<compile_context>
chip_gen: v7x
topology: tpu7x:2x2x1
jax: 0.10.0
libtpu: 0.0.40
codegen_flags: <defaults>
</compile_context>

<pallas_src>
import functools

import jax
import jax.numpy as jnp
from jax.experimental import pallas as pl
from jax.experimental.pallas import tpu as pltpu

LANE = 128


def _round_up(x, m):
    return (x + m - 1) // m * m


# ============================================================================
# The fused forward kernel (everything stays in VMEM / vregs)
# ============================================================================
def _sscunet_kernel(*refs, treedef, n_leaves):
    x_ref = refs[0]
    p = jax.tree_util.tree_unflatten(treedef, refs[1:1 + n_leaves])
    o_ref = refs[1 + n_leaves]

    f32, bf16 = jnp.float32, jnp.bfloat16

    def conv(groups, w_ref, b_ref, shift, relu):
        """Conv with row taps + split-K groups collapsed into ONE MXU matmul.

        groups : list of f32 (M, Kp) activations (torch.cat replaced by split-K groups).
        shift  : None (1x1 conv / 1-row images) or (up_ref, dn_ref) constant row-shift
                 matrices implementing the +/-1 row taps with zero padding at image
                 boundaries folded in.
        """
        pieces = []
        for g in groups:
            gb = g.astype(bf16)
            pieces.append(gb)
            if shift is not None:
                u_ref, d_ref = shift
                pieces.append(jnp.dot(u_ref[...], gb,
                                      preferred_element_type=f32).astype(bf16))
                pieces.append(jnp.dot(d_ref[...], gb,
                                      preferred_element_type=f32).astype(bf16))
        xcat = pieces[0] if len(pieces) == 1 else jnp.concatenate(pieces, axis=1)
        acc = jnp.dot(xcat, w_ref[...], preferred_element_type=f32) + b_ref[...]
        return jnp.maximum(acc, 0.0) if relu else acc

    def scb(groups, prm, shift):
        h = conv(groups, prm["w1"], prm["b1"], shift, True)
        return conv([h], prm["w2"], prm["b2"], shift, True)

    def down(x, prm, g_ref):
        # Stride-4 conv: gather the 4 row phases with constant selection matrices,
        # lane-concatenate and do one matmul against the stacked 4x4 weight.
        xb = x.astype(bf16)
        pieces = [jnp.dot(g_ref[dr], xb,
                          preferred_element_type=f32).astype(bf16)
                  for dr in range(4)]
        xcat = jnp.concatenate(pieces, axis=1)
        return jnp.dot(xcat, prm["w"][...], preferred_element_type=f32) + prm["b"][...]

    def up(x, prm, t_ref):
        # Stride-4 ConvTranspose: one matmul producing the 4 output-row phases packed
        # along lanes, then scatter them back to rows with constant selection matrices.
        res = jnp.dot(x.astype(bf16), prm["w"][...],
                      preferred_element_type=f32) + prm["b"][...]
        n = res.shape[1] // 4       # per-output-row lane width (a multiple of 128)
        out = None
        for dr in range(4):
            piece = res[:, dr * n:(dr + 1) * n].astype(bf16)
            o = jnp.dot(t_ref[dr], piece, preferred_element_type=f32)
            out = o if out is None else out + o
        return out

    mix = p["mix"]
    sh_f = (mix["uf"], mix["df"])                              # full resolution
    sh_q = (mix["uq"], mix["dq"])                              # 1/4 resolution
    sh_s = (mix["us"], mix["ds"]) if "us" in mix else None     # 1/16 resolution

    x = x_ref[...].astype(f32)

    # ------------------------------ encoder ------------------------------
    a1 = scb([x], p["scb_d1"], sh_f)                  # (B*H,    W*C)
    d1 = down(a1, p["down1"], mix["g1"])              # (B*H/4,  (W/4)*C)
    a2 = scb([d1], p["scb_d2"], sh_q)                 # (B*H/4,  (W/4)*4C)
    r1 = up(a2, p["restore"], mix["s4"])              # (B*H,    W*C)
    c1 = conv([a1 + r1], p["dcp1"]["w"], p["dcp1"]["b"], sh_f, True)
    c2 = conv([a2], p["dcp2"]["w"], p["dcp2"]["b"], sh_q, True)
    d2 = down(a2, p["down2"], mix["g2"])              # (B*H/16, (W/16)*4C)
    a3 = scb([d2], p["bott"], sh_s)                   # (B*H/16, (W/16)*8C)

    # ------------------------------ decoder ------------------------------
    u1 = up(a3, p["up1"], mix["s16"])                 # (B*H/4,  (W/4)*4C)
    r2 = up(u1, p["restore"], mix["s4"])              # (B*H,    W*C)
    a4 = scb([u1, c2], p["scb_u1"], sh_q)             # torch.cat -> split-K groups
    u2 = up(a4, p["up2"], mix["s4"])                  # (B*H,    W*C)
    a5 = scb([u2, c1 + r2], p["scb_u2"], sh_f)        # torch.cat -> split-K groups
    y = conv([a5], p["final"]["w"], p["final"]["b"], None, False)

    o_ref[...] = y.astype(o_ref.dtype)


# ============================================================================
# pallas_call wrapper
# ============================================================================
def sscunet_forward(params, x_nhwc, *, out_channels):
    """x_nhwc: (B, H, W, Cin) -- equivalent to a PyTorch NCHW input (B, Cin, H, W)."""
    B, H, W, cin = x_nhwc.shape
    x2d = x_nhwc.reshape(B * H, W * cin).astype(jnp.float32)
    x2d = jnp.pad(x2d, ((0, 0), (0, _round_up(W * cin, LANE) - W * cin)))

    n_out = _round_up(W * out_channels, LANE)
    leaves, treedef = jax.tree_util.tree_flatten(params)

    out = pl.pallas_call(
        functools.partial(_sscunet_kernel, treedef=treedef, n_leaves=len(leaves)),
        out_shape=jax.ShapeDtypeStruct((B * H, n_out), jnp.float32),
        compiler_params=pltpu.CompilerParams(vmem_limit_bytes=32 * 1024 * 1024),
    )(x2d, *leaves)

    return out[:, :W * out_channels].reshape(B, H, W, out_channels)


# ============================================================================
# One-time weight transforms (block-Toeplitz matmul forms, padded once at init)
# ============================================================================
def _toeplitz3(k, W):
    """(3,3,Cin,Cout) HWIO conv kernel -> 3 per-row-tap (Kp, W*Cout) matrices."""
    kh, kw, cin, cout = k.shape
    kp = _round_up(W * cin, LANE)
    mats = []
    for di in range(kh):
        t = jnp.zeros((W, cin, W, cout), jnp.float32)
        for dj in range(kw):
            d = jnp.eye(W, W, k=1 - dj, dtype=jnp.float32)   # d[w_in,w_out]=1 iff w_in==w_out+dj-1
            t = t + d[:, None, :, None] * k[di, dj][None, :, None, :]
        m = t.reshape(W * cin, W * cout)
        mats.append(jnp.pad(m, ((0, kp - W * cin), (0, 0))))
    return mats


def _conv3x3_weight(k, W, H, group_slices):
    """Stack taps ([center, up, down]) x channel groups along K; pad N to a lane mult."""
    cout = k.shape[-1]
    npad = _round_up(W * cout, LANE)
    order = [1, 0, 2] if H > 1 else [1]   # 1-row images: only the centre tap survives
    blocks = []
    for (s, l) in group_slices:
        taps = _toeplitz3(k[:, :, s:s + l, :], W)
        blocks += [taps[di] for di in order]
    m = jnp.concatenate(blocks, axis=0)
    return jnp.pad(m, ((0, 0), (0, npad - W * cout))).astype(jnp.bfloat16)


def _down4_weight(k, W):
    """(4,4,Cin,Cout) stride-4 conv acting on 4 lane-concatenated row phases."""
    kh, kw, cin, cout = k.shape
    wo = W // kw
    kp = _round_up(W * cin, LANE)
    npad = _round_up(wo * cout, LANE)
    blocks = []
    for dr in range(kh):
        t = jnp.zeros((W, cin, wo, cout), jnp.float32)
        for dj in range(kw):
            d = (jnp.arange(W)[:, None] == (kw * jnp.arange(wo)[None, :] + dj))
            t = t + d.astype(jnp.float32)[:, None, :, None] * k[dr, dj][None, :, None, :]
        blocks.append(jnp.pad(t.reshape(W * cin, wo * cout), ((0, kp - W * cin), (0, 0))))
    m = jnp.concatenate(blocks, axis=0)
    return jnp.pad(m, ((0, 0), (0, npad - wo * cout))).astype(jnp.bfloat16)


def _up4_weight(k, W):
    """(Cin,4,4,Cout) stride-4 ConvTranspose -> (Kp, 16*W*Cout) packed-row form."""
    cin, kh, kw, cout = k.shape
    kp = _round_up(W * cin, LANE)
    t = jnp.zeros((W, cin, kh, kw * W, cout), jnp.float32)
    for dj in range(kw):
        d = (jnp.arange(kw * W)[None, :] == (kw * jnp.arange(W)[:, None] + dj))
        t = t + d.astype(jnp.float32)[:, None, None, :, None] \
                * k[:, :, dj, :][None, :, :, None, :]
    m = t.reshape(W * cin, kh * kw * W * cout)
    return jnp.pad(m, ((0, kp - W * cin), (0, 0))).astype(jnp.bfloat16)


def _conv1x1_weight(k2d, W):
    cin, cout = k2d.shape
    kp = _round_up(W * cin, LANE)
    npad = _round_up(W * cout, LANE)
    d = jnp.eye(W, dtype=jnp.float32)
    m = (d[:, None, :, None] * k2d[None, :, None, :]).reshape(W * cin, W * cout)
    return jnp.pad(m, ((0, kp - W * cin), (0, npad - W * cout))).astype(jnp.bfloat16)


def _bias(b, reps, npad):
    v = jnp.tile(b, reps)
    return jnp.pad(v, (0, npad - v.shape[0])).reshape(1, -1).astype(jnp.float32)


# ---- constant 0/1 row-mixing matrices (run on the MXU; replace halos / strided slices)
def _shift_mats(M, H):
    """up[r,r-1]=1 except first row of each image; dn[r,r+1]=1 except last row."""
    r = jnp.arange(M)
    up = ((r[:, None] - 1) == r[None, :]) & ((r % H) != 0)[:, None]
    dn = ((r[:, None] + 1) == r[None, :]) & ((r % H) != (H - 1))[:, None]
    return up.astype(jnp.bfloat16), dn.astype(jnp.bfloat16)


def _gather4(R, M):
    """(4, R, M): phase dr selects input rows 4*i + dr (stride-4 downsample)."""
    eye = jnp.eye(M, dtype=jnp.float32)
    return eye.reshape(R, 4, M).transpose(1, 0, 2).astype(jnp.bfloat16)


def _scatter4(R):
    """(4, 4R, R): phase dr scatters row i to output row 4*i + dr (stride-4 upsample)."""
    eye = jnp.eye(R, dtype=jnp.float32)
    t = jnp.zeros((4, 4 * R, R), jnp.float32)
    for dr in range(4):
        t = t.at[dr, dr::4, :].set(eye)
    return t.astype(jnp.bfloat16)


# ============================================================================
# Parameter init (deterministic, PyTorch-like uniform(-1/sqrt(fan_in), +))
# ============================================================================
def _conv_param(key, kh, kw, cin, cout):
    k1, k2 = jax.random.split(key)
    bound = 1.0 / float(kh * kw * cin) ** 0.5
    w = jax.random.uniform(k1, (kh, kw, cin, cout), jnp.float32, -bound, bound)
    b = jax.random.uniform(k2, (cout,), jnp.float32, -bound, bound)
    return w, b


def _deconv_param(key, cin, cout):
    k1, k2 = jax.random.split(key)
    bound = 1.0 / float(16 * cin) ** 0.5
    w = jax.random.uniform(k1, (cin, 4, 4, cout), jnp.float32, -bound, bound)
    b = jax.random.uniform(k2, (cout,), jnp.float32, -bound, bound)
    return w, b


def init_params(key, in_channels, out_channels, channels, B, H, W):
    """Init + one-time transform of every weight into its fused matmul form,
    specialised to the batch / spatial size (done once, outside the kernel)."""
    C = channels
    H4, W4, H16, W16 = H // 4, W // 4, H // 16, W // 16
    keys = iter(jax.random.split(key, 32))

    def scb(cin, cout, Wsite, Hsite, group_slices):
        w1, b1 = _conv_param(next(keys), 3, 3, cin, cout)
        w2, b2 = _conv_param(next(keys), 3, 3, cout, cout)
        npad = _round_up(Wsite * cout, LANE)
        return {"w1": _conv3x3_weight(w1, Wsite, Hsite, group_slices),
                "b1": _bias(b1, Wsite, npad),
                "w2": _conv3x3_weight(w2, Wsite, Hsite, [(0, cout)]),
                "b2": _bias(b2, Wsite, npad)}

    def dcp(c, Wsite, Hsite):
        # ReLU(conv1x3 + conv3x1) == ReLU(conv3x3 with a cross-shaped kernel)
        wh, bh = _conv_param(next(keys), 1, 3, c, c)
        wv, bv = _conv_param(next(keys), 3, 1, c, c)
        cross = jnp.zeros((3, 3, c, c), jnp.float32)
        cross = cross.at[1, :, :, :].set(wh[0])
        cross = cross.at[:, 1, :, :].add(wv[:, 0])
        return {"w": _conv3x3_weight(cross, Wsite, Hsite, [(0, c)]),
                "b": _bias(bh + bv, Wsite, _round_up(Wsite * c, LANE))}

    def down(c, Wsite):
        w, b = _conv_param(next(keys), 4, 4, c, c)
        return {"w": _down4_weight(w, Wsite),
                "b": _bias(b, Wsite // 4, _round_up((Wsite // 4) * c, LANE))}

    def up(cin, cout, Wsite):
        w, b = _deconv_param(next(keys), cin, cout)
        return {"w": _up4_weight(w, Wsite),
                "b": _bias(b, 16 * Wsite, 16 * Wsite * cout)}

    p = {}
    p["scb_d1"] = scb(in_channels, C, W, H, [(0, in_channels)])
    p["down1"] = down(C, W)
    p["scb_d2"] = scb(C, 4 * C, W4, H4, [(0, C)])
    p["restore"] = up(4 * C, C, W4)
    p["dcp1"] = dcp(C, W, H)
    p["dcp2"] = dcp(4 * C, W4, H4)
    p["down2"] = down(4 * C, W4)
    p["bott"] = scb(4 * C, 8 * C, W16, H16, [(0, 4 * C)])
    p["up1"] = up(8 * C, 4 * C, W16)
    p["up2"] = up(4 * C, C, W4)
    # torch.cat([u1, c2], 1) -> two split-K groups sharing one stacked weight
    p["scb_u1"] = scb(8 * C, 4 * C, W4, H4, [(0, 4 * C), (4 * C, 4 * C)])
    # torch.cat([u2, connection_1], 1) -> two split-K groups
    p["scb_u2"] = scb(2 * C, C, W, H, [(0, C), (C, C)])
    wf, bfin = _conv_param(next(keys), 1, 1, C, out_channels)
    p["final"] = {"w": _conv1x1_weight(wf[0, 0], W),
                  "b": _bias(bfin, W, _round_up(W * out_channels, LANE))}

    mix = {"g1": _gather4(B * H4, B * H), "g2": _gather4(B * H16, B * H4),
           "s4": _scatter4(B * H4), "s16": _scatter4(B * H16)}
    mix["uf"], mix["df"] = _shift_mats(B * H, H)
    mix["uq"], mix["dq"] = _shift_mats(B * H4, H4)
    if H16 > 1:
        mix["us"], mix["ds"] = _shift_mats(B * H16, H16)
    p["mix"] = mix
    return p


if __name__ == "__main__":
    key = jax.random.PRNGKey(0)
    pkey, xkey = jax.random.split(key)

    in_channels, out_channels, channels = 3, 2, 8
    B, H, W = 2, 16, 16                      # spatial must be divisible by 16

    params = init_params(pkey, in_channels, out_channels, channels, B, H, W)
    # NHWC input; equivalent to a PyTorch NCHW input of shape (2, 3, 16, 16).
    x = jax.random.normal(xkey, (B, H, W, in_channels), jnp.float32)

    fwd = jax.jit(functools.partial(sscunet_forward, out_channels=out_channels))
    y = fwd(params, x)
    y = jax.block_until_ready(y)
    assert y.shape == (B, H, W, out_channels), y.shape
    assert bool(jnp.all(jnp.isfinite(y)))
    print("KERNEL_OK")
</pallas_src>

<mosaic_0001>
module attributes {stable_mosaic.version = 11 : i64} {
  func.func @_sscunet_kernel(%arg0: memref<32x128xf32, #tpu.memory_space<vmem>>, %arg1: memref<1x128xf32, #tpu.memory_space<vmem>>, %arg2: memref<1x128xf32, #tpu.memory_space<vmem>>, %arg3: memref<128x128xbf16, #tpu.memory_space<vmem>>, %arg4: memref<128x128xbf16, #tpu.memory_space<vmem>>, %arg5: memref<1x128xf32, #tpu.memory_space<vmem>>, %arg6: memref<384x128xbf16, #tpu.memory_space<vmem>>, %arg7: memref<1x128xf32, #tpu.memory_space<vmem>>, %arg8: memref<384x128xbf16, #tpu.memory_space<vmem>>, %arg9: memref<1x128xf32, #tpu.memory_space<vmem>>, %arg10: memref<512x128xbf16, #tpu.memory_space<vmem>>, %arg11: memref<1x128xf32, #tpu.memory_space<vmem>>, %arg12: memref<512x128xbf16, #tpu.memory_space<vmem>>, %arg13: memref<1x128xf32, #tpu.memory_space<vmem>>, %arg14: memref<128x128xbf16, #tpu.memory_space<vmem>>, %arg15: memref<32x32xbf16, #tpu.memory_space<vmem>>, %arg16: memref<8x8xbf16, #tpu.memory_space<vmem>>, %arg17: memref<4x8x32xbf16, #tpu.memory_space<vmem>>, %arg18: memref<4x2x8xbf16, #tpu.memory_space<vmem>>, %arg19: memref<4x8x2xbf16, #tpu.memory_space<vmem>>, %arg20: memref<4x32x8xbf16, #tpu.memory_space<vmem>>, %arg21: memref<32x32xbf16, #tpu.memory_space<vmem>>, %arg22: memref<8x8xbf16, #tpu.memory_space<vmem>>, %arg23: memref<1x512xf32, #tpu.memory_space<vmem>>, %arg24: memref<128x512xbf16, #tpu.memory_space<vmem>>, %arg25: memref<1x128xf32, #tpu.memory_space<vmem>>, %arg26: memref<1x128xf32, #tpu.memory_space<vmem>>, %arg27: memref<384x128xbf16, #tpu.memory_space<vmem>>, %arg28: memref<384x128xbf16, #tpu.memory_space<vmem>>, %arg29: memref<1x128xf32, #tpu.memory_space<vmem>>, %arg30: memref<1x128xf32, #tpu.memory_space<vmem>>, %arg31: memref<384x128xbf16, #tpu.memory_space<vmem>>, %arg32: memref<384x128xbf16, #tpu.memory_space<vmem>>, %arg33: memref<1x128xf32, #tpu.memory_space<vmem>>, %arg34: memref<1x128xf32, #tpu.memory_space<vmem>>, %arg35: memref<768x128xbf16, #tpu.memory_space<vmem>>, %arg36: memref<384x128xbf16, #tpu.memory_space<vmem>>, %arg37: memref<1x128xf32, #tpu.memory_space<vmem>>, %arg38: memref<1x128xf32, #tpu.memory_space<vmem>>, %arg39: memref<768x128xbf16, #tpu.memory_space<vmem>>, %arg40: memref<384x128xbf16, #tpu.memory_space<vmem>>, %arg41: memref<1x512xf32, #tpu.memory_space<vmem>>, %arg42: memref<128x512xbf16, #tpu.memory_space<vmem>>, %arg43: memref<1x512xf32, #tpu.memory_space<vmem>>, %arg44: memref<128x512xbf16, #tpu.memory_space<vmem>>, %arg45: memref<32x128xf32, #tpu.memory_space<vmem>>) attributes {dimension_semantics = [], scalar_prefetch = 0 : i64, scratch_operands = 0 : i64, tpu.core_type = #tpu.core_type<tc>} {
    %c0 = arith.constant 0 : index
    %c0_0 = arith.constant 0 : index
    %0 = vector.load %arg0[%c0, %c0_0] : memref<32x128xf32, #tpu.memory_space<vmem>>, vector<32x128xf32>
    %1 = arith.truncf %0 : vector<32x128xf32> to vector<32x128xbf16>
    %c0_1 = arith.constant 0 : index
    %c0_2 = arith.constant 0 : index
    %2 = vector.load %arg21[%c0_1, %c0_2] : memref<32x32xbf16, #tpu.memory_space<vmem>>, vector<32x32xbf16>
    %cst = arith.constant dense<0.000000e+00> : vector<32x128xf32>
    %3 = tpu.matmul %2, %1, %cst {dimension_numbers = #tpu.dot_dimension_numbers<[1], [0], [0], [1], [0, 0, 1, 1], [], []>} : vector<32x32xbf16>, vector<32x128xbf16>, vector<32x128xf32> -> vector<32x128xf32>
    %4 = arith.truncf %3 : vector<32x128xf32> to vector<32x128xbf16>
    %c0_3 = arith.constant 0 : index
    %c0_4 = arith.constant 0 : index
    %5 = vector.load %arg15[%c0_3, %c0_4] : memref<32x32xbf16, #tpu.memory_space<vmem>>, vector<32x32xbf16>
    %cst_5 = arith.constant dense<0.000000e+00> : vector<32x128xf32>
    %6 = tpu.matmul %5, %1, %cst_5 {dimension_numbers = #tpu.dot_dimension_numbers<[1], [0], [0], [1], [0, 0, 1, 1], [], []>} : vector<32x32xbf16>, vector<32x128xbf16>, vector<32x128xf32> -> vector<32x128xf32>
    %7 = arith.truncf %6 : vector<32x128xf32> to vector<32x128xbf16>
    %8 = tpu.concatenate %1, %4, %7 in 1 : vector<32x128xbf16>, vector<32x128xbf16>, vector<32x128xbf16> -> vector<32x384xbf16>
    %c0_6 = arith.constant 0 : index
    %c0_7 = arith.constant 0 : index
    %9 = vector.load %arg27[%c0_6, %c0_7] : memref<384x128xbf16, #tpu.memory_space<vmem>>, vector<384x128xbf16>
    %cst_8 = arith.constant dense<0.000000e+00> : vector<32x128xf32>
    %10 = tpu.matmul %8, %9, %cst_8 {dimension_numbers = #tpu.dot_dimension_numbers<[1], [0], [0], [1], [0, 0, 1, 1], [], []>} : vector<32x384xbf16>, vector<384x128xbf16>, vector<32x128xf32> -> vector<32x128xf32>
    %c0_9 = arith.constant 0 : index
    %c0_10 = arith.constant 0 : index
    %11 = vector.load %arg25[%c0_9, %c0_10] : memref<1x128xf32, #tpu.memory_space<vmem>>, vector<1x128xf32>
    %12 = vector.broadcast %11 : vector<1x128xf32> to vector<32x128xf32>
    %13 = arith.addf %10, %12 : vector<32x128xf32>
    %cst_11 = arith.constant 0.000000e+00 : f32
    %14 = vector.broadcast %cst_11 : f32 to vector<32x128xf32>
    %15 = arith.maximumf %13, %14 : vector<32x128xf32>
    %16 = arith.truncf %15 : vector<32x128xf32> to vector<32x128xbf16>
    %c0_12 = arith.constant 0 : index
    %c0_13 = arith.constant 0 : index
    %17 = vector.load %arg21[%c0_12, %c0_13] : memref<32x32xbf16, #tpu.memory_space<vmem>>, vector<32x32xbf16>
    %cst_14 = arith.constant dense<0.000000e+00> : vector<32x128xf32>
    %18 = tpu.matmul %17, %16, %cst_14 {dimension_numbers = #tpu.dot_dimension_numbers<[1], [0], [0], [1], [0, 0, 1, 1], [], []>} : vector<32x32xbf16>, vector<32x128xbf16>, vector<32x128xf32> -> vector<32x128xf32>
    %19 = arith.truncf %18 : vector<32x128xf32> to vector<32x128xbf16>
    %c0_15 = arith.constant 0 : index
    %c0_16 = arith.constant 0 : index
    %20 = vector.load %arg15[%c0_15, %c0_16] : memref<32x32xbf16, #tpu.memory_space<vmem>>, vector<32x32xbf16>
    %cst_17 = arith.constant dense<0.000000e+00> : vector<32x128xf32>
    %21 = tpu.matmul %20, %16, %cst_17 {dimension_numbers = #tpu.dot_dimension_numbers<[1], [0], [0], [1], [0, 0, 1, 1], [], []>} : vector<32x32xbf16>, vector<32x128xbf16>, vector<32x128xf32> -> vector<32x128xf32>
    %22 = arith.truncf %21 : vector<32x128xf32> to vector<32x128xbf16>
    %23 = tpu.concatenate %16, %19, %22 in 1 : vector<32x128xbf16>, vector<32x128xbf16>, vector<32x128xbf16> -> vector<32x384xbf16>
    %c0_18 = arith.constant 0 : index
    %c0_19 = arith.constant 0 : index
    %24 = vector.load %arg28[%c0_18, %c0_19] : memref<384x128xbf16, #tpu.memory_space<vmem>>, vector<384x128xbf16>
    %cst_20 = arith.constant dense<0.000000e+00> : vector<32x128xf32>
    %25 = tpu.matmul %23, %24, %cst_20 {dimension_numbers = #tpu.dot_dimension_numbers<[1], [0], [0], [1], [0, 0, 1, 1], [], []>} : vector<32x384xbf16>, vector<384x128xbf16>, vector<32x128xf32> -> vector<32x128xf32>
    %c0_21 = arith.constant 0 : index
    %c0_22 = arith.constant 0 : index
    %26 = vector.load %arg26[%c0_21, %c0_22] : memref<1x128xf32, #tpu.memory_space<vmem>>, vector<1x128xf32>
    %27 = vector.broadcast %26 : vector<1x128xf32> to vector<32x128xf32>
    %28 = arith.addf %25, %27 : vector<32x128xf32>
    %cst_23 = arith.constant 0.000000e+00 : f32
    %29 = vector.broadcast %cst_23 : f32 to vector<32x128xf32>
    %30 = arith.maximumf %28, %29 : vector<32x128xf32>
    %31 = arith.truncf %30 : vector<32x128xf32> to vector<32x128xbf16>
    %c0_24 = arith.constant 0 : index
    %c0_25 = arith.constant 0 : index
    %c0_26 = arith.constant 0 : index
    %32 = vector.load %arg17[%c0_24, %c0_25, %c0_26] : memref<4x8x32xbf16, #tpu.memory_space<vmem>>, vector<1x8x32xbf16>
    %33 = vector.shape_cast %32 : vector<1x8x32xbf16> to vector<8x32xbf16>
    %cst_27 = arith.constant dense<0.000000e+00> : vector<8x128xf32>
    %34 = tpu.matmul %33, %31, %cst_27 {dimension_numbers = #tpu.dot_dimension_numbers<[1], [0], [0], [1], [0, 0, 1, 1], [], []>} : vector<8x32xbf16>, vector<32x128xbf16>, vector<8x128xf32> -> vector<8x128xf32>
    %35 = arith.truncf %34 : vector<8x128xf32> to vector<8x128xbf16>
    %c1 = arith.constant 1 : index
    %c0_28 = arith.constant 0 : index
    %c0_29 = arith.constant 0 : index
    %36 = vector.load %arg17[%c1, %c0_28, %c0_29] : memref<4x8x32xbf16, #tpu.memory_space<vmem>>, vector<1x8x32xbf16>
    %37 = vector.shape_cast %36 : vector<1x8x32xbf16> to vector<8x32xbf16>
    %cst_30 = arith.constant dense<0.000000e+00> : vector<8x128xf32>
    %38 = tpu.matmul %37, %31, %cst_30 {dimension_numbers = #tpu.dot_dimension_numbers<[1], [0], [0], [1], [0, 0, 1, 1], [], []>} : vector<8x32xbf16>, vector<32x128xbf16>, vector<8x128xf32> -> vector<8x128xf32>
    %39 = arith.truncf %38 : vector<8x128xf32> to vector<8x128xbf16>
    %c2 = arith.constant 2 : index
    %c0_31 = arith.constant 0 : index
    %c0_32 = arith.constant 0 : index
    %40 = vector.load %arg17[%c2, %c0_31, %c0_32] : memref<4x8x32xbf16, #tpu.memory_space<vmem>>, vector<1x8x32xbf16>
    %41 = vector.shape_cast %40 : vector<1x8x32xbf16> to vector<8x32xbf16>
    %cst_33 = arith.constant dense<0.000000e+00> : vector<8x128xf32>
    %42 = tpu.matmul %41, %31, %cst_33 {dimension_numbers = #tpu.dot_dimension_numbers<[1], [0], [0], [1], [0, 0, 1, 1], [], []>} : vector<8x32xbf16>, vector<32x128xbf16>, vector<8x128xf32> -> vector<8x128xf32>
    %43 = arith.truncf %42 : vector<8x128xf32> to vector<8x128xbf16>
    %c3 = arith.constant 3 : index
    %c0_34 = arith.constant 0 : index
    %c0_35 = arith.constant 0 : index
    %44 = vector.load %arg17[%c3, %c0_34, %c0_35] : memref<4x8x32xbf16, #tpu.memory_space<vmem>>, vector<1x8x32xbf16>
    %45 = vector.shape_cast %44 : vector<1x8x32xbf16> to vector<8x32xbf16>
    %cst_36 = arith.constant dense<0.000000e+00> : vector<8x128xf32>
    %46 = tpu.matmul %45, %31, %cst_36 {dimension_numbers = #tpu.dot_dimension_numbers<[1], [0], [0], [1], [0, 0, 1, 1], [], []>} : vector<8x32xbf16>, vector<32x128xbf16>, vector<8x128xf32> -> vector<8x128xf32>
    %47 = arith.truncf %46 : vector<8x128xf32> to vector<8x128xbf16>
    %48 = tpu.concatenate %35, %39, %43, %47 in 1 : vector<8x128xbf16>, vector<8x128xbf16>, vector<8x128xbf16>, vector<8x128xbf16> -> vector<8x512xbf16>
    %c0_37 = arith.constant 0 : index
    %c0_38 = arith.constant 0 : index
    %49 = vector.load %arg10[%c0_37, %c0_38] : memref<512x128xbf16, #tpu.memory_space<vmem>>, vector<512x128xbf16>
    %cst_39 = arith.constant dense<0.000000e+00> : vector<8x128xf32>
    %50 = tpu.matmul %48, %49, %cst_39 {dimension_numbers = #tpu.dot_dimension_numbers<[1], [0], [0], [1], [0, 0, 1, 1], [], []>} : vector<8x512xbf16>, vector<512x128xbf16>, vector<8x128xf32> -> vector<8x128xf32>
    %c0_40 = arith.constant 0 : index
    %c0_41 = arith.constant 0 : index
    %51 = vector.load %arg9[%c0_40, %c0_41] : memref<1x128xf32, #tpu.memory_space<vmem>>, vector<1x128xf32>
    %52 = vector.broadcast %51 : vector<1x128xf32> to vector<8x128xf32>
    %53 = arith.addf %50, %52 : vector<8x128xf32>
    %54 = arith.truncf %53 : vector<8x128xf32> to vector<8x128xbf16>
    %c0_42 = arith.constant 0 : index
    %c0_43 = arith.constant 0 : index
    %55 = vector.load %arg22[%c0_42, %c0_43] : memref<8x8xbf16, #tpu.memory_space<vmem>>, vector<8x8xbf16>
    %cst_44 = arith.constant dense<0.000000e+00> : vector<8x128xf32>
    %56 = tpu.matmul %55, %54, %cst_44 {dimension_numbers = #tpu.dot_dimension_numbers<[1], [0], [0], [1], [0, 0, 1, 1], [], []>} : vector<8x8xbf16>, vector<8x128xbf16>, vector<8x128xf32> -> vector<8x128xf32>
    %57 = arith.truncf %56 : vector<8x128xf32> to vector<8x128xbf16>
    %c0_45 = arith.constant 0 : index
    %c0_46 = arith.constant 0 : index
    %58 = vector.load %arg16[%c0_45, %c0_46] : memref<8x8xbf16, #tpu.memory_space<vmem>>, vector<8x8xbf16>
    %cst_47 = arith.constant dense<0.000000e+00> : vector<8x128xf32>
    %59 = tpu.matmul %58, %54, %cst_47 {dimension_numbers = #tpu.dot_dimension_numbers<[1], [0], [0], [1], [0, 0, 1, 1], [], []>} : vector<8x8xbf16>, vector<8x128xbf16>, vector<8x128xf32> -> vector<8x128xf32>
    %60 = arith.truncf %59 : vector<8x128xf32> to vector<8x128xbf16>
    %61 = tpu.concatenate %54, %57, %60 in 1 : vector<8x128xbf16>, vector<8x128xbf16>, vector<8x128xbf16> -> vector<8x384xbf16>
    %c0_48 = arith.constant 0 : index
    %c0_49 = arith.constant 0 : index
    %62 = vector.load %arg31[%c0_48, %c0_49] : memref<384x128xbf16, #tpu.memory_space<vmem>>, vector<384x128xbf16>
    %cst_50 = arith.constant dense<0.000000e+00> : vector<8x128xf32>
    %63 = tpu.matmul %61, %62, %cst_50 {dimension_numbers = #tpu.dot_dimension_numbers<[1], [0], [0], [1], [0, 0, 1, 1], [], []>} : vector<8x384xbf16>, vector<384x128xbf16>, vector<8x128xf32> -> vector<8x128xf32>
    %c0_51 = arith.constant 0 : index
    %c0_52 = arith.constant 0 : index
    %64 = vector.load %arg29[%c0_51, %c0_52] : memref<1x128xf32, #tpu.memory_space<vmem>>, vector<1x128xf32>
    %65 = vector.broadcast %64 : vector<1x128xf32> to vector<8x128xf32>
    %66 = arith.addf %63, %65 : vector<8x128xf32>
    %cst_53 = arith.constant 0.000000e+00 : f32
    %67 = vector.broadcast %cst_53 : f32 to vector<8x128xf32>
    %68 = arith.maximumf %66, %67 : vector<8x128xf32>
    %69 = arith.truncf %68 : vector<8x128xf32> to vector<8x128xbf16>
    %c0_54 = arith.constant 0 : index
    %c0_55 = arith.constant 0 : index
    %70 = vector.load %arg22[%c0_54, %c0_55] : memref<8x8xbf16, #tpu.memory_space<vmem>>, vector<8x8xbf16>
    %cst_56 = arith.constant dense<0.000000e+00> : vector<8x128xf32>
    %71 = tpu.matmul %70, %69, %cst_56 {dimension_numbers = #tpu.dot_dimension_numbers<[1], [0], [0], [1], [0, 0, 1, 1], [], []>} : vector<8x8xbf16>, vector<8x128xbf16>, vector<8x128xf32> -> vector<8x128xf32>
    %72 = arith.truncf %71 : vector<8x128xf32> to vector<8x128xbf16>
    %c0_57 = arith.constant 0 : index
    %c0_58 = arith.constant 0 : index
    %73 = vector.load %arg16[%c0_57, %c0_58] : memref<8x8xbf16, #tpu.memory_space<vmem>>, vector<8x8xbf16>
    %cst_59 = arith.constant dense<0.000000e+00> : vector<8x128xf32>
    %74 = tpu.matmul %73, %69, %cst_59 {dimension_numbers = #tpu.dot_dimension_numbers<[1], [0], [0], [1], [0, 0, 1, 1], [], []>} : vector<8x8xbf16>, vector<8x128xbf16>, vector<8x128xf32> -> vector<8x128xf32>
    %75 = arith.truncf %74 : vector<8x128xf32> to vector<8x128xbf16>
    %76 = tpu.concatenate %69, %72, %75 in 1 : vector<8x128xbf16>, vector<8x128xbf16>, vector<8x128xbf16> -> vector<8x384xbf16>
    %c0_60 = arith.constant 0 : index
    %c0_61 = arith.constant 0 : index
    %77 = vector.load %arg32[%c0_60, %c0_61] : memref<384x128xbf16, #tpu.memory_space<vmem>>, vector<384x128xbf16>
    %cst_62 = arith.constant dense<0.000000e+00> : vector<8x128xf32>
    %78 = tpu.matmul %76, %77, %cst_62 {dimension_numbers = #tpu.dot_dimension_numbers<[1], [0], [0], [1], [0, 0, 1, 1], [], []>} : vector<8x384xbf16>, vector<384x128xbf16>, vector<8x128xf32> -> vector<8x128xf32>
    %c0_63 = arith.constant 0 : index
    %c0_64 = arith.constant 0 : index
    %79 = vector.load %arg30[%c0_63, %c0_64] : memref<1x128xf32, #tpu.memory_space<vmem>>, vector<1x128xf32>
    %80 = vector.broadcast %79 : vector<1x128xf32> to vector<8x128xf32>
    %81 = arith.addf %78, %80 : vector<8x128xf32>
    %cst_65 = arith.constant 0.000000e+00 : f32
    %82 = vector.broadcast %cst_65 : f32 to vector<8x128xf32>
    %83 = arith.maximumf %81, %82 : vector<8x128xf32>
    %84 = arith.truncf %83 : vector<8x128xf32> to vector<8x128xbf16>
    %c0_66 = arith.constant 0 : index
    %c0_67 = arith.constant 0 : index
    %85 = vector.load %arg24[%c0_66, %c0_67] : memref<128x512xbf16, #tpu.memory_space<vmem>>, vector<128x512xbf16>
    %cst_68 = arith.constant dense<0.000000e+00> : vector<8x512xf32>
    %86 = tpu.matmul %84, %85, %cst_68 {dimension_numbers = #tpu.dot_dimension_numbers<[1], [0], [0], [1], [0, 0, 1, 1], [], []>} : vector<8x128xbf16>, vector<128x512xbf16>, vector<8x512xf32> -> vector<8x512xf32>
    %c0_69 = arith.constant 0 : index
    %c0_70 = arith.constant 0 : index
    %87 = vector.load %arg23[%c0_69, %c0_70] : memref<1x512xf32, #tpu.memory_space<vmem>>, vector<1x512xf32>
    %88 = vector.broadcast %87 : vector<1x512xf32> to vector<8x512xf32>
    %89 = arith.addf %86, %88 : vector<8x512xf32>
    %90 = vector.extract_strided_slice %89 {offsets = [0, 0], sizes = [8, 128], strides = [1, 1]} : vector<8x512xf32> to vector<8x128xf32>
    %91 = arith.truncf %90 : vector<8x128xf32> to vector<8x128xbf16>
    %c0_71 = arith.constant 0 : index
    %c0_72 = arith.constant 0 : index
    %c0_73 = arith.constant 0 : index
    %92 = vector.load %arg20[%c0_71, %c0_72, %c0_73] : memref<4x32x8xbf16, #tpu.memory_space<vmem>>, vector<1x32x8xbf16>
    %93 = vector.shape_cast %92 : vector<1x32x8xbf16> to vector<32x8xbf16>
    %cst_74 = arith.constant dense<0.000000e+00> : vector<32x128xf32>
    %94 = tpu.matmul %93, %91, %cst_74 {dimension_numbers = #tpu.dot_dimension_numbers<[1], [0], [0], [1], [0, 0, 1, 1], [], []>} : vector<32x8xbf16>, vector<8x128xbf16>, vector<32x128xf32> -> vector<32x128xf32>
    %95 = vector.extract_strided_slice %89 {offsets = [0, 128], sizes = [8, 128], strides = [1, 1]} : vector<8x512xf32> to vector<8x128xf32>
    %96 = arith.truncf %95 : vector<8x128xf32> to vector<8x128xbf16>
    %c1_75 = arith.constant 1 : index
    %c0_76 = arith.constant 0 : index
    %c0_77 = arith.constant 0 : index
    %97 = vector.load %arg20[%c1_75, %c0_76, %c0_77] : memref<4x32x8xbf16, #tpu.memory_space<vmem>>, vector<1x32x8xbf16>
    %98 = vector.shape_cast %97 : vector<1x32x8xbf16> to vector<32x8xbf16>
    %cst_78 = arith.constant dense<0.000000e+00> : vector<32x128xf32>
    %99 = tpu.matmul %98, %96, %cst_78 {dimension_numbers = #tpu.dot_dimension_numbers<[1], [0], [0], [1], [0, 0, 1, 1], [], []>} : vector<32x8xbf16>, vector<8x128xbf16>, vector<32x128xf32> -> vector<32x128xf32>
    %100 = arith.addf %94, %99 : vector<32x128xf32>
    %101 = vector.extract_strided_slice %89 {offsets = [0, 256], sizes = [8, 128], strides = [1, 1]} : vector<8x512xf32> to vector<8x128xf32>
    %102 = arith.truncf %101 : vector<8x128xf32> to vector<8x128xbf16>
    %c2_79 = arith.constant 2 : index
    %c0_80 = arith.constant 0 : index
    %c0_81 = arith.constant 0 : index
    %103 = vector.load %arg20[%c2_79, %c0_80, %c0_81] : memref<4x32x8xbf16, #tpu.memory_space<vmem>>, vector<1x32x8xbf16>
    %104 = vector.shape_cast %103 : vector<1x32x8xbf16> to vector<32x8xbf16>
    %cst_82 = arith.constant dense<0.000000e+00> : vector<32x128xf32>
    %105 = tpu.matmul %104, %102, %cst_82 {dimension_numbers = #tpu.dot_dimension_numbers<[1], [0], [0], [1], [0, 0, 1, 1], [], []>} : vector<32x8xbf16>, vector<8x128xbf16>, vector<32x128xf32> -> vector<32x128xf32>
    %106 = arith.addf %100, %105 : vector<32x128xf32>
    %107 = vector.extract_strided_slice %89 {offsets = [0, 384], sizes = [8, 128], strides = [1, 1]} : vector<8x512xf32> to vector<8x128xf32>
    %108 = arith.truncf %107 : vector<8x128xf32> to vector<8x128xbf16>
    %c3_83 = arith.constant 3 : index
    %c0_84 = arith.constant 0 : index
    %c0_85 = arith.constant 0 : index
    %109 = vector.load %arg20[%c3_83, %c0_84, %c0_85] : memref<4x32x8xbf16, #tpu.memory_space<vmem>>, vector<1x32x8xbf16>
    %110 = vector.shape_cast %109 : vector<1x32x8xbf16> to vector<32x8xbf16>
    %cst_86 = arith.constant dense<0.000000e+00> : vector<32x128xf32>
    %111 = tpu.matmul %110, %108, %cst_86 {dimension_numbers = #tpu.dot_dimension_numbers<[1], [0], [0], [1], [0, 0, 1, 1], [], []>} : vector<32x8xbf16>, vector<8x128xbf16>, vector<32x128xf32> -> vector<32x128xf32>
    %112 = arith.addf %106, %111 : vector<32x128xf32>
    %113 = arith.addf %30, %112 : vector<32x128xf32>
    %114 = arith.truncf %113 : vector<32x128xf32> to vector<32x128xbf16>
    %c0_87 = arith.constant 0 : index
    %c0_88 = arith.constant 0 : index
    %115 = vector.load %arg21[%c0_87, %c0_88] : memref<32x32xbf16, #tpu.memory_space<vmem>>, vector<32x32xbf16>
    %cst_89 = arith.constant dense<0.000000e+00> : vector<32x128xf32>
    %116 = tpu.matmul %115, %114, %cst_89 {dimension_numbers = #tpu.dot_dimension_numbers<[1], [0], [0], [1], [0, 0, 1, 1], [], []>} : vector<32x32xbf16>, vector<32x128xbf16>, vector<32x128xf32> -> vector<32x128xf32>
    %117 = arith.truncf %116 : vector<32x128xf32> to vector<32x128xbf16>
    %c0_90 = arith.constant 0 : index
    %c0_91 = arith.constant 0 : index
    %118 = vector.load %arg15[%c0_90, %c0_91] : memref<32x32xbf16, #tpu.memory_space<vmem>>, vector<32x32xbf16>
    %cst_92 = arith.constant dense<0.000000e+00> : vector<32x128xf32>
    %119 = tpu.matmul %118, %114, %cst_92 {dimension_numbers = #tpu.dot_dimension_numbers<[1], [0], [0], [1], [0, 0, 1, 1], [], []>} : vector<32x32xbf16>, vector<32x128xbf16>, vector<32x128xf32> -> vector<32x128xf32>
    %120 = arith.truncf %119 : vector<32x128xf32> to vector<32x128xbf16>
    %121 = tpu.concatenate %114, %117, %120 in 1 : vector<32x128xbf16>, vector<32x128xbf16>, vector<32x128xbf16> -> vector<32x384xbf16>
    %c0_93 = arith.constant 0 : index
    %c0_94 = arith.constant 0 : index
    %122 = vector.load %arg6[%c0_93, %c0_94] : memref<384x128xbf16, #tpu.memory_space<vmem>>, vector<384x128xbf16>
    %cst_95 = arith.constant dense<0.000000e+00> : vector<32x128xf32>
    %123 = tpu.matmul %121, %122, %cst_95 {dimension_numbers = #tpu.dot_dimension_numbers<[1], [0], [0], [1], [0, 0, 1, 1], [], []>} : vector<32x384xbf16>, vector<384x128xbf16>, vector<32x128xf32> -> vector<32x128xf32>
    %c0_96 = arith.constant 0 : index
    %c0_97 = arith.constant 0 : index
    %124 = vector.load %arg5[%c0_96, %c0_97] : memref<1x128xf32, #tpu.memory_space<vmem>>, vector<1x128xf32>
    %125 = vector.broadcast %124 : vector<1x128xf32> to vector<32x128xf32>
    %126 = arith.addf %123, %125 : vector<32x128xf32>
    %cst_98 = arith.constant 0.000000e+00 : f32
    %127 = vector.broadcast %cst_98 : f32 to vector<32x128xf32>
    %128 = arith.maximumf %126, %127 : vector<32x128xf32>
    %129 = arith.truncf %83 : vector<8x128xf32> to vector<8x128xbf16>
    %c0_99 = arith.constant 0 : index
    %c0_100 = arith.constant 0 : index
    %130 = vector.load %arg22[%c0_99, %c0_100] : memref<8x8xbf16, #tpu.memory_space<vmem>>, vector<8x8xbf16>
    %cst_101 = arith.constant dense<0.000000e+00> : vector<8x128xf32>
    %131 = tpu.matmul %130, %129, %cst_101 {dimension_numbers = #tpu.dot_dimension_numbers<[1], [0], [0], [1], [0, 0, 1, 1], [], []>} : vector<8x8xbf16>, vector<8x128xbf16>, vector<8x128xf32> -> vector<8x128xf32>
    %132 = arith.truncf %131 : vector<8x128xf32> to vector<8x128xbf16>
    %c0_102 = arith.constant 0 : index
    %c0_103 = arith.constant 0 : index
    %133 = vector.load %arg16[%c0_102, %c0_103] : memref<8x8xbf16, #tpu.memory_space<vmem>>, vector<8x8xbf16>
    %cst_104 = arith.constant dense<0.000000e+00> : vector<8x128xf32>
    %134 = tpu.matmul %133, %129, %cst_104 {dimension_numbers = #tpu.dot_dimension_numbers<[1], [0], [0], [1], [0, 0, 1, 1], [], []>} : vector<8x8xbf16>, vector<8x128xbf16>, vector<8x128xf32> -> vector<8x128xf32>
    %135 = arith.truncf %134 : vector<8x128xf32> to vector<8x128xbf16>
    %136 = tpu.concatenate %129, %132, %135 in 1 : vector<8x128xbf16>, vector<8x128xbf16>, vector<8x128xbf16> -> vector<8x384xbf16>
    %c0_105 = arith.constant 0 : index
    %c0_106 = arith.constant 0 : index
    %137 = vector.load %arg8[%c0_105, %c0_106] : memref<384x128xbf16, #tpu.memory_space<vmem>>, vector<384x128xbf16>
    %cst_107 = arith.constant dense<0.000000e+00> : vector<8x128xf32>
    %138 = tpu.matmul %136, %137, %cst_107 {dimension_numbers = #tpu.dot_dimension_numbers<[1], [0], [0], [1], [0, 0, 1, 1], [], []>} : vector<8x384xbf16>, vector<384x128xbf16>, vector<8x128xf32> -> vector<8x128xf32>
    %c0_108 = arith.constant 0 : index
    %c0_109 = arith.constant 0 : index
    %139 = vector.load %arg7[%c0_108, %c0_109] : memref<1x128xf32, #tpu.memory_space<vmem>>, vector<1x128xf32>
    %140 = vector.broadcast %139 : vector<1x128xf32> to vector<8x128xf32>
    %141 = arith.addf %138, %140 : vector<8x128xf32>
    %cst_110 = arith.constant 0.000000e+00 : f32
    %142 = vector.broadcast %cst_110 : f32 to vector<8x128xf32>
    %143 = arith.maximumf %141, %142 : vector<8x128xf32>
    %144 = arith.truncf %83 : vector<8x128xf32> to vector<8x128xbf16>
    %c0_111 = arith.constant 0 : index
    %c0_112 = arith.constant 0 : index
    %c0_113 = arith.constant 0 : index
    %145 = vector.load %arg18[%c0_111, %c0_112, %c0_113] : memref<4x2x8xbf16, #tpu.memory_space<vmem>>, vector<1x2x8xbf16>
    %146 = vector.shape_cast %145 : vector<1x2x8xbf16> to vector<2x8xbf16>
    %cst_114 = arith.constant dense<0.000000e+00> : vector<2x128xf32>
    %147 = tpu.matmul %146, %144, %cst_114 {dimension_numbers = #tpu.dot_dimension_numbers<[1], [0], [0], [1], [0, 0, 1, 1], [], []>} : vector<2x8xbf16>, vector<8x128xbf16>, vector<2x128xf32> -> vector<2x128xf32>
    %148 = arith.truncf %147 : vector<2x128xf32> to vector<2x128xbf16>
    %c1_115 = arith.constant 1 : index
    %c0_116 = arith.constant 0 : index
    %c0_117 = arith.constant 0 : index
    %149 = vector.load %arg18[%c1_115, %c0_116, %c0_117] : memref<4x2x8xbf16, #tpu.memory_space<vmem>>, vector<1x2x8xbf16>
    %150 = vector.shape_cast %149 : vector<1x2x8xbf16> to vector<2x8xbf16>
    %cst_118 = arith.constant dense<0.000000e+00> : vector<2x128xf32>
    %151 = tpu.matmul %150, %144, %cst_118 {dimension_numbers = #tpu.dot_dimension_numbers<[1], [0], [0], [1], [0, 0, 1, 1], [], []>} : vector<2x8xbf16>, vector<8x128xbf16>, vector<2x128xf32> -> vector<2x128xf32>
    %152 = arith.truncf %151 : vector<2x128xf32> to vector<2x128xbf16>
    %c2_119 = arith.constant 2 : index
    %c0_120 = arith.constant 0 : index
    %c0_121 = arith.constant 0 : index
    %153 = vector.load %arg18[%c2_119, %c0_120, %c0_121] : memref<4x2x8xbf16, #tpu.memory_space<vmem>>, vector<1x2x8xbf16>
    %154 = vector.shape_cast %153 : vector<1x2x8xbf16> to vector<2x8xbf16>
    %cst_122 = arith.constant dense<0.000000e+00> : vector<2x128xf32>
    %155 = tpu.matmul %154, %144, %cst_122 {dimension_numbers = #tpu.dot_dimension_numbers<[1], [0], [0], [1], [0, 0, 1, 1], [], []>} : vector<2x8xbf16>, vector<8x128xbf16>, vector<2x128xf32> -> vector<2x128xf32>
    %156 = arith.truncf %155 : vector<2x128xf32> to vector<2x128xbf16>
    %c3_123 = arith.constant 3 : index
    %c0_124 = arith.constant 0 : index
    %c0_125 = arith.constant 0 : index
    %157 = vector.load %arg18[%c3_123, %c0_124, %c0_125] : memref<4x2x8xbf16, #tpu.memory_space<vmem>>, vector<1x2x8xbf16>
    %158 = vector.shape_cast %157 : vector<1x2x8xbf16> to vector<2x8xbf16>
    %cst_126 = arith.constant dense<0.000000e+00> : vector<2x128xf32>
    %159 = tpu.matmul %158, %144, %cst_126 {dimension_numbers = #tpu.dot_dimension_numbers<[1], [0], [0], [1], [0, 0, 1, 1], [], []>} : vector<2x8xbf16>, vector<8x128xbf16>, vector<2x128xf32> -> vector<2x128xf32>
    %160 = arith.truncf %159 : vector<2x128xf32> to vector<2x128xbf16>
    %161 = tpu.concatenate %148, %152, %156, %160 in 1 : vector<2x128xbf16>, vector<2x128xbf16>, vector<2x128xbf16>, vector<2x128xbf16> -> vector<2x512xbf16>
    %c0_127 = arith.constant 0 : index
    %c0_128 = arith.constant 0 : index
    %162 = vector.load %arg12[%c0_127, %c0_128] : memref<512x128xbf16, #tpu.memory_space<vmem>>, vector<512x128xbf16>
    %cst_129 = arith.constant dense<0.000000e+00> : vector<2x128xf32>
    %163 = tpu.matmul %161, %162, %cst_129 {dimension_numbers = #tpu.dot_dimension_numbers<[1], [0], [0], [1], [0, 0, 1, 1], [], []>} : vector<2x512xbf16>, vector<512x128xbf16>, vector<2x128xf32> -> vector<2x128xf32>
    %c0_130 = arith.constant 0 : index
    %c0_131 = arith.constant 0 : index
    %164 = vector.load %arg11[%c0_130, %c0_131] : memref<1x128xf32, #tpu.memory_space<vmem>>, vector<1x128xf32>
    %165 = vector.broadcast %164 : vector<1x128xf32> to vector<2x128xf32>
    %166 = arith.addf %163, %165 : vector<2x128xf32>
    %167 = arith.truncf %166 : vector<2x128xf32> to vector<2x128xbf16>
    %c0_132 = arith.constant 0 : index
    %c0_133 = arith.constant 0 : index
    %168 = vector.load %arg3[%c0_132, %c0_133] : memref<128x128xbf16, #tpu.memory_space<vmem>>, vector<128x128xbf16>
    %cst_134 = arith.constant dense<0.000000e+00> : vector<2x128xf32>
    %169 = tpu.matmul %167, %168, %cst_134 {dimension_numbers = #tpu.dot_dimension_numbers<[1], [0], [0], [1], [0, 0, 1, 1], [], []>} : vector<2x128xbf16>, vector<128x128xbf16>, vector<2x128xf32> -> vector<2x128xf32>
    %c0_135 = arith.constant 0 : index
    %c0_136 = arith.constant 0 : index
    %170 = vector.load %arg1[%c0_135, %c0_136] : memref<1x128xf32, #tpu.memory_space<vmem>>, vector<1x128xf32>
    %171 = vector.broadcast %170 : vector<1x128xf32> to vector<2x128xf32>
    %172 = arith.addf %169, %171 : vector<2x128xf32>
    %cst_137 = arith.constant 0.000000e+00 : f32
    %173 = vector.broadcast %cst_137 : f32 to vector<2x128xf32>
    %174 = arith.maximumf %172, %173 : vector<2x128xf32>
    %175 = arith.truncf %174 : vector<2x128xf32> to vector<2x128xbf16>
    %c0_138 = arith.constant 0 : index
    %c0_139 = arith.constant 0 : index
    %176 = vector.load %arg4[%c0_138, %c0_139] : memref<128x128xbf16, #tpu.memory_space<vmem>>, vector<128x128xbf16>
    %cst_140 = arith.constant dense<0.000000e+00> : vector<2x128xf32>
    %177 = tpu.matmul %175, %176, %cst_140 {dimension_numbers = #tpu.dot_dimension_numbers<[1], [0], [0], [1], [0, 0, 1, 1], [], []>} : vector<2x128xbf16>, vector<128x128xbf16>, vector<2x128xf32> -> vector<2x128xf32>
    %c0_141 = arith.constant 0 : index
    %c0_142 = arith.constant 0 : index
    %178 = vector.load %arg2[%c0_141, %c0_142] : memref<1x128xf32, #tpu.memory_space<vmem>>, vector<1x128xf32>
    %179 = vector.broadcast %178 : vector<1x128xf32> to vector<2x128xf32>
    %180 = arith.addf %177, %179 : vector<2x128xf32>
    %cst_143 = arith.constant 0.000000e+00 : f32
    %181 = vector.broadcast %cst_143 : f32 to vector<2x128xf32>
    %182 = arith.maximumf %180, %181 : vector<2x128xf32>
    %183 = arith.truncf %182 : vector<2x128xf32> to vector<2x128xbf16>
    %c0_144 = arith.constant 0 : index
    %c0_145 = arith.constant 0 : index
    %184 = vector.load %arg42[%c0_144, %c0_145] : memref<128x512xbf16, #tpu.memory_space<vmem>>, vector<128x512xbf16>
    %cst_146 = arith.constant dense<0.000000e+00> : vector<2x512xf32>
    %185 = tpu.matmul %183, %184, %cst_146 {dimension_numbers = #tpu.dot_dimension_numbers<[1], [0], [0], [1], [0, 0, 1, 1], [], []>} : vector<2x128xbf16>, vector<128x512xbf16>, vector<2x512xf32> -> vector<2x512xf32>
    %c0_147 = arith.constant 0 : index
    %c0_148 = arith.constant 0 : index
    %186 = vector.load %arg41[%c0_147, %c0_148] : memref<1x512xf32, #tpu.memory_space<vmem>>, vector<1x512xf32>
    %187 = vector.broadcast %186 : vector<1x512xf32> to vector<2x512xf32>
    %188 = arith.addf %185, %187 : vector<2x512xf32>
    %189 = vector.extract_strided_slice %188 {offsets = [0, 0], sizes = [2, 128], strides = [1, 1]} : vector<2x512xf32> to vector<2x128xf32>
    %190 = arith.truncf %189 : vector<2x128xf32> to vector<2x128xbf16>
    %c0_149 = arith.constant 0 : index
    %c0_150 = arith.constant 0 : index
    %c0_151 = arith.constant 0 : index
    %191 = vector.load %arg19[%c0_149, %c0_150, %c0_151] : memref<4x8x2xbf16, #tpu.memory_space<vmem>>, vector<1x8x2xbf16>
    %192 = vector.shape_cast %191 : vector<1x8x2xbf16> to vector<8x2xbf16>
    %cst_152 = arith.constant dense<0.000000e+00> : vector<8x128xf32>
    %193 = tpu.matmul %192, %190, %cst_152 {dimension_numbers = #tpu.dot_dimension_numbers<[1], [0], [0], [1], [0, 0, 1, 1], [], []>} : vector<8x2xbf16>, vector<2x128xbf16>, vector<8x128xf32> -> vector<8x128xf32>
    %194 = vector.extract_strided_slice %188 {offsets = [0, 128], sizes = [2, 128], strides = [1, 1]} : vector<2x512xf32> to vector<2x128xf32>
    %195 = arith.truncf %194 : vector<2x128xf32> to vector<2x128xbf16>
    %c1_153 = arith.constant 1 : index
    %c0_154 = arith.constant 0 : index
    %c0_155 = arith.constant 0 : index
    %196 = vector.load %arg19[%c1_153, %c0_154, %c0_155] : memref<4x8x2xbf16, #tpu.memory_space<vmem>>, vector<1x8x2xbf16>
    %197 = vector.shape_cast %196 : vector<1x8x2xbf16> to vector<8x2xbf16>
    %cst_156 = arith.constant dense<0.000000e+00> : vector<8x128xf32>
    %198 = tpu.matmul %197, %195, %cst_156 {dimension_numbers = #tpu.dot_dimension_numbers<[1], [0], [0], [1], [0, 0, 1, 1], [], []>} : vector<8x2xbf16>, vector<2x128xbf16>, vector<8x128xf32> -> vector<8x128xf32>
    %199 = arith.addf %193, %198 : vector<8x128xf32>
    %200 = vector.extract_strided_slice %188 {offsets = [0, 256], sizes = [2, 128], strides = [1, 1]} : vector<2x512xf32> to vector<2x128xf32>
    %201 = arith.truncf %200 : vector<2x128xf32> to vector<2x128xbf16>
    %c2_157 = arith.constant 2 : index
    %c0_158 = arith.constant 0 : index
    %c0_159 = arith.constant 0 : index
    %202 = vector.load %arg19[%c2_157, %c0_158, %c0_159] : memref<4x8x2xbf16, #tpu.memory_space<vmem>>, vector<1x8x2xbf16>
    %203 = vector.shape_cast %202 : vector<1x8x2xbf16> to vector<8x2xbf16>
    %cst_160 = arith.constant dense<0.000000e+00> : vector<8x128xf32>
    %204 = tpu.matmul %203, %201, %cst_160 {dimension_numbers = #tpu.dot_dimension_numbers<[1], [0], [0], [1], [0, 0, 1, 1], [], []>} : vector<8x2xbf16>, vector<2x128xbf16>, vector<8x128xf32> -> vector<8x128xf32>
    %205 = arith.addf %199, %204 : vector<8x128xf32>
    %206 = vector.extract_strided_slice %188 {offsets = [0, 384], sizes = [2, 128], strides = [1, 1]} : vector<2x512xf32> to vector<2x128xf32>
    %207 = arith.truncf %206 : vector<2x128xf32> to vector<2x128xbf16>
    %c3_161 = arith.constant 3 : index
    %c0_162 = arith.constant 0 : index
    %c0_163 = arith.constant 0 : index
    %208 = vector.load %arg19[%c3_161, %c0_162, %c0_163] : memref<4x8x2xbf16, #tpu.memory_space<vmem>>, vector<1x8x2xbf16>
    %209 = vector.shape_cast %208 : vector<1x8x2xbf16> to vector<8x2xbf16>
    %cst_164 = arith.constant dense<0.000000e+00> : vector<8x128xf32>
    %210 = tpu.matmul %209, %207, %cst_164 {dimension_numbers = #tpu.dot_dimension_numbers<[1], [0], [0], [1], [0, 0, 1, 1], [], []>} : vector<8x2xbf16>, vector<2x128xbf16>, vector<8x128xf32> -> vector<8x128xf32>
    %211 = arith.addf %205, %210 : vector<8x128xf32>
    %212 = arith.truncf %211 : vector<8x128xf32> to vector<8x128xbf16>
    %c0_165 = arith.constant 0 : index
    %c0_166 = arith.constant 0 : index
    %213 = vector.load %arg24[%c0_165, %c0_166] : memref<128x512xbf16, #tpu.memory_space<vmem>>, vector<128x512xbf16>
    %cst_167 = arith.constant dense<0.000000e+00> : vector<8x512xf32>
    %214 = tpu.matmul %212, %213, %cst_167 {dimension_numbers = #tpu.dot_dimension_numbers<[1], [0], [0], [1], [0, 0, 1, 1], [], []>} : vector<8x128xbf16>, vector<128x512xbf16>, vector<8x512xf32> -> vector<8x512xf32>
    %c0_168 = arith.constant 0 : index
    %c0_169 = arith.constant 0 : index
    %215 = vector.load %arg23[%c0_168, %c0_169] : memref<1x512xf32, #tpu.memory_space<vmem>>, vector<1x512xf32>
    %216 = vector.broadcast %215 : vector<1x512xf32> to vector<8x512xf32>
    %217 = arith.addf %214, %216 : vector<8x512xf32>
    %218 = vector.extract_strided_slice %217 {offsets = [0, 0], sizes = [8, 128], strides = [1, 1]} : vector<8x512xf32> to vector<8x128xf32>
    %219 = arith.truncf %218 : vector<8x128xf32> to vector<8x128xbf16>
    %c0_170 = arith.constant 0 : index
    %c0_171 = arith.constant 0 : index
    %c0_172 = arith.constant 0 : index
    %220 = vector.load %arg20[%c0_170, %c0_171, %c0_172] : memref<4x32x8xbf16, #tpu.memory_space<vmem>>, vector<1x32x8xbf16>
    %221 = vector.shape_cast %220 : vector<1x32x8xbf16> to vector<32x8xbf16>
    %cst_173 = arith.constant dense<0.000000e+00> : vector<32x128xf32>
    %222 = tpu.matmul %221, %219, %cst_173 {dimension_numbers = #tpu.dot_dimension_numbers<[1], [0], [0], [1], [0, 0, 1, 1], [], []>} : vector<32x8xbf16>, vector<8x128xbf16>, vector<32x128xf32> -> vector<32x128xf32>
    %223 = vector.extract_strided_slice %217 {offsets = [0, 128], sizes = [8, 128], strides = [1, 1]} : vector<8x512xf32> to vector<8x128xf32>
    %224 = arith.truncf %223 : vector<8x128xf32> to vector<8x128xbf16>
    %c1_174 = arith.constant 1 : index
    %c0_175 = arith.constant 0 : index
    %c0_176 = arith.constant 0 : index
    %225 = vector.load %arg20[%c1_174, %c0_175, %c0_176] : memref<4x32x8xbf16, #tpu.memory_space<vmem>>, vector<1x32x8xbf16>
    %226 = vector.shape_cast %225 : vector<1x32x8xbf16> to vector<32x8xbf16>
    %cst_177 = arith.constant dense<0.000000e+00> : vector<32x128xf32>
    %227 = tpu.matmul %226, %224, %cst_177 {dimension_numbers = #tpu.dot_dimension_numbers<[1], [0], [0], [1], [0, 0, 1, 1], [], []>} : vector<32x8xbf16>, vector<8x128xbf16>, vector<32x128xf32> -> vector<32x128xf32>
    %228 = arith.addf %222, %227 : vector<32x128xf32>
    %229 = vector.extract_strided_slice %217 {offsets = [0, 256], sizes = [8, 128], strides = [1, 1]} : vector<8x512xf32> to vector<8x128xf32>
    %230 = arith.truncf %229 : vector<8x128xf32> to vector<8x128xbf16>
    %c2_178 = arith.constant 2 : index
    %c0_179 = arith.constant 0 : index
    %c0_180 = arith.constant 0 : index
    %231 = vector.load %arg20[%c2_178, %c0_179, %c0_180] : memref<4x32x8xbf16, #tpu.memory_space<vmem>>, vector<1x32x8xbf16>
    %232 = vector.shape_cast %231 : vector<1x32x8xbf16> to vector<32x8xbf16>
    %cst_181 = arith.constant dense<0.000000e+00> : vector<32x128xf32>
    %233 = tpu.matmul %232, %230, %cst_181 {dimension_numbers = #tpu.dot_dimension_numbers<[1], [0], [0], [1], [0, 0, 1, 1], [], []>} : vector<32x8xbf16>, vector<8x128xbf16>, vector<32x128xf32> -> vector<32x128xf32>
    %234 = arith.addf %228, %233 : vector<32x128xf32>
    %235 = vector.extract_strided_slice %217 {offsets = [0, 384], sizes = [8, 128], strides = [1, 1]} : vector<8x512xf32> to vector<8x128xf32>
    %236 = arith.truncf %235 : vector<8x128xf32> to vector<8x128xbf16>
    %c3_182 = arith.constant 3 : index
    %c0_183 = arith.constant 0 : index
    %c0_184 = arith.constant 0 : index
    %237 = vector.load %arg20[%c3_182, %c0_183, %c0_184] : memref<4x32x8xbf16, #tpu.memory_space<vmem>>, vector<1x32x8xbf16>
    %238 = vector.shape_cast %237 : vector<1x32x8xbf16> to vector<32x8xbf16>
    %cst_185 = arith.constant dense<0.000000e+00> : vector<32x128xf32>
    %239 = tpu.matmul %238, %236, %cst_185 {dimension_numbers = #tpu.dot_dimension_numbers<[1], [0], [0], [1], [0, 0, 1, 1], [], []>} : vector<32x8xbf16>, vector<8x128xbf16>, vector<32x128xf32> -> vector<32x128xf32>
    %240 = arith.addf %234, %239 : vector<32x128xf32>
    %241 = arith.truncf %211 : vector<8x128xf32> to vector<8x128xbf16>
    %c0_186 = arith.constant 0 : index
    %c0_187 = arith.constant 0 : index
    %242 = vector.load %arg22[%c0_186, %c0_187] : memref<8x8xbf16, #tpu.memory_space<vmem>>, vector<8x8xbf16>
    %cst_188 = arith.constant dense<0.000000e+00> : vector<8x128xf32>
    %243 = tpu.matmul %242, %241, %cst_188 {dimension_numbers = #tpu.dot_dimension_numbers<[1], [0], [0], [1], [0, 0, 1, 1], [], []>} : vector<8x8xbf16>, vector<8x128xbf16>, vector<8x128xf32> -> vector<8x128xf32>
    %244 = arith.truncf %243 : vector<8x128xf32> to vector<8x128xbf16>
    %c0_189 = arith.constant 0 : index
    %c0_190 = arith.constant 0 : index
    %245 = vector.load %arg16[%c0_189, %c0_190] : memref<8x8xbf16, #tpu.memory_space<vmem>>, vector<8x8xbf16>
    %cst_191 = arith.constant dense<0.000000e+00> : vector<8x128xf32>
    %246 = tpu.matmul %245, %241, %cst_191 {dimension_numbers = #tpu.dot_dimension_numbers<[1], [0], [0], [1], [0, 0, 1, 1], [], []>} : vector<8x8xbf16>, vector<8x128xbf16>, vector<8x128xf32> -> vector<8x128xf32>
    %247 = arith.truncf %246 : vector<8x128xf32> to vector<8x128xbf16>
    %248 = arith.truncf %143 : vector<8x128xf32> to vector<8x128xbf16>
    %c0_192 = arith.constant 0 : index
    %c0_193 = arith.constant 0 : index
    %249 = vector.load %arg22[%c0_192, %c0_193] : memref<8x8xbf16, #tpu.memory_space<vmem>>, vector<8x8xbf16>
    %cst_194 = arith.constant dense<0.000000e+00> : vector<8x128xf32>
    %250 = tpu.matmul %249, %248, %cst_194 {dimension_numbers = #tpu.dot_dimension_numbers<[1], [0], [0], [1], [0, 0, 1, 1], [], []>} : vector<8x8xbf16>, vector<8x128xbf16>, vector<8x128xf32> -> vector<8x128xf32>
    %251 = arith.truncf %250 : vector<8x128xf32> to vector<8x128xbf16>
    %c0_195 = arith.constant 0 : index
    %c0_196 = arith.constant 0 : index
    %252 = vector.load %arg16[%c0_195, %c0_196] : memref<8x8xbf16, #tpu.memory_space<vmem>>, vector<8x8xbf16>
    %cst_197 = arith.constant dense<0.000000e+00> : vector<8x128xf32>
    %253 = tpu.matmul %252, %248, %cst_197 {dimension_numbers = #tpu.dot_dimension_numbers<[1], [0], [0], [1], [0, 0, 1, 1], [], []>} : vector<8x8xbf16>, vector<8x128xbf16>, vector<8x128xf32> -> vector<8x128xf32>
    %254 = arith.truncf %253 : vector<8x128xf32> to vector<8x128xbf16>
    %255 = tpu.concatenate %241, %244, %247, %248, %251, %254 in 1 : vector<8x128xbf16>, vector<8x128xbf16>, vector<8x128xbf16>, vector<8x128xbf16>, vector<8x128xbf16>, vector<8x128xbf16> -> vector<8x768xbf16>
    %c0_198 = arith.constant 0 : index
    %c0_199 = arith.constant 0 : index
    %256 = vector.load %arg35[%c0_198, %c0_199] : memref<768x128xbf16, #tpu.memory_space<vmem>>, vector<768x128xbf16>
    %cst_200 = arith.constant dense<0.000000e+00> : vector<8x128xf32>
    %257 = tpu.matmul %255, %256, %cst_200 {dimension_numbers = #tpu.dot_dimension_numbers<[1], [0], [0], [1], [0, 0, 1, 1], [], []>} : vector<8x768xbf16>, vector<768x128xbf16>, vector<8x128xf32> -> vector<8x128xf32>
    %c0_201 = arith.constant 0 : index
    %c0_202 = arith.constant 0 : index
    %258 = vector.load %arg33[%c0_201, %c0_202] : memref<1x128xf32, #tpu.memory_space<vmem>>, vector<1x128xf32>
    %259 = vector.broadcast %258 : vector<1x128xf32> to vector<8x128xf32>
    %260 = arith.addf %257, %259 : vector<8x128xf32>
    %cst_203 = arith.constant 0.000000e+00 : f32
    %261 = vector.broadcast %cst_203 : f32 to vector<8x128xf32>
    %262 = arith.maximumf %260, %261 : vector<8x128xf32>
    %263 = arith.truncf %262 : vector<8x128xf32> to vector<8x128xbf16>
    %c0_204 = arith.constant 0 : index
    %c0_205 = arith.constant 0 : index
    %264 = vector.load %arg22[%c0_204, %c0_205] : memref<8x8xbf16, #tpu.memory_space<vmem>>, vector<8x8xbf16>
    %cst_206 = arith.constant dense<0.000000e+00> : vector<8x128xf32>
    %265 = tpu.matmul %264, %263, %cst_206 {dimension_numbers = #tpu.dot_dimension_numbers<[1], [0], [0], [1], [0, 0, 1, 1], [], []>} : vector<8x8xbf16>, vector<8x128xbf16>, vector<8x128xf32> -> vector<8x128xf32>
    %266 = arith.truncf %265 : vector<8x128xf32> to vector<8x128xbf16>
    %c0_207 = arith.constant 0 : index
    %c0_208 = arith.constant 0 : index
    %267 = vector.load %arg16[%c0_207, %c0_208] : memref<8x8xbf16, #tpu.memory_space<vmem>>, vector<8x8xbf16>
    %cst_209 = arith.constant dense<0.000000e+00> : vector<8x128xf32>
    %268 = tpu.matmul %267, %263, %cst_209 {dimension_numbers = #tpu.dot_dimension_numbers<[1], [0], [0], [1], [0, 0, 1, 1], [], []>} : vector<8x8xbf16>, vector<8x128xbf16>, vector<8x128xf32> -> vector<8x128xf32>
    %269 = arith.truncf %268 : vector<8x128xf32> to vector<8x128xbf16>
    %270 = tpu.concatenate %263, %266, %269 in 1 : vector<8x128xbf16>, vector<8x128xbf16>, vector<8x128xbf16> -> vector<8x384xbf16>
    %c0_210 = arith.constant 0 : index
    %c0_211 = arith.constant 0 : index
    %271 = vector.load %arg36[%c0_210, %c0_211] : memref<384x128xbf16, #tpu.memory_space<vmem>>, vector<384x128xbf16>
    %cst_212 = arith.constant dense<0.000000e+00> : vector<8x128xf32>
    %272 = tpu.matmul %270, %271, %cst_212 {dimension_numbers = #tpu.dot_dimension_numbers<[1], [0], [0], [1], [0, 0, 1, 1], [], []>} : vector<8x384xbf16>, vector<384x128xbf16>, vector<8x128xf32> -> vector<8x128xf32>
    %c0_213 = arith.constant 0 : index
    %c0_214 = arith.constant 0 : index
    %273 = vector.load %arg34[%c0_213, %c0_214] : memref<1x128xf32, #tpu.memory_space<vmem>>, vector<1x128xf32>
    %274 = vector.broadcast %273 : vector<1x128xf32> to vector<8x128xf32>
    %275 = arith.addf %272, %274 : vector<8x128xf32>
    %cst_215 = arith.constant 0.000000e+00 : f32
    %276 = vector.broadcast %cst_215 : f32 to vector<8x128xf32>
    %277 = arith.maximumf %275, %276 : vector<8x128xf32>
    %278 = arith.truncf %277 : vector<8x128xf32> to vector<8x128xbf16>
    %c0_216 = arith.constant 0 : index
    %c0_217 = arith.constant 0 : index
    %279 = vector.load %arg44[%c0_216, %c0_217] : memref<128x512xbf16, #tpu.memory_space<vmem>>, vector<128x512xbf16>
    %cst_218 = arith.constant dense<0.000000e+00> : vector<8x512xf32>
    %280 = tpu.matmul %278, %279, %cst_218 {dimension_numbers = #tpu.dot_dimension_numbers<[1], [0], [0], [1], [0, 0, 1, 1], [], []>} : vector<8x128xbf16>, vector<128x512xbf16>, vector<8x512xf32> -> vector<8x512xf32>
    %c0_219 = arith.constant 0 : index
    %c0_220 = arith.constant 0 : index
    %281 = vector.load %arg43[%c0_219, %c0_220] : memref<1x512xf32, #tpu.memory_space<vmem>>, vector<1x512xf32>
    %282 = vector.broadcast %281 : vector<1x512xf32> to vector<8x512xf32>
    %283 = arith.addf %280, %282 : vector<8x512xf32>
    %284 = vector.extract_strided_slice %283 {offsets = [0, 0], sizes = [8, 128], strides = [1, 1]} : vector<8x512xf32> to vector<8x128xf32>
    %285 = arith.truncf %284 : vector<8x128xf32> to vector<8x128xbf16>
    %c0_221 = arith.constant 0 : index
    %c0_222 = arith.constant 0 : index
    %c0_223 = arith.constant 0 : index
    %286 = vector.load %arg20[%c0_221, %c0_222, %c0_223] : memref<4x32x8xbf16, #tpu.memory_space<vmem>>, vector<1x32x8xbf16>
    %287 = vector.shape_cast %286 : vector<1x32x8xbf16> to vector<32x8xbf16>
    %cst_224 = arith.constant dense<0.000000e+00> : vector<32x128xf32>
    %288 = tpu.matmul %287, %285, %cst_224 {dimension_numbers = #tpu.dot_dimension_numbers<[1], [0], [0], [1], [0, 0, 1, 1], [], []>} : vector<32x8xbf16>, vector<8x128xbf16>, vector<32x128xf32> -> vector<32x128xf32>
    %289 = vector.extract_strided_slice %283 {offsets = [0, 128], sizes = [8, 128], strides = [1, 1]} : vector<8x512xf32> to vector<8x128xf32>
    %290 = arith.truncf %289 : vector<8x128xf32> to vector<8x128xbf16>
    %c1_225 = arith.constant 1 : index
    %c0_226 = arith.constant 0 : index
    %c0_227 = arith.constant 0 : index
    %291 = vector.load %arg20[%c1_225, %c0_226, %c0_227] : memref<4x32x8xbf16, #tpu.memory_space<vmem>>, vector<1x32x8xbf16>
    %292 = vector.shape_cast %291 : vector<1x32x8xbf16> to vector<32x8xbf16>
    %cst_228 = arith.constant dense<0.000000e+00> : vector<32x128xf32>
    %293 = tpu.matmul %292, %290, %cst_228 {dimension_numbers = #tpu.dot_dimension_numbers<[1], [0], [0], [1], [0, 0, 1, 1], [], []>} : vector<32x8xbf16>, vector<8x128xbf16>, vector<32x128xf32> -> vector<32x128xf32>
    %294 = arith.addf %288, %293 : vector<32x128xf32>
    %295 = vector.extract_strided_slice %283 {offsets = [0, 256], sizes = [8, 128], strides = [1, 1]} : vector<8x512xf32> to vector<8x128xf32>
    %296 = arith.truncf %295 : vector<8x128xf32> to vector<8x128xbf16>
    %c2_229 = arith.constant 2 : index
    %c0_230 = arith.constant 0 : index
    %c0_231 = arith.constant 0 : index
    %297 = vector.load %arg20[%c2_229, %c0_230, %c0_231] : memref<4x32x8xbf16, #tpu.memory_space<vmem>>, vector<1x32x8xbf16>
    %298 = vector.shape_cast %297 : vector<1x32x8xbf16> to vector<32x8xbf16>
    %cst_232 = arith.constant dense<0.000000e+00> : vector<32x128xf32>
    %299 = tpu.matmul %298, %296, %cst_232 {dimension_numbers = #tpu.dot_dimension_numbers<[1], [0], [0], [1], [0, 0, 1, 1], [], []>} : vector<32x8xbf16>, vector<8x128xbf16>, vector<32x128xf32> -> vector<32x128xf32>
    %300 = arith.addf %294, %299 : vector<32x128xf32>
    %301 = vector.extract_strided_slice %283 {offsets = [0, 384], sizes = [8, 128], strides = [1, 1]} : vector<8x512xf32> to vector<8x128xf32>
    %302 = arith.truncf %301 : vector<8x128xf32> to vector<8x128xbf16>
    %c3_233 = arith.constant 3 : index
    %c0_234 = arith.constant 0 : index
    %c0_235 = arith.constant 0 : index
    %303 = vector.load %arg20[%c3_233, %c0_234, %c0_235] : memref<4x32x8xbf16, #tpu.memory_space<vmem>>, vector<1x32x8xbf16>
    %304 = vector.shape_cast %303 : vector<1x32x8xbf16> to vector<32x8xbf16>
    %cst_236 = arith.constant dense<0.000000e+00> : vector<32x128xf32>
    %305 = tpu.matmul %304, %302, %cst_236 {dimension_numbers = #tpu.dot_dimension_numbers<[1], [0], [0], [1], [0, 0, 1, 1], [], []>} : vector<32x8xbf16>, vector<8x128xbf16>, vector<32x128xf32> -> vector<32x128xf32>
    %306 = arith.addf %300, %305 : vector<32x128xf32>
    %307 = arith.addf %128, %240 : vector<32x128xf32>
    %308 = arith.truncf %306 : vector<32x128xf32> to vector<32x128xbf16>
    %c0_237 = arith.constant 0 : index
    %c0_238 = arith.constant 0 : index
    %309 = vector.load %arg21[%c0_237, %c0_238] : memref<32x32xbf16, #tpu.memory_space<vmem>>, vector<32x32xbf16>
    %cst_239 = arith.constant dense<0.000000e+00> : vector<32x128xf32>
    %310 = tpu.matmul %309, %308, %cst_239 {dimension_numbers = #tpu.dot_dimension_numbers<[1], [0], [0], [1], [0, 0, 1, 1], [], []>} : vector<32x32xbf16>, vector<32x128xbf16>, vector<32x128xf32> -> vector<32x128xf32>
    %311 = arith.truncf %310 : vector<32x128xf32> to vector<32x128xbf16>
    %c0_240 = arith.constant 0 : index
    %c0_241 = arith.constant 0 : index
    %312 = vector.load %arg15[%c0_240, %c0_241] : memref<32x32xbf16, #tpu.memory_space<vmem>>, vector<32x32xbf16>
    %cst_242 = arith.constant dense<0.000000e+00> : vector<32x128xf32>
    %313 = tpu.matmul %312, %308, %cst_242 {dimension_numbers = #tpu.dot_dimension_numbers<[1], [0], [0], [1], [0, 0, 1, 1], [], []>} : vector<32x32xbf16>, vector<32x128xbf16>, vector<32x128xf32> -> vector<32x128xf32>
    %314 = arith.truncf %313 : vector<32x128xf32> to vector<32x128xbf16>
    %315 = arith.truncf %307 : vector<32x128xf32> to vector<32x128xbf16>
    %c0_243 = arith.constant 0 : index
    %c0_244 = arith.constant 0 : index
    %316 = vector.load %arg21[%c0_243, %c0_244] : memref<32x32xbf16, #tpu.memory_space<vmem>>, vector<32x32xbf16>
    %cst_245 = arith.constant dense<0.000000e+00> : vector<32x128xf32>
    %317 = tpu.matmul %316, %315, %cst_245 {dimension_numbers = #tpu.dot_dimension_numbers<[1], [0], [0], [1], [0, 0, 1, 1], [], []>} : vector<32x32xbf16>, vector<32x128xbf16>, vector<32x128xf32> -> vector<32x128xf32>
    %318 = arith.truncf %317 : vector<32x128xf32> to vector<32x128xbf16>
    %c0_246 = arith.constant 0 : index
    %c0_247 = arith.constant 0 : index
    %319 = vector.load %arg15[%c0_246, %c0_247] : memref<32x32xbf16, #tpu.memory_space<vmem>>, vector<32x32xbf16>
    %cst_248 = arith.constant dense<0.000000e+00> : vector<32x128xf32>
    %320 = tpu.matmul %319, %315, %cst_248 {dimension_numbers = #tpu.dot_dimension_numbers<[1], [0], [0], [1], [0, 0, 1, 1], [], []>} : vector<32x32xbf16>, vector<32x128xbf16>, vector<32x128xf32> -> vector<32x128xf32>
    %321 = arith.truncf %320 : vector<32x128xf32> to vector<32x128xbf16>
    %322 = tpu.concatenate %308, %311, %314, %315, %318, %321 in 1 : vector<32x128xbf16>, vector<32x128xbf16>, vector<32x128xbf16>, vector<32x128xbf16>, vector<32x128xbf16>, vector<32x128xbf16> -> vector<32x768xbf16>
    %c0_249 = arith.constant 0 : index
    %c0_250 = arith.constant 0 : index
    %323 = vector.load %arg39[%c0_249, %c0_250] : memref<768x128xbf16, #tpu.memory_space<vmem>>, vector<768x128xbf16>
    %cst_251 = arith.constant dense<0.000000e+00> : vector<32x128xf32>
    %324 = tpu.matmul %322, %323, %cst_251 {dimension_numbers = #tpu.dot_dimension_numbers<[1], [0], [0], [1], [0, 0, 1, 1], [], []>} : vector<32x768xbf16>, vector<768x128xbf16>, vector<32x128xf32> -> vector<32x128xf32>
    %c0_252 = arith.constant 0 : index
    %c0_253 = arith.constant 0 : index
    %325 = vector.load %arg37[%c0_252, %c0_253] : memref<1x128xf32, #tpu.memory_space<vmem>>, vector<1x128xf32>
    %326 = vector.broadcast %325 : vector<1x128xf32> to vector<32x128xf32>
    %327 = arith.addf %324, %326 : vector<32x128xf32>
    %cst_254 = arith.constant 0.000000e+00 : f32
    %328 = vector.broadcast %cst_254 : f32 to vector<32x128xf32>
    %329 = arith.maximumf %327, %328 : vector<32x128xf32>
    %330 = arith.truncf %329 : vector<32x128xf32> to vector<32x128xbf16>
    %c0_255 = arith.constant 0 : index
    %c0_256 = arith.constant 0 : index
    %331 = vector.load %arg21[%c0_255, %c0_256] : memref<32x32xbf16, #tpu.memory_space<vmem>>, vector<32x32xbf16>
    %cst_257 = arith.constant dense<0.000000e+00> : vector<32x128xf32>
    %332 = tpu.matmul %331, %330, %cst_257 {dimension_numbers = #tpu.dot_dimension_numbers<[1], [0], [0], [1], [0, 0, 1, 1], [], []>} : vector<32x32xbf16>, vector<32x128xbf16>, vector<32x128xf32> -> vector<32x128xf32>
    %333 = arith.truncf %332 : vector<32x128xf32> to vector<32x128xbf16>
    %c0_258 = arith.constant 0 : index
    %c0_259 = arith.constant 0 : index
    %334 = vector.load %arg15[%c0_258, %c0_259] : memref<32x32xbf16, #tpu.memory_space<vmem>>, vector<32x32xbf16>
    %cst_260 = arith.constant dense<0.000000e+00> : vector<32x128xf32>
    %335 = tpu.matmul %334, %330, %cst_260 {dimension_numbers = #tpu.dot_dimension_numbers<[1], [0], [0], [1], [0, 0, 1, 1], [], []>} : vector<32x32xbf16>, vector<32x128xbf16>, vector<32x128xf32> -> vector<32x128xf32>
    %336 = arith.truncf %335 : vector<32x128xf32> to vector<32x128xbf16>
    %337 = tpu.concatenate %330, %333, %336 in 1 : vector<32x128xbf16>, vector<32x128xbf16>, vector<32x128xbf16> -> vector<32x384xbf16>
    %c0_261 = arith.constant 0 : index
    %c0_262 = arith.constant 0 : index
    %338 = vector.load %arg40[%c0_261, %c0_262] : memref<384x128xbf16, #tpu.memory_space<vmem>>, vector<384x128xbf16>
    %cst_263 = arith.constant dense<0.000000e+00> : vector<32x128xf32>
    %339 = tpu.matmul %337, %338, %cst_263 {dimension_numbers = #tpu.dot_dimension_numbers<[1], [0], [0], [1], [0, 0, 1, 1], [], []>} : vector<32x384xbf16>, vector<384x128xbf16>, vector<32x128xf32> -> vector<32x128xf32>
    %c0_264 = arith.constant 0 : index
    %c0_265 = arith.constant 0 : index
    %340 = vector.load %arg38[%c0_264, %c0_265] : memref<1x128xf32, #tpu.memory_space<vmem>>, vector<1x128xf32>
    %341 = vector.broadcast %340 : vector<1x128xf32> to vector<32x128xf32>
    %342 = arith.addf %339, %341 : vector<32x128xf32>
    %cst_266 = arith.constant 0.000000e+00 : f32
    %343 = vector.broadcast %cst_266 : f32 to vector<32x128xf32>
    %344 = arith.maximumf %342, %343 : vector<32x128xf32>
    %345 = arith.truncf %344 : vector<32x128xf32> to vector<32x128xbf16>
    %c0_267 = arith.constant 0 : index
    %c0_268 = arith.constant 0 : index
    %346 = vector.load %arg14[%c0_267, %c0_268] : memref<128x128xbf16, #tpu.memory_space<vmem>>, vector<128x128xbf16>
    %cst_269 = arith.constant dense<0.000000e+00> : vector<32x128xf32>
    %347 = tpu.matmul %345, %346, %cst_269 {dimension_numbers = #tpu.dot_dimension_numbers<[1], [0], [0], [1], [0, 0, 1, 1], [], []>} : vector<32x128xbf16>, vector<128x128xbf16>, vector<32x128xf32> -> vector<32x128xf32>
    %c0_270 = arith.constant 0 : index
    %c0_271 = arith.constant 0 : index
    %348 = vector.load %arg13[%c0_270, %c0_271] : memref<1x128xf32, #tpu.memory_space<vmem>>, vector<1x128xf32>
    %349 = vector.broadcast %348 : vector<1x128xf32> to vector<32x128xf32>
    %350 = arith.addf %347, %349 : vector<32x128xf32>
    %c0_272 = arith.constant 0 : index
    %c0_273 = arith.constant 0 : index
    %351 = vector.load %arg45[%c0_272, %c0_273] : memref<32x128xf32, #tpu.memory_space<vmem>>, vector<32x128xf32>
    tpu.vector_store %arg45[%c0_272, %c0_273], %350 {strides = array<i32>} : memref<32x128xf32, #tpu.memory_space<vmem>>, vector<32x128xf32>,
    return
  }
}

</mosaic_0001>

<bundles_post_ra>
// kernel: sscunet_forward.1
= control target key start
LH: loop header
LB: loop body
LE: loop exit
PB: predicated region body
PF: predicated region fallthrough
CT: control target
= control target key end

     0   :  { %s11942_s6 = smov 1   ;;  %s11943_s10 = smov 2   ;;  %s13181_s0 = inlined_call_operand.smem [shape: u32[46], index: -1, kind: input, shape index: {}] }
   0x1   :  { %s12037_s5 = sld [smem:[%s13181_s0]]   ;;  %s11944_s14 = smov 3  }
   0x2   :  { %s12042_s9 = sld [smem:[%s13181_s0 + %s11942_s6]]   ;;  %s11945_s18 = smov 4  }
   0x3   :  { %s12047_s13 = sld [smem:[%s13181_s0 + %s11943_s10]]   ;;  %s11946_s22 = smov 5  }
   0x4   :  { %s12052_s17 = sld [smem:[%s13181_s0 + %s11944_s14]]   ;;  %s11947_s26 = smov 6  }
   0x5   :  { %s12057_s21 = sld [smem:[%s13181_s0 + %s11945_s18]]   ;;  %s11948_s30 = smov 7  }
   0x6   :  { %s12062_s25 = sld [smem:[%s13181_s0 + %s11946_s22]]   ;;  %s11949_s4 = smov 8  }
   0x7   :  { %13207 = sst [smem:[#allocation73_spill]] %s12037_s5  ;;  %s11950_s10 = smov 9  }
   0x8   :  { %13208 = sst [smem:[#allocation74_spill]] %s12042_s9  ;;  %s11951_s15 = smov 10  }
   0x9   :  { %13209 = sst [smem:[#allocation75_spill]] %s12047_s13  ;;  %s11952_s20 = smov 11  }
   0xa   :  { %13210 = sst [smem:[#allocation76_spill]] %s12052_s17  ;;  %s11954_s1 = smov 13  }
   0xb   :  { %s12067_s29 = sld [smem:[%s13181_s0 + %s11947_s26]]   ;;  %s11953_s26 = smov 12  }
   0xc   :  { %13211 = sst [smem:[#allocation77_spill]] %s12062_s25  ;;  %s11955_s7 = smov 14  }
   0xd   :  { %s12072_s3 = sld [smem:[%s13181_s0 + %s11948_s30]]   ;;  %s11957_s22 = smov 16  }
   0xe   :  { %s12077_s8 = sld [smem:[%s13181_s0 + %s11949_s4]]   ;;  %s11958_s28 = smov 17  }
   0xf   :  { %s12082_s14 = sld [smem:[%s13181_s0 + %s11950_s10]]  }
  0x10   :  { %s12087_s19 = sld [smem:[%s13181_s0 + %s11951_s15]]   ;;  %s11956_s15 = smov 15  }
  0x11   :  { %13212 = sst [smem:[#allocation78_spill]] %s12067_s29 }
  0x12   :  { %s12092_s24 = sld [smem:[%s13181_s0 + %s11952_s20]]  }
  0x13   :  { %s12097_s30 = sld [smem:[%s13181_s0 + %s11953_s26]]  }
  0x14   :  { %13213 = sst [smem:[#allocation79_spill]] %s12077_s8 }
  0x15   :  { %s12102_s6 = sld [smem:[%s13181_s0 + %s11954_s1]]  }
  0x16   :  { %13214 = sst [smem:[#allocation80_spill]] %s12087_s19 }
  0x17   :  { %s12107_s12 = sld [smem:[%s13181_s0 + %s11955_s7]]   ;;  %s11959_s7 = smov 18  }
  0x18   :  { %13215 = sst [smem:[#allocation81_spill]] %s12092_s24 }
  0x19   :  { %s12112_s20 = sld [smem:[%s13181_s0 + %s11956_s15]]   ;;  %s11960_s15 = smov 19  }
  0x1a   :  { %s12117_s27 = sld [smem:[%s13181_s0 + %s11957_s22]]   ;;  %s11961_s22 = smov 20  }
  0x1b   :  { %13216 = sst [smem:[#allocation82_spill]] %s12102_s6 }
  0x1c   :  { %s12122_s4 = sld [smem:[%s13181_s0 + %s11958_s28]]   ;;  %s11962_s28 = smov 21  }
  0x1d   :  { %s12127_s13 = sld [smem:[%s13181_s0 + %s11959_s7]]   ;;  %s11963_s7 = smov 22  }
  0x1e   :  { %s12132_s9 = sld [smem:[%s13181_s0 + %s11960_s15]]   ;;  %s11964_s15 = smov 23  }
  0x1f   :  { %13217 = sst [smem:[#allocation83_spill]] %s12112_s20 }
  0x20   :  { %13218 = sst [smem:[#allocation84_spill]] %s12117_s27 }
  0x21   :  { %s12137_s25 = sld [smem:[%s13181_s0 + %s11961_s22]]   ;;  %s11965_s22 = smov 24  }
  0x22   :  { %s12142_s27 = sld [smem:[%s13181_s0 + %s11962_s28]]   ;;  %s11966_s28 = smov 25  }
  0x23   :  { %13219 = sst [smem:[#allocation85_spill]] %s12127_s13 }
  0x24   :  { %13220 = sst [smem:[#allocation86_spill]] %s12132_s9 }
  0x25   :  { %s12147_s13 = sld [smem:[%s13181_s0 + %s11963_s7]]   ;;  %s11967_s7 = smov 26  }
  0x26   :  { %s12152_s9 = sld [smem:[%s13181_s0 + %s11964_s15]]   ;;  %s11968_s15 = smov 27  }
  0x27   :  { %13221 = sst [smem:[#allocation87_spill]] %s12137_s25 }
  0x28   :  { %13222 = sst [smem:[#allocation88_spill]] %s12142_s27 }
  0x29   :  { %s12157_s25 = sld [smem:[%s13181_s0 + %s11965_s22]]   ;;  %s11969_s22 = smov 28  }
  0x2a   :  { %s12162_s19 = sld [smem:[%s13181_s0 + %s11966_s28]]   ;;  %s11970_s28 = smov 29  }
  0x2b   :  { %s12167_s5 = sld [smem:[%s13181_s0 + %s11967_s7]]   ;;  %s11971_s7 = smov 30  }
  0x2c   :  { %13223 = sst [smem:[#allocation89_spill]] %s12152_s9 }
  0x2d   :  { %s12172_s9 = sld [smem:[%s13181_s0 + %s11968_s15]]   ;;  %s11972_s15 = smov 31  }
  0x2e   :  { %s12177_s27 = sld [smem:[%s13181_s0 + %s11969_s22]]   ;;  %s11973_s22 = smov 32  }
  0x2f   :  { %s12187_s20 = sld [smem:[%s13181_s0 + %s11971_s7]]   ;;  %s11975_s7 = smov 34  }
  0x30   :  { %13224 = sst [smem:[#allocation90_spill]] %s12162_s19 }
  0x31   :  { %s12182_s19 = sld [smem:[%s13181_s0 + %s11970_s28]]   ;;  %s11974_s28 = smov 33  }
  0x32   :  { %s12197_s6 = sld [smem:[%s13181_s0 + %s11973_s22]]   ;;  %s11977_s22 = smov 36  }
  0x33   :  { %13225 = sst [smem:[#allocation91_spill]] %s12172_s9 }
  0x34   :  { %s12192_s9 = sld [smem:[%s13181_s0 + %s11972_s15]]   ;;  %s11976_s15 = smov 35  }
  0x35   :  { %s12207_s24 = sld [smem:[%s13181_s0 + %s11975_s7]]   ;;  %s11979_s7 = smov 38  }
  0x36   :  { %s12217_s8 = sld [smem:[%s13181_s0 + %s11977_s22]]   ;;  %s11981_s22 = smov 40  }
  0x37   :  { %13226 = sst [smem:[#allocation92_spill]] %s12182_s19 }
  0x38   :  { %s12202_s19 = sld [smem:[%s13181_s0 + %s11974_s28]]   ;;  %s11978_s28 = smov 37  }
  0x39   :  { %s12227_s29 = sld [smem:[%s13181_s0 + %s11979_s7]]   ;;  %s11983_s7 = smov 42  }
  0x3a   :  { %13227 = sst [smem:[#allocation93_spill]] %s12192_s9 }
  0x3b   :  { %s12212_s9 = sld [smem:[%s13181_s0 + %s11976_s15]]   ;;  %s11980_s15 = smov 39  }
  0x3c   :  { %13230 = sst [smem:[#allocation96_spill]] %s12217_s8 }
  0x3d   :  { %s12237_s8 = sld [smem:[%s13181_s0 + %s11981_s22]]   ;;  %s11985_s22 = smov 44  }
  0x3e   :  { %13228 = sst [smem:[#allocation94_spill]] %s12202_s19 }
  0x3f   :  { %s12222_s19 = sld [smem:[%s13181_s0 + %s11978_s28]]   ;;  %s11982_s28 = smov 41  }
  0x40   :  { %13231 = sst [smem:[#allocation97_spill]] %s12227_s29 }
  0x41   :  { %13229 = sst [smem:[#allocation95_spill]] %s12212_s9 }
  0x42   :  { %s12232_s9 = sld [smem:[%s13181_s0 + %s11980_s15]]   ;;  %s11984_s15 = smov 43  }
  0x43   :  { %13233 = sst [smem:[#allocation99_spill]] %s12237_s8 }
  0x44   :  { %s12242_s17 = sld [smem:[%s13181_s0 + %s11982_s28]]   ;;  %s11986_s28 = smov 45  }
  0x45   :  { %s12247_s29 = sld [smem:[%s13181_s0 + %s11983_s7]]  }
  0x46   :  { %s12257_s8 = sld [smem:[%s13181_s0 + %s11985_s22]]  }
  0x48   :  { %13232 = sst [smem:[#allocation98_spill]] %s12232_s9 }
  0x49   :  { %s12252_s9 = sld [smem:[%s13181_s0 + %s11984_s15]]  }
  0x4a   :  { %13234 = sst [smem:[#allocation100_spill]] %s12242_s17 }
  0x4b   :  { %s12262_s17 = sld [smem:[%s13181_s0 + %s11986_s28]]  }
  0x4c   :  { %96 = vsyncpa [#allocation3], 0 }
  0x4d   :  { %97 = vsyncpa [#allocation5], 0 }
  0x4e   :  { %98 = vsyncpa [#allocation8], 0 }
  0x4f   :  { %99 = vsyncpa [#allocation11], 0 }
  0x50   :  { %100 = vsyncpa [#allocation14], 0 }
  0x51   :  { %101 = vsyncpa [#allocation17], 0 }
  0x52   :  { %102 = vsyncpa [#allocation20], 0 }
  0x53   :  { %103 = vsyncpa [#allocation23], 0 }
  0x54   :  { %104 = vsyncpa [#allocation26], 0 }
  0x55   :  { %105 = vsyncpa [#allocation29], 0 }
  0x56   :  { %106 = vsyncpa [#allocation32], 0 }
  0x57   :  { %107 = vsyncpa [#allocation35], 0 }
  0x58   :  { %108 = vsyncpa [#allocation38], 0 }
  0x59   :  { %109 = vsyncpa [#allocation41], 0 }
  0x5a   :  { %110 = vsyncpa [#allocation44], 0 }
  0x5b   :  { %111 = vsyncpa [#allocation47], 0 }
  0x5c   :  { %112 = vsyncpa [#allocation50], 0 }
  0x5d   :  { %113 = vsyncpa [#allocation53], 0  ;;  %s11987_s0 = smov [#allocation4]   ;;  %s11988_s10 = smov [#allocation7]  }
  0x5e   :  { %s137_s7 = sshll.u32 %s11987_s0, 4  ;;  %s164_s11 = sshll.u32 %s11988_s10, 4  ;;  %s138_s7 = int_to_ptr.vmem [resolvable:$true] %s137_s7  ;;  %s12264_s11 = int_to_ptr.vmem [resolvable:$true] %s164_s11 }
  0x5f   :  { %s11136_s15 = scalar_lea.hbm %s12057_s21, 1024 }
  0x60   :  { %p11137_p0 = scmp.ne.s32.totalorder %s12057_s21, %s11136_s15  ;;  %p11140_p1 = scmp.lt.u32.totalorder %s11136_s15, %s12057_s21 }
  0x62   :  { %p11142_p2 = pnand %p11140_p1, %p11137_p0 }
  0x64   :  { %11145 = shalt.err (!%p11142_p2)
}
  0x65   :  { %s11146_s16 = scalar_lea.vmem %s138_s7, 1024  ;;  %p11151_p4 = scmp.lt.s32.totalorder %s138_s7, %s138_s7 }
  0x66   :  { %p11147_p3 = scmp.ne.s32.totalorder %s138_s7, %s11146_s16  ;;  %p11152_p5 = scmp.lt.s32.totalorder %s11146_s16, %s11146_s16 }
  0x68   :  { %p11153_p6 = por %p11152_p5, %p11151_p4 }
  0x6a   :  { %p11154_p7 = pnand %p11153_p6, %p11147_p3 }
  0x6c   :  { %11157 = shalt.err (!%p11154_p7)
}
  0x6d   :  { %s11989_s18 = smov 64   ;;  %s11990_s22 = smov 4  }
  0x6e   :  { %143 = dma.hbm_to_vmem [thread:$0]  %s12057_s21, 1024, %s138_s7, [#allocation5], %s11989_s18, %s11989_s18, %s11990_s22  }
  0x6f   :  { %s11158_s23 = scalar_lea.hbm %s12072_s3, 16 }
  0x70   :  { %p11159_p8 = scmp.ne.s32.totalorder %s12072_s3, %s11158_s23  ;;  %p11162_p9 = scmp.lt.u32.totalorder %s11158_s23, %s12072_s3 }
  0x72   :  { %p11164_p10 = pnand %p11162_p9, %p11159_p8 }
  0x74   :  { %11167 = shalt.err (!%p11164_p10)
}
  0x75   :  { %s11168_s26 = scalar_lea.vmem %s12264_s11, 16  ;;  %s11172_s28 = scalar_lea.vmem %s12264_s11, 32 }
  0x76   :  { %p11169_p11 = scmp.ne.s32.totalorder %s12264_s11, %s11168_s26  ;;  %p11173_p12 = scmp.lt.s32.totalorder %s12264_s11, %s12264_s11 }
  0x77   :  { %p11174_p13 = scmp.lt.s32.totalorder %s11172_s28, %s11168_s26 }
  0x79   :  { %p11175_p0 = por %p11174_p13, %p11173_p12 }
  0x7b   :  { %p11176_p1 = pnand %p11175_p0, %p11169_p11 }
  0x7d   :  { %11179 = shalt.err (!%p11176_p1)
}
  0x7e   :  { %167 = dma.hbm_to_vmem [thread:$0]  %s12072_s3, 16, %s12264_s11, [#allocation8]  }
  0x7f   :  { %s11991_s21 = smov [#allocation10]   ;;  %s11992_s2 = smov [#allocation13]  }
  0x80   :  { %s186_s1 = sshll.u32 %s11991_s21, 4  ;;  %s207_s0 = sshll.u32 %s11992_s2, 4  ;;  %s187_s1 = int_to_ptr.vmem [resolvable:$true] %s186_s1  ;;  %s12283_s0 = int_to_ptr.vmem [resolvable:$true] %s207_s0 }
  0x81   :  { %s11180_s7 = scalar_lea.hbm %s12082_s14, 16 }
  0x82   :  { %p11181_p2 = scmp.ne.s32.totalorder %s12082_s14, %s11180_s7  ;;  %p11184_p3 = scmp.lt.u32.totalorder %s11180_s7, %s12082_s14 }
  0x84   :  { %p11186_p4 = pnand %p11184_p3, %p11181_p2 }
  0x86   :  { %11189 = shalt.err (!%p11186_p4)
}
  0x87   :  { %s11190_s10 = scalar_lea.vmem %s187_s1, 16  ;;  %s11194_s15 = scalar_lea.vmem %s187_s1, 32 }
  0x88   :  { %p11191_p5 = scmp.ne.s32.totalorder %s187_s1, %s11190_s10  ;;  %p11195_p6 = scmp.lt.s32.totalorder %s187_s1, %s187_s1 }
  0x89   :  { %p11196_p7 = scmp.lt.s32.totalorder %s11194_s15, %s11190_s10 }
  0x8b   :  { %p11197_p8 = por %p11196_p7, %p11195_p6 }
  0x8d   :  { %p11198_p9 = pnand %p11197_p8, %p11191_p5 }
  0x8f   :  { %11201 = shalt.err (!%p11198_p9)
}
  0x90   :  { %189 = dma.hbm_to_vmem [thread:$0]  %s12082_s14, 16, %s187_s1, [#allocation11]  }
  0x91   :  { %s11202_s3 = scalar_lea.hbm %s12097_s30, 4096 }
  0x92   :  { %p11203_p10 = scmp.ne.s32.totalorder %s12097_s30, %s11202_s3  ;;  %p11206_p11 = scmp.lt.u32.totalorder %s11202_s3, %s12097_s30 }
  0x94   :  { %p11208_p12 = pnand %p11206_p11, %p11203_p10 }
  0x96   :  { %11211 = shalt.err (!%p11208_p12)
}
  0x97   :  { %s11212_s11 = scalar_lea.vmem %s12283_s0, 4096  ;;  %p11217_p0 = scmp.lt.s32.totalorder %s12283_s0, %s12283_s0 }
  0x98   :  { %p11213_p13 = scmp.ne.s32.totalorder %s12283_s0, %s11212_s11  ;;  %p11218_p1 = scmp.lt.s32.totalorder %s11212_s11, %s11212_s11 }
  0x9a   :  { %p11219_p2 = por %p11218_p1, %p11217_p0 }
  0x9c   :  { %p11220_p3 = pnand %p11219_p2, %p11213_p13 }
  0x9e   :  { %11223 = shalt.err (!%p11220_p3)
}
  0x9f   :  { %213 = dma.hbm_to_vmem [thread:$0]  %s12097_s30, 4096, %s12283_s0, [#allocation14], %s11989_s18, %s11989_s18, %s11990_s22  }
  0xa0   :  { %s11993_s14 = smov [#allocation16]   ;;  %s11994_s23 = smov [#allocation19]  }
  0xa1   :  { %s229_s16 = sshll.u32 %s11993_s14, 4  ;;  %s255_s26 = sshll.u32 %s11994_s23, 4  ;;  %s230_s16 = int_to_ptr.vmem [resolvable:$true] %s229_s16  ;;  %s12301_s26 = int_to_ptr.vmem [resolvable:$true] %s255_s26 }
  0xa2   :  { %s11224_s28 = scalar_lea.hbm %s12107_s12, 1024 }
  0xa3   :  { %p11225_p4 = scmp.ne.s32.totalorder %s12107_s12, %s11224_s28  ;;  %p11228_p5 = scmp.lt.u32.totalorder %s11224_s28, %s12107_s12 }
  0xa5   :  { %p11230_p6 = pnand %p11228_p5, %p11225_p4 }
  0xa7   :  { %11233 = shalt.err (!%p11230_p6)
}
  0xa8   :  { %s11234_s21 = scalar_lea.vmem %s230_s16, 1024  ;;  %p11239_p8 = scmp.lt.s32.totalorder %s230_s16, %s230_s16 }
  0xa9   :  { %p11235_p7 = scmp.ne.s32.totalorder %s230_s16, %s11234_s21  ;;  %p11240_p9 = scmp.lt.s32.totalorder %s11234_s21, %s11234_s21 }
  0xab   :  { %p11241_p10 = por %p11240_p9, %p11239_p8 }
  0xad   :  { %p11242_p11 = pnand %p11241_p10, %p11235_p7 }
  0xaf   :  { %11245 = shalt.err (!%p11242_p11)
}
  0xb0   :  { %235 = dma.hbm_to_vmem [thread:$0]  %s12107_s12, 1024, %s230_s16, [#allocation17], %s11989_s18, %s11989_s18, %s11990_s22  }
  0xb1   :  { %s11246_s30 = scalar_lea.hbm %s12122_s4, 256 }
  0xb2   :  { %p11247_p12 = scmp.ne.s32.totalorder %s12122_s4, %s11246_s30  ;;  %p11250_p13 = scmp.lt.u32.totalorder %s11246_s30, %s12122_s4 }
  0xb4   :  { %p11252_p0 = pnand %p11250_p13, %p11247_p12 }
  0xb6   :  { %11255 = shalt.err (!%p11252_p0)
}
  0xb7   :  { %s11256_s1 = scalar_lea.vmem %s12301_s26, 256  ;;  %p11261_p2 = scmp.lt.s32.totalorder %s12301_s26, %s12301_s26 }
  0xb8   :  { %p11257_p1 = scmp.ne.s32.totalorder %s12301_s26, %s11256_s1  ;;  %p11262_p3 = scmp.lt.s32.totalorder %s11256_s1, %s11256_s1 }
  0xba   :  { %p11263_p4 = por %p11262_p3, %p11261_p2 }
  0xbc   :  { %p11264_p5 = pnand %p11263_p4, %p11257_p1 }
  0xbe   :  { %11267 = shalt.err (!%p11264_p5)
}
  0xbf   :  { %261 = dma.hbm_to_vmem [thread:$0]  %s12122_s4, 256, %s12301_s26, [#allocation20], %s11989_s18, %s11989_s18, %s11990_s22  }
  0xc0   :  { %s11995_s12 = smov [#allocation22]   ;;  %s11996_s0 = smov [#allocation25]  }
  0xc1   :  { %s286_s2 = sshll.u32 %s11995_s12, 4  ;;  %s305_s7 = sshll.u32 %s11996_s0, 4  ;;  %s287_s2 = int_to_ptr.vmem [resolvable:$true] %s286_s2  ;;  %s12322_s7 = int_to_ptr.vmem [resolvable:$true] %s305_s7 }
  0xc2   :  { %s11268_s10 = scalar_lea.hbm %s12147_s13, 64 }
  0xc3   :  { %p11269_p6 = scmp.ne.s32.totalorder %s12147_s13, %s11268_s10  ;;  %p11272_p7 = scmp.lt.u32.totalorder %s11268_s10, %s12147_s13 }
  0xc5   :  { %p11274_p8 = pnand %p11272_p7, %p11269_p6 }
  0xc7   :  { %11277 = shalt.err (!%p11274_p8)
}
  0xc8   :  { %s11278_s15 = scalar_lea.vmem %s287_s2, 64  ;;  %p11283_p10 = scmp.lt.s32.totalorder %s287_s2, %s287_s2 }
  0xc9   :  { %p11279_p9 = scmp.ne.s32.totalorder %s287_s2, %s11278_s15  ;;  %p11284_p11 = scmp.lt.s32.totalorder %s11278_s15, %s11278_s15 }
  0xcb   :  { %p11285_p12 = por %p11284_p11, %p11283_p10 }
  0xcd   :  { %p11286_p13 = pnand %p11285_p12, %p11279_p9 }
  0xcf   :  { %11289 = shalt.err (!%p11286_p13)
}
  0xd0   :  { %289 = dma.hbm_to_vmem [thread:$0]  %s12147_s13, 64, %s287_s2, [#allocation23]  }
  0xd1   :  { %s11290_s4 = scalar_lea.hbm %s12157_s25, 4096 }
  0xd2   :  { %p11291_p0 = scmp.ne.s32.totalorder %s12157_s25, %s11290_s4  ;;  %p11294_p1 = scmp.lt.u32.totalorder %s11290_s4, %s12157_s25 }
  0xd4   :  { %p11296_p2 = pnand %p11294_p1, %p11291_p0 }
  0xd6   :  { %11299 = shalt.err (!%p11296_p2)
}
  0xd7   :  { %s11300_s3 = scalar_lea.vmem %s12322_s7, 4096  ;;  %p11305_p4 = scmp.lt.s32.totalorder %s12322_s7, %s12322_s7 }
  0xd8   :  { %p11301_p3 = scmp.ne.s32.totalorder %s12322_s7, %s11300_s3  ;;  %p11306_p5 = scmp.lt.s32.totalorder %s11300_s3, %s11300_s3 }
  0xda   :  { %p11307_p6 = por %p11306_p5, %p11305_p4 }
  0xdc   :  { %p11308_p7 = pnand %p11307_p6, %p11301_p3 }
  0xde   :  { %11311 = shalt.err (!%p11308_p7)
}
  0xdf   :  { %s11997_s11 = smov 256   ;;  %s11998_s13 = smov 16  }
  0xe0   :  { %311 = dma.hbm_to_vmem [thread:$0]  %s12157_s25, 4096, %s12322_s7, [#allocation26], %s11997_s11, %s11997_s11, %s11998_s13  }
  0xe1   :  { %s11999_s14 = smov [#allocation28]   ;;  %s12000_s23 = smov [#allocation31]  }
  0xe2   :  { %s328_s16 = sshll.u32 %s11999_s14, 4  ;;  %s349_s26 = sshll.u32 %s12000_s23, 4  ;;  %s329_s16 = int_to_ptr.vmem [resolvable:$true] %s328_s16  ;;  %s12340_s26 = int_to_ptr.vmem [resolvable:$true] %s349_s26 }
  0xe3   :  { %s11312_s28 = scalar_lea.hbm %s12167_s5, 16 }
  0xe4   :  { %p11313_p8 = scmp.ne.s32.totalorder %s12167_s5, %s11312_s28  ;;  %p11316_p9 = scmp.lt.u32.totalorder %s11312_s28, %s12167_s5 }
  0xe6   :  { %p11318_p10 = pnand %p11316_p9, %p11313_p8 }
  0xe8   :  { %11321 = shalt.err (!%p11318_p10)
}
  0xe9   :  { %s11322_s21 = scalar_lea.vmem %s329_s16, 16  ;;  %s11326_s30 = scalar_lea.vmem %s329_s16, 32 }
  0xea   :  { %p11323_p11 = scmp.ne.s32.totalorder %s329_s16, %s11322_s21  ;;  %p11327_p12 = scmp.lt.s32.totalorder %s329_s16, %s329_s16 }
  0xeb   :  { %p11328_p13 = scmp.lt.s32.totalorder %s11326_s30, %s11322_s21 }
  0xed   :  { %p11329_p0 = por %p11328_p13, %p11327_p12 }
  0xef   :  { %p11330_p1 = pnand %p11329_p0, %p11323_p11 }
  0xf1   :  { %11333 = shalt.err (!%p11330_p1)
}
  0xf2   :  { %331 = dma.hbm_to_vmem [thread:$0]  %s12167_s5, 16, %s329_s16, [#allocation29]  }
  0xf3   :  { %s11334_s25 = scalar_lea.hbm %s12177_s27, 3072 }
  0xf4   :  { %p11335_p2 = scmp.ne.s32.totalorder %s12177_s27, %s11334_s25  ;;  %p11338_p3 = scmp.lt.u32.totalorder %s11334_s25, %s12177_s27 }
  0xf6   :  { %p11340_p4 = pnand %p11338_p3, %p11335_p2 }
  0xf8   :  { %11343 = shalt.err (!%p11340_p4)
}
  0xf9   :  { %s11344_s1 = scalar_lea.vmem %s12340_s26, 3072  ;;  %p11349_p6 = scmp.lt.s32.totalorder %s12340_s26, %s12340_s26 }
  0xfa   :  { %p11345_p5 = scmp.ne.s32.totalorder %s12340_s26, %s11344_s1  ;;  %p11350_p7 = scmp.lt.s32.totalorder %s11344_s1, %s11344_s1 }
  0xfc   :  { %p11351_p8 = por %p11350_p7, %p11349_p6 }
  0xfe   :  { %p11352_p9 = pnand %p11351_p8, %p11345_p5 }
 0x100   :  { %11355 = shalt.err (!%p11352_p9)
}
 0x101   :  { %355 = dma.hbm_to_vmem [thread:$0]  %s12177_s27, 3072, %s12340_s26, [#allocation32], %s11989_s18, %s11989_s18, %s11990_s22  }
 0x102   :  { %s12001_s5 = smov [#allocation34]   ;;  %s12002_s2 = smov [#allocation37]  }
 0x103   :  { %s372_s12 = sshll.u32 %s12001_s5, 4  ;;  %s393_s0 = sshll.u32 %s12002_s2, 4  ;;  %s373_s12 = int_to_ptr.vmem [resolvable:$true] %s372_s12  ;;  %s12358_s0 = int_to_ptr.vmem [resolvable:$true] %s393_s0 }
 0x104   :  { %s11356_s7 = scalar_lea.hbm %s12187_s20, 16 }
 0x105   :  { %p11357_p10 = scmp.ne.s32.totalorder %s12187_s20, %s11356_s7  ;;  %p11360_p11 = scmp.lt.u32.totalorder %s11356_s7, %s12187_s20 }
 0x107   :  { %p11362_p12 = pnand %p11360_p11, %p11357_p10 }
 0x109   :  { %11365 = shalt.err (!%p11362_p12)
}
 0x10a   :  { %s11366_s10 = scalar_lea.vmem %s373_s12, 16  ;;  %s11370_s15 = scalar_lea.vmem %s373_s12, 32 }
 0x10b   :  { %p11367_p13 = scmp.ne.s32.totalorder %s373_s12, %s11366_s10  ;;  %p11371_p0 = scmp.lt.s32.totalorder %s373_s12, %s373_s12 }
 0x10c   :  { %p11372_p1 = scmp.lt.s32.totalorder %s11370_s15, %s11366_s10 }
 0x10e   :  { %p11373_p2 = por %p11372_p1, %p11371_p0 }
 0x110   :  { %p11374_p3 = pnand %p11373_p2, %p11367_p13 }
 0x112   :  { %11377 = shalt.err (!%p11374_p3)
}
 0x113   :  { %375 = dma.hbm_to_vmem [thread:$0]  %s12187_s20, 16, %s373_s12, [#allocation35]  }
 0x114   :  { %s11378_s27 = scalar_lea.hbm %s12197_s6, 3072 }
 0x115   :  { %p11379_p4 = scmp.ne.s32.totalorder %s12197_s6, %s11378_s27  ;;  %p11382_p5 = scmp.lt.u32.totalorder %s11378_s27, %s12197_s6 }
 0x117   :  { %p11384_p6 = pnand %p11382_p5, %p11379_p4 }
 0x119   :  { %11387 = shalt.err (!%p11384_p6)
}
 0x11a   :  { %s11388_s4 = scalar_lea.vmem %s12358_s0, 3072  ;;  %p11393_p8 = scmp.lt.s32.totalorder %s12358_s0, %s12358_s0 }
 0x11b   :  { %p11389_p7 = scmp.ne.s32.totalorder %s12358_s0, %s11388_s4  ;;  %p11394_p9 = scmp.lt.s32.totalorder %s11388_s4, %s11388_s4 }
 0x11d   :  { %p11395_p10 = por %p11394_p9, %p11393_p8 }
 0x11f   :  { %p11396_p11 = pnand %p11395_p10, %p11389_p7 }
 0x121   :  { %11399 = shalt.err (!%p11396_p11)
}
 0x122   :  { %399 = dma.hbm_to_vmem [thread:$0]  %s12197_s6, 3072, %s12358_s0, [#allocation38], %s11989_s18, %s11989_s18, %s11990_s22  }
 0x123   :  { %s12003_s20 = smov [#allocation40]   ;;  %s12004_s14 = smov [#allocation43]  }
 0x124   :  { %s416_s3 = sshll.u32 %s12003_s20, 4  ;;  %s440_s16 = sshll.u32 %s12004_s14, 4  ;;  %s417_s3 = int_to_ptr.vmem [resolvable:$true] %s416_s3  ;;  %s441_s16 = int_to_ptr.vmem [resolvable:$true] %s440_s16 }
 0x125   :  { %s11400_s23 = scalar_lea.hbm %s12207_s24, 16 }
 0x126   :  { %p11401_p12 = scmp.ne.s32.totalorder %s12207_s24, %s11400_s23  ;;  %p11404_p13 = scmp.lt.u32.totalorder %s11400_s23, %s12207_s24 }
 0x128   :  { %p11406_p0 = pnand %p11404_p13, %p11401_p12 }
 0x12a   :  { %11409 = shalt.err (!%p11406_p0)
}
 0x12b   :  { %s11410_s26 = scalar_lea.vmem %s417_s3, 16  ;;  %s11414_s28 = scalar_lea.vmem %s417_s3, 32 }
 0x12c   :  { %p11411_p1 = scmp.ne.s32.totalorder %s417_s3, %s11410_s26  ;;  %p11415_p2 = scmp.lt.s32.totalorder %s417_s3, %s417_s3 }
 0x12d   :  { %p11416_p3 = scmp.lt.s32.totalorder %s11414_s28, %s11410_s26 }
 0x12f   :  { %p11417_p4 = por %p11416_p3, %p11415_p2 }
 0x131   :  { %p11418_p5 = pnand %p11417_p4, %p11411_p1 }
 0x133   :  { %11421 = shalt.err (!%p11418_p5)
}
 0x134   :  { %419 = dma.hbm_to_vmem [thread:$0]  %s12207_s24, 16, %s417_s3, [#allocation41]  }
 0x135   :  { %s11422_s6 = scalar_lea.hbm %s12222_s19, 16 }
 0x136   :  { %p11423_p6 = scmp.ne.s32.totalorder %s12222_s19, %s11422_s6  ;;  %p11426_p7 = scmp.lt.u32.totalorder %s11422_s6, %s12222_s19 }
 0x138   :  { %p11428_p8 = pnand %p11426_p7, %p11423_p6 }
 0x13a   :  { %11431 = shalt.err (!%p11428_p8)
}
 0x13b   :  { %s11432_s21 = scalar_lea.vmem %s441_s16, 16  ;;  %s11436_s30 = scalar_lea.vmem %s441_s16, 32 }
 0x13c   :  { %p11433_p9 = scmp.ne.s32.totalorder %s441_s16, %s11432_s21  ;;  %p11437_p10 = scmp.lt.s32.totalorder %s441_s16, %s441_s16 }
 0x13d   :  { %p11438_p11 = scmp.lt.s32.totalorder %s11436_s30, %s11432_s21 }
 0x13f   :  { %p11439_p12 = por %p11438_p11, %p11437_p10 }
 0x141   :  { %p11440_p13 = pnand %p11439_p12, %p11433_p9 }
 0x143   :  { %11443 = shalt.err (!%p11440_p13)
}
 0x144   :  { %s13235_s25 = sld [smem:[#allocation98_spill]]  ;;  %s12005_s1 = smov [#allocation46]  }
 0x145   :  { %443 = dma.hbm_to_vmem [thread:$0]  %s12222_s19, 16, %s441_s16, [#allocation44]  }
 0x146   :  { %s459_s24 = sshll.u32 %s12005_s1, 4  ;;  %s12006_s5 = smov [#allocation49]   ;;  %s460_s24 = int_to_ptr.vmem [resolvable:$true] %s459_s24 }
 0x147   :  { %s484_s12 = sshll.u32 %s12006_s5, 4  ;;  %s485_s12 = int_to_ptr.vmem [resolvable:$true] %s484_s12 }
 0x14a   :  { %s11444_s2 = scalar_lea.hbm %s13235_s25, 6144 }
 0x14b   :  { %p11445_p0 = scmp.ne.s32.totalorder %s13235_s25, %s11444_s2  ;;  %p11448_p1 = scmp.lt.u32.totalorder %s11444_s2, %s13235_s25 }
 0x14d   :  { %p11450_p2 = pnand %p11448_p1, %p11445_p0 }
 0x14f   :  { %11453 = shalt.err (!%p11450_p2)
}
 0x150   :  { %s11454_s0 = scalar_lea.vmem %s460_s24, 6144  ;;  %p11459_p4 = scmp.lt.s32.totalorder %s460_s24, %s460_s24 }
 0x151   :  { %p11455_p3 = scmp.ne.s32.totalorder %s460_s24, %s11454_s0  ;;  %p11460_p5 = scmp.lt.s32.totalorder %s11454_s0, %s11454_s0 }
 0x153   :  { %p11461_p6 = por %p11460_p5, %p11459_p4 }
 0x155   :  { %p11462_p7 = pnand %p11461_p6, %p11455_p3 }
 0x157   :  { %11465 = shalt.err (!%p11462_p7)
}
 0x158   :  { %s13236_s19 = sld [smem:[#allocation100_spill]] }
 0x159   :  { %465 = dma.hbm_to_vmem [thread:$0]  %s13235_s25, 6144, %s460_s24, [#allocation47], %s11989_s18, %s11989_s18, %s11990_s22  }
 0x15e   :  { %s11466_s7 = scalar_lea.hbm %s13236_s19, 64 }
 0x15f   :  { %p11467_p8 = scmp.ne.s32.totalorder %s13236_s19, %s11466_s7  ;;  %p11470_p9 = scmp.lt.u32.totalorder %s11466_s7, %s13236_s19 }
 0x161   :  { %p11472_p10 = pnand %p11470_p9, %p11467_p8 }
 0x163   :  { %11475 = shalt.err (!%p11472_p10)
}
 0x164   :  { %s11476_s10 = scalar_lea.vmem %s485_s12, 64  ;;  %p11481_p12 = scmp.lt.s32.totalorder %s485_s12, %s485_s12 }
 0x165   :  { %p11477_p11 = scmp.ne.s32.totalorder %s485_s12, %s11476_s10  ;;  %p11482_p13 = scmp.lt.s32.totalorder %s11476_s10, %s11476_s10 }
 0x167   :  { %p11483_p0 = por %p11482_p13, %p11481_p12 }
 0x169   :  { %p11484_p1 = pnand %p11483_p0, %p11477_p11 }
 0x16b   :  { %11487 = shalt.err (!%p11484_p1)
}
 0x16c   :  { %487 = dma.hbm_to_vmem [thread:$0]  %s13236_s19, 64, %s485_s12, [#allocation50]  }
 0x16d   :  { %s12007_s15 = smov [#allocation52]   ;;  %s12008_s4 = smov [#allocation2]  }
 0x16e   :  { %s506_s27 = sshll.u32 %s12007_s15, 4  ;;  %s125_s20 = sshll.u32 %s12008_s4, 4  ;;  %s507_s27 = int_to_ptr.vmem [resolvable:$true] %s506_s27  ;;  %s12395_s20 = int_to_ptr.vmem [resolvable:$true] %s125_s20 }
 0x16f   :  { %s11488_s3 = scalar_lea.hbm %s12252_s9, 64 }
 0x170   :  { %p11489_p2 = scmp.ne.s32.totalorder %s12252_s9, %s11488_s3  ;;  %p11492_p3 = scmp.lt.u32.totalorder %s11488_s3, %s12252_s9 }
 0x172   :  { %p11494_p4 = pnand %p11492_p3, %p11489_p2 }
 0x174   :  { %11497 = shalt.err (!%p11494_p4)
}
 0x175   :  { %s11498_s14 = scalar_lea.vmem %s507_s27, 64  ;;  %p11503_p6 = scmp.lt.s32.totalorder %s507_s27, %s507_s27 }
 0x176   :  { %p11499_p5 = scmp.ne.s32.totalorder %s507_s27, %s11498_s14  ;;  %p11504_p7 = scmp.lt.s32.totalorder %s11498_s14, %s11498_s14 }
 0x178   :  { %p11505_p8 = por %p11504_p7, %p11503_p6 }
 0x17a   :  { %p11506_p9 = pnand %p11505_p8, %p11499_p5 }
 0x17c   :  { %11509 = shalt.err (!%p11506_p9)
}
 0x17d   :  { %s13237_s16 = sld [smem:[#allocation76_spill]] }
 0x17e   :  { %509 = dma.hbm_to_vmem [thread:$0]  %s12252_s9, 64, %s507_s27, [#allocation53]  }
 0x183   :  { %s11510_s23 = scalar_lea.hbm %s13237_s16, 1024 }
 0x184   :  { %p11511_p10 = scmp.ne.s32.totalorder %s13237_s16, %s11510_s23  ;;  %p11514_p11 = scmp.lt.u32.totalorder %s11510_s23, %s13237_s16 }
 0x186   :  { %p11516_p12 = pnand %p11514_p11, %p11511_p10 }
 0x188   :  { %11519 = shalt.err (!%p11516_p12)
}
 0x189   :  { %s11520_s26 = scalar_lea.vmem %s12395_s20, 1024  ;;  %p11525_p0 = scmp.lt.s32.totalorder %s12395_s20, %s12395_s20 }
 0x18a   :  { %p11521_p13 = scmp.ne.s32.totalorder %s12395_s20, %s11520_s26  ;;  %p11526_p1 = scmp.lt.s32.totalorder %s11520_s26, %s11520_s26 }
 0x18c   :  { %p11527_p2 = por %p11526_p1, %p11525_p0 }
 0x18e   :  { %p11528_p3 = pnand %p11527_p2, %p11521_p13 }
 0x190   :  { %11531 = shalt.err (!%p11528_p3)
}
 0x191   :  { %s13238_s9 = sld [smem:[#allocation78_spill]]  ;;  %s12009_s28 = smov [#allocation6]  }
 0x192   :  { %131 = dma.hbm_to_vmem [thread:$0]  %s13237_s16, 1024, %s12395_s20, [#allocation3], %s11989_s18, %s11989_s18, %s11990_s22  }
 0x193   :  { %s151_s6 = sshll.u32 %s12009_s28, 4  ;;  %s12010_s21 = smov [#allocation9]   ;;  %s152_s6 = int_to_ptr.vmem [resolvable:$true] %s151_s6 }
 0x194   :  { %s173_s30 = sshll.u32 %s12010_s21, 4  ;;  %s12413_s30 = int_to_ptr.vmem [resolvable:$true] %s173_s30 }
 0x197   :  { %s11532_s25 = scalar_lea.hbm %s13238_s9, 3072 }
 0x198   :  { %p11533_p4 = scmp.ne.s32.totalorder %s13238_s9, %s11532_s25  ;;  %p11536_p5 = scmp.lt.u32.totalorder %s11532_s25, %s13238_s9 }
 0x19a   :  { %p11538_p6 = pnand %p11536_p5, %p11533_p4 }
 0x19c   :  { %11541 = shalt.err (!%p11538_p6)
}
 0x19d   :  { %s11542_s1 = scalar_lea.vmem %s152_s6, 3072  ;;  %p11547_p8 = scmp.lt.s32.totalorder %s152_s6, %s152_s6 }
 0x19e   :  { %p11543_p7 = scmp.ne.s32.totalorder %s152_s6, %s11542_s1  ;;  %p11548_p9 = scmp.lt.s32.totalorder %s11542_s1, %s11542_s1 }
 0x1a0   :  { %p11549_p10 = por %p11548_p9, %p11547_p8 }
 0x1a2   :  { %p11550_p11 = pnand %p11549_p10, %p11543_p7 }
 0x1a4   :  { %11553 = shalt.err (!%p11550_p11)
}
 0x1a5   :  { %s13239_s24 = sld [smem:[#allocation79_spill]] }
 0x1a6   :  { %157 = dma.hbm_to_vmem [thread:$0]  %s13238_s9, 3072, %s152_s6, [#allocation5], %s11989_s18, %s11989_s18, %s11990_s22  }
 0x1ab   :  { %s11554_s5 = scalar_lea.hbm %s13239_s24, 3072 }
 0x1ac   :  { %p11555_p12 = scmp.ne.s32.totalorder %s13239_s24, %s11554_s5  ;;  %p11558_p13 = scmp.lt.u32.totalorder %s11554_s5, %s13239_s24 }
 0x1ae   :  { %p11560_p0 = pnand %p11558_p13, %p11555_p12 }
 0x1b0   :  { %11563 = shalt.err (!%p11560_p0)
}
 0x1b1   :  { %s11564_s12 = scalar_lea.vmem %s12413_s30, 3072  ;;  %p11569_p2 = scmp.lt.s32.totalorder %s12413_s30, %s12413_s30 }
 0x1b2   :  { %p11565_p1 = scmp.ne.s32.totalorder %s12413_s30, %s11564_s12  ;;  %p11570_p3 = scmp.lt.s32.totalorder %s11564_s12, %s11564_s12 }
 0x1b4   :  { %p11571_p4 = por %p11570_p3, %p11569_p2 }
 0x1b6   :  { %p11572_p5 = pnand %p11571_p4, %p11565_p1 }
 0x1b8   :  { %11575 = shalt.err (!%p11572_p5)
}
 0x1b9   :  { %s13240_s2 = sld [smem:[#allocation81_spill]]  ;;  %s12011_s0 = smov [#allocation12]  }
 0x1ba   :  { %179 = dma.hbm_to_vmem [thread:$0]  %s13239_s24, 3072, %s12413_s30, [#allocation8], %s11989_s18, %s11989_s18, %s11990_s22  }
 0x1bb   :  { %s198_s19 = sshll.u32 %s12011_s0, 4  ;;  %s12012_s7 = smov [#allocation15]   ;;  %s199_s19 = int_to_ptr.vmem [resolvable:$true] %s198_s19 }
 0x1bc   :  { %s220_s10 = sshll.u32 %s12012_s7, 4  ;;  %s221_s10 = int_to_ptr.vmem [resolvable:$true] %s220_s10 }
 0x1bf   :  { %s11576_s15 = scalar_lea.hbm %s13240_s2, 16 }
 0x1c0   :  { %p11577_p6 = scmp.ne.s32.totalorder %s13240_s2, %s11576_s15  ;;  %p11580_p7 = scmp.lt.u32.totalorder %s11576_s15, %s13240_s2 }
 0x1c2   :  { %p11582_p8 = pnand %p11580_p7, %p11577_p6 }
 0x1c4   :  { %11585 = shalt.err (!%p11582_p8)
}
 0x1c5   :  { %s11586_s27 = scalar_lea.vmem %s199_s19, 16  ;;  %s11590_s4 = scalar_lea.vmem %s199_s19, 32 }
 0x1c6   :  { %p11587_p9 = scmp.ne.s32.totalorder %s199_s19, %s11586_s27  ;;  %p11591_p10 = scmp.lt.s32.totalorder %s199_s19, %s199_s19 }
 0x1c7   :  { %p11592_p11 = scmp.lt.s32.totalorder %s11590_s4, %s11586_s27 }
 0x1c9   :  { %p11593_p12 = por %p11592_p11, %p11591_p10 }
 0x1cb   :  { %p11594_p13 = pnand %p11593_p12, %p11587_p9 }
 0x1cd   :  { %11597 = shalt.err (!%p11594_p13)
}
 0x1ce   :  { %s13241_s20 = sld [smem:[#allocation82_spill]] }
 0x1cf   :  { %201 = dma.hbm_to_vmem [thread:$0]  %s13240_s2, 16, %s199_s19, [#allocation11]  }
 0x1d4   :  { %s11598_s3 = scalar_lea.hbm %s13241_s20, 16 }
 0x1d5   :  { %p11599_p0 = scmp.ne.s32.totalorder %s13241_s20, %s11598_s3  ;;  %p11602_p1 = scmp.lt.u32.totalorder %s11598_s3, %s13241_s20 }
 0x1d7   :  { %p11604_p2 = pnand %p11602_p1, %p11599_p0 }
 0x1d9   :  { %11607 = shalt.err (!%p11604_p2)
}
 0x1da   :  { %s11608_s14 = scalar_lea.vmem %s221_s10, 16  ;;  %s11612_s16 = scalar_lea.vmem %s221_s10, 32 }
 0x1db   :  { %p11609_p3 = scmp.ne.s32.totalorder %s221_s10, %s11608_s14  ;;  %p11613_p4 = scmp.lt.s32.totalorder %s221_s10, %s221_s10 }
 0x1dc   :  { %p11614_p5 = scmp.lt.s32.totalorder %s11612_s16, %s11608_s14 }
 0x1de   :  { %p11615_p6 = por %p11614_p5, %p11613_p4 }
 0x1e0   :  { %p11616_p7 = pnand %p11615_p6, %p11609_p3 }
 0x1e2   :  { %11619 = shalt.err (!%p11616_p7)
}
 0x1e3   :  { %s13242_s23 = sld [smem:[#allocation83_spill]]  ;;  %s12013_s26 = smov [#allocation18]  }
 0x1e4   :  { %223 = dma.hbm_to_vmem [thread:$0]  %s13241_s20, 16, %s221_s10, [#allocation14]  }
 0x1e5   :  { %s241_s9 = sshll.u32 %s12013_s26, 4  ;;  %s12014_s28 = smov [#allocation21]   ;;  %s242_s9 = int_to_ptr.vmem [resolvable:$true] %s241_s9 }
 0x1e6   :  { %s273_s6 = sshll.u32 %s12014_s28, 4  ;;  %s12442_s6 = int_to_ptr.vmem [resolvable:$true] %s273_s6 }
 0x1e9   :  { %s11620_s21 = scalar_lea.hbm %s13242_s23, 256 }
 0x1ea   :  { %p11621_p8 = scmp.ne.s32.totalorder %s13242_s23, %s11620_s21  ;;  %p11624_p9 = scmp.lt.u32.totalorder %s11620_s21, %s13242_s23 }
 0x1ec   :  { %p11626_p10 = pnand %p11624_p9, %p11621_p8 }
 0x1ee   :  { %11629 = shalt.err (!%p11626_p10)
}
 0x1ef   :  { %s11630_s30 = scalar_lea.vmem %s242_s9, 256  ;;  %p11635_p12 = scmp.lt.s32.totalorder %s242_s9, %s242_s9 }
 0x1f0   :  { %p11631_p11 = scmp.ne.s32.totalorder %s242_s9, %s11630_s30  ;;  %p11636_p13 = scmp.lt.s32.totalorder %s11630_s30, %s11630_s30 }
 0x1f2   :  { %p11637_p0 = por %p11636_p13, %p11635_p12 }
 0x1f4   :  { %p11638_p1 = pnand %p11637_p0, %p11631_p11 }
 0x1f6   :  { %11641 = shalt.err (!%p11638_p1)
}
 0x1f7   :  { %s13243_s25 = sld [smem:[#allocation88_spill]] }
 0x1f8   :  { %247 = dma.hbm_to_vmem [thread:$0]  %s13242_s23, 256, %s242_s9, [#allocation17], %s11989_s18, %s11989_s18, %s11990_s22  }
 0x1fd   :  { %s11642_s1 = scalar_lea.hbm %s13243_s25, 256 }
 0x1fe   :  { %p11643_p2 = scmp.ne.s32.totalorder %s13243_s25, %s11642_s1  ;;  %p11646_p3 = scmp.lt.u32.totalorder %s11642_s1, %s13243_s25 }
 0x200   :  { %p11648_p4 = pnand %p11646_p3, %p11643_p2 }
 0x202   :  { %11651 = shalt.err (!%p11648_p4)
}
 0x203   :  { %s11652_s24 = scalar_lea.vmem %s12442_s6, 256  ;;  %p11657_p6 = scmp.lt.s32.totalorder %s12442_s6, %s12442_s6 }
 0x204   :  { %p11653_p5 = scmp.ne.s32.totalorder %s12442_s6, %s11652_s24  ;;  %p11658_p7 = scmp.lt.s32.totalorder %s11652_s24, %s11652_s24 }
 0x206   :  { %p11659_p8 = por %p11658_p7, %p11657_p6 }
 0x208   :  { %p11660_p9 = pnand %p11659_p8, %p11653_p5 }
 0x20a   :  { %11663 = shalt.err (!%p11660_p9)
}
 0x20b   :  { %s13244_s5 = sld [smem:[#allocation89_spill]]  ;;  %s12015_s12 = smov [#allocation24]  }
 0x20c   :  { %279 = dma.hbm_to_vmem [thread:$0]  %s13243_s25, 256, %s12442_s6, [#allocation20], %s11989_s18, %s11989_s18, %s11990_s22  }
 0x20d   :  { %s296_s2 = sshll.u32 %s12015_s12, 4  ;;  %s12016_s0 = smov [#allocation27]   ;;  %s297_s2 = int_to_ptr.vmem [resolvable:$true] %s296_s2 }
 0x20e   :  { %s318_s19 = sshll.u32 %s12016_s0, 4  ;;  %s319_s19 = int_to_ptr.vmem [resolvable:$true] %s318_s19 }
 0x211   :  { %s11664_s7 = scalar_lea.hbm %s13244_s5, 64 }
 0x212   :  { %p11665_p10 = scmp.ne.s32.totalorder %s13244_s5, %s11664_s7  ;;  %p11668_p11 = scmp.lt.u32.totalorder %s11664_s7, %s13244_s5 }
 0x214   :  { %p11670_p12 = pnand %p11668_p11, %p11665_p10 }
 0x216   :  { %11673 = shalt.err (!%p11670_p12)
}
 0x217   :  { %s11674_s10 = scalar_lea.vmem %s297_s2, 64  ;;  %p11679_p0 = scmp.lt.s32.totalorder %s297_s2, %s297_s2 }
 0x218   :  { %p11675_p13 = scmp.ne.s32.totalorder %s297_s2, %s11674_s10  ;;  %p11680_p1 = scmp.lt.s32.totalorder %s11674_s10, %s11674_s10 }
 0x21a   :  { %p11681_p2 = por %p11680_p1, %p11679_p0 }
 0x21c   :  { %p11682_p3 = pnand %p11681_p2, %p11675_p13 }
 0x21e   :  { %11685 = shalt.err (!%p11682_p3)
}
 0x21f   :  { %s13245_s15 = sld [smem:[#allocation90_spill]] }
 0x220   :  { %299 = dma.hbm_to_vmem [thread:$0]  %s13244_s5, 64, %s297_s2, [#allocation23]  }
 0x225   :  { %s11686_s27 = scalar_lea.hbm %s13245_s15, 16 }
 0x226   :  { %p11687_p4 = scmp.ne.s32.totalorder %s13245_s15, %s11686_s27  ;;  %p11690_p5 = scmp.lt.u32.totalorder %s11686_s27, %s13245_s15 }
 0x228   :  { %p11692_p6 = pnand %p11690_p5, %p11687_p4 }
 0x22a   :  { %11695 = shalt.err (!%p11692_p6)
}
 0x22b   :  { %s11696_s4 = scalar_lea.vmem %s319_s19, 16  ;;  %s11700_s20 = scalar_lea.vmem %s319_s19, 32 }
 0x22c   :  { %p11697_p7 = scmp.ne.s32.totalorder %s319_s19, %s11696_s4  ;;  %p11701_p8 = scmp.lt.s32.totalorder %s319_s19, %s319_s19 }
 0x22d   :  { %p11702_p9 = scmp.lt.s32.totalorder %s11700_s20, %s11696_s4 }
 0x22f   :  { %p11703_p10 = por %p11702_p9, %p11701_p8 }
 0x231   :  { %p11704_p11 = pnand %p11703_p10, %p11697_p7 }
 0x233   :  { %11707 = shalt.err (!%p11704_p11)
}
 0x234   :  { %s13246_s3 = sld [smem:[#allocation91_spill]]  ;;  %s12017_s14 = smov [#allocation30]  }
 0x235   :  { %321 = dma.hbm_to_vmem [thread:$0]  %s13245_s15, 16, %s319_s19, [#allocation26]  }
 0x236   :  { %s337_s16 = sshll.u32 %s12017_s14, 4  ;;  %s12018_s23 = smov [#allocation33]   ;;  %s338_s16 = int_to_ptr.vmem [resolvable:$true] %s337_s16 }
 0x237   :  { %s362_s26 = sshll.u32 %s12018_s23, 4  ;;  %s363_s26 = int_to_ptr.vmem [resolvable:$true] %s362_s26 }
 0x23a   :  { %s11708_s9 = scalar_lea.hbm %s13246_s3, 3072 }
 0x23b   :  { %p11709_p12 = scmp.ne.s32.totalorder %s13246_s3, %s11708_s9  ;;  %p11712_p13 = scmp.lt.u32.totalorder %s11708_s9, %s13246_s3 }
 0x23d   :  { %p11714_p0 = pnand %p11712_p13, %p11709_p12 }
 0x23f   :  { %11717 = shalt.err (!%p11714_p0)
}
 0x240   :  { %s11718_s28 = scalar_lea.vmem %s338_s16, 3072  ;;  %p11723_p2 = scmp.lt.s32.totalorder %s338_s16, %s338_s16 }
 0x241   :  { %p11719_p1 = scmp.ne.s32.totalorder %s338_s16, %s11718_s28  ;;  %p11724_p3 = scmp.lt.s32.totalorder %s11718_s28, %s11718_s28 }
 0x243   :  { %p11725_p4 = por %p11724_p3, %p11723_p2 }
 0x245   :  { %p11726_p5 = pnand %p11725_p4, %p11719_p1 }
 0x247   :  { %11729 = shalt.err (!%p11726_p5)
}
 0x248   :  { %s13247_s6 = sld [smem:[#allocation92_spill]] }
 0x249   :  { %343 = dma.hbm_to_vmem [thread:$0]  %s13246_s3, 3072, %s338_s16, [#allocation29], %s11989_s18, %s11989_s18, %s11990_s22  }
 0x24e   :  { %s11730_s21 = scalar_lea.hbm %s13247_s6, 16 }
 0x24f   :  { %p11731_p6 = scmp.ne.s32.totalorder %s13247_s6, %s11730_s21  ;;  %p11734_p7 = scmp.lt.u32.totalorder %s11730_s21, %s13247_s6 }
 0x251   :  { %p11736_p8 = pnand %p11734_p7, %p11731_p6 }
 0x253   :  { %11739 = shalt.err (!%p11736_p8)
}
 0x254   :  { %s11740_s30 = scalar_lea.vmem %s363_s26, 16  ;;  %s11744_s25 = scalar_lea.vmem %s363_s26, 32 }
 0x255   :  { %p11741_p9 = scmp.ne.s32.totalorder %s363_s26, %s11740_s30  ;;  %p11745_p10 = scmp.lt.s32.totalorder %s363_s26, %s363_s26 }
 0x256   :  { %p11746_p11 = scmp.lt.s32.totalorder %s11744_s25, %s11740_s30 }
 0x258   :  { %p11747_p12 = por %p11746_p11, %p11745_p10 }
 0x25a   :  { %p11748_p13 = pnand %p11747_p12, %p11741_p9 }
 0x25c   :  { %11751 = shalt.err (!%p11748_p13)
}
 0x25d   :  { %s13248_s1 = sld [smem:[#allocation93_spill]]  ;;  %s12019_s24 = smov [#allocation36]  }
 0x25e   :  { %365 = dma.hbm_to_vmem [thread:$0]  %s13247_s6, 16, %s363_s26, [#allocation32]  }
 0x25f   :  { %s381_s5 = sshll.u32 %s12019_s24, 4  ;;  %s12020_s12 = smov [#allocation39]   ;;  %s382_s5 = int_to_ptr.vmem [resolvable:$true] %s381_s5 }
 0x260   :  { %s406_s2 = sshll.u32 %s12020_s12, 4  ;;  %s407_s2 = int_to_ptr.vmem [resolvable:$true] %s406_s2 }
 0x263   :  { %s11752_s0 = scalar_lea.hbm %s13248_s1, 3072 }
 0x264   :  { %p11753_p0 = scmp.ne.s32.totalorder %s13248_s1, %s11752_s0  ;;  %p11756_p1 = scmp.lt.u32.totalorder %s11752_s0, %s13248_s1 }
 0x266   :  { %p11758_p2 = pnand %p11756_p1, %p11753_p0 }
 0x268   :  { %11761 = shalt.err (!%p11758_p2)
}
 0x269   :  { %s11762_s19 = scalar_lea.vmem %s382_s5, 3072  ;;  %p11767_p4 = scmp.lt.s32.totalorder %s382_s5, %s382_s5 }
 0x26a   :  { %p11763_p3 = scmp.ne.s32.totalorder %s382_s5, %s11762_s19  ;;  %p11768_p5 = scmp.lt.s32.totalorder %s11762_s19, %s11762_s19 }
 0x26c   :  { %p11769_p6 = por %p11768_p5, %p11767_p4 }
 0x26e   :  { %p11770_p7 = pnand %p11769_p6, %p11763_p3 }
 0x270   :  { %11773 = shalt.err (!%p11770_p7)
}
 0x271   :  { %s13249_s7 = sld [smem:[#allocation94_spill]] }
 0x272   :  { %387 = dma.hbm_to_vmem [thread:$0]  %s13248_s1, 3072, %s382_s5, [#allocation35], %s11989_s18, %s11989_s18, %s11990_s22  }
 0x277   :  { %s11774_s10 = scalar_lea.hbm %s13249_s7, 16 }
 0x278   :  { %p11775_p8 = scmp.ne.s32.totalorder %s13249_s7, %s11774_s10  ;;  %p11778_p9 = scmp.lt.u32.totalorder %s11774_s10, %s13249_s7 }
 0x27a   :  { %p11780_p10 = pnand %p11778_p9, %p11775_p8 }
 0x27c   :  { %11783 = shalt.err (!%p11780_p10)
}
 0x27d   :  { %s11784_s15 = scalar_lea.vmem %s407_s2, 16  ;;  %s11788_s27 = scalar_lea.vmem %s407_s2, 32 }
 0x27e   :  { %p11785_p11 = scmp.ne.s32.totalorder %s407_s2, %s11784_s15  ;;  %p11789_p12 = scmp.lt.s32.totalorder %s407_s2, %s407_s2 }
 0x27f   :  { %p11790_p13 = scmp.lt.s32.totalorder %s11788_s27, %s11784_s15 }
 0x281   :  { %p11791_p0 = por %p11790_p13, %p11789_p12 }
 0x283   :  { %p11792_p1 = pnand %p11791_p0, %p11785_p11 }
 0x285   :  { %11795 = shalt.err (!%p11792_p1)
}
 0x286   :  { %s13250_s4 = sld [smem:[#allocation96_spill]]  ;;  %s12021_s20 = smov [#allocation42]  }
 0x287   :  { %409 = dma.hbm_to_vmem [thread:$0]  %s13249_s7, 16, %s407_s2, [#allocation38]  }
 0x288   :  { %s427_s3 = sshll.u32 %s12021_s20, 4  ;;  %s12022_s14 = smov [#allocation45]   ;;  %s428_s3 = int_to_ptr.vmem [resolvable:$true] %s427_s3 }
 0x289   :  { %s450_s16 = sshll.u32 %s12022_s14, 4  ;;  %s451_s16 = int_to_ptr.vmem [resolvable:$true] %s450_s16 }
 0x28c   :  { %s11796_s23 = scalar_lea.hbm %s13250_s4, 3072 }
 0x28d   :  { %p11797_p2 = scmp.ne.s32.totalorder %s13250_s4, %s11796_s23  ;;  %p11800_p3 = scmp.lt.u32.totalorder %s11796_s23, %s13250_s4 }
 0x28f   :  { %p11802_p4 = pnand %p11800_p3, %p11797_p2 }
 0x291   :  { %11805 = shalt.err (!%p11802_p4)
}
 0x292   :  { %s11806_s26 = scalar_lea.vmem %s428_s3, 3072  ;;  %p11811_p6 = scmp.lt.s32.totalorder %s428_s3, %s428_s3 }
 0x293   :  { %p11807_p5 = scmp.ne.s32.totalorder %s428_s3, %s11806_s26  ;;  %p11812_p7 = scmp.lt.s32.totalorder %s11806_s26, %s11806_s26 }
 0x295   :  { %p11813_p8 = por %p11812_p7, %p11811_p6 }
 0x297   :  { %p11814_p9 = pnand %p11813_p8, %p11807_p5 }
 0x299   :  { %11817 = shalt.err (!%p11814_p9)
}
 0x29a   :  { %s13251_s9 = sld [smem:[#allocation97_spill]] }
 0x29b   :  { %433 = dma.hbm_to_vmem [thread:$0]  %s13250_s4, 3072, %s428_s3, [#allocation41], %s11989_s18, %s11989_s18, %s11990_s22  }
 0x2a0   :  { %s11818_s28 = scalar_lea.hbm %s13251_s9, 16 }
 0x2a1   :  { %p11819_p10 = scmp.ne.s32.totalorder %s13251_s9, %s11818_s28  ;;  %p11822_p11 = scmp.lt.u32.totalorder %s11818_s28, %s13251_s9 }
 0x2a3   :  { %p11824_p12 = pnand %p11822_p11, %p11819_p10 }
 0x2a5   :  { %11827 = shalt.err (!%p11824_p12)
}
 0x2a6   :  { %s11828_s6 = scalar_lea.vmem %s451_s16, 16  ;;  %s11832_s21 = scalar_lea.vmem %s451_s16, 32 }
 0x2a7   :  { %p11829_p13 = scmp.ne.s32.totalorder %s451_s16, %s11828_s6  ;;  %p11833_p0 = scmp.lt.s32.totalorder %s451_s16, %s451_s16 }
 0x2a8   :  { %p11834_p1 = scmp.lt.s32.totalorder %s11832_s21, %s11828_s6 }
 0x2aa   :  { %p11835_p2 = por %p11834_p1, %p11833_p0 }
 0x2ac   :  { %p11836_p3 = pnand %p11835_p2, %p11829_p13 }
 0x2ae   :  { %11839 = shalt.err (!%p11836_p3)
}
 0x2af   :  { %s13252_s30 = sld [smem:[#allocation99_spill]]  ;;  %s12023_s25 = smov [#allocation48]  }
 0x2b0   :  { %453 = dma.hbm_to_vmem [thread:$0]  %s13251_s9, 16, %s451_s16, [#allocation44]  }
 0x2b1   :  { %s471_s1 = sshll.u32 %s12023_s25, 4  ;;  %s12024_s24 = smov [#allocation51]   ;;  %s472_s1 = int_to_ptr.vmem [resolvable:$true] %s471_s1 }
 0x2b2   :  { %s493_s5 = sshll.u32 %s12024_s24, 4  ;;  %s12504_s5 = int_to_ptr.vmem [resolvable:$true] %s493_s5 }
 0x2b5   :  { %s11840_s12 = scalar_lea.hbm %s13252_s30, 3072 }
 0x2b6   :  { %p11841_p4 = scmp.ne.s32.totalorder %s13252_s30, %s11840_s12  ;;  %p11844_p5 = scmp.lt.u32.totalorder %s11840_s12, %s13252_s30 }
 0x2b8   :  { %p11846_p6 = pnand %p11844_p5, %p11841_p4 }
 0x2ba   :  { %11849 = shalt.err (!%p11846_p6)
}
 0x2bb   :  { %s11850_s2 = scalar_lea.vmem %s472_s1, 3072  ;;  %p11855_p8 = scmp.lt.s32.totalorder %s472_s1, %s472_s1 }
 0x2bc   :  { %p11851_p7 = scmp.ne.s32.totalorder %s472_s1, %s11850_s2  ;;  %p11856_p9 = scmp.lt.s32.totalorder %s11850_s2, %s11850_s2 }
 0x2be   :  { %p11857_p10 = por %p11856_p9, %p11855_p8 }
 0x2c0   :  { %p11858_p11 = pnand %p11857_p10, %p11851_p7 }
 0x2c2   :  { %11861 = shalt.err (!%p11858_p11)
}
 0x2c3   :  { %477 = dma.hbm_to_vmem [thread:$0]  %s13252_s30, 3072, %s472_s1, [#allocation47], %s11989_s18, %s11989_s18, %s11990_s22  }
 0x2c4   :  { %s11862_s0 = scalar_lea.hbm %s12247_s29, 4096 }
 0x2c5   :  { %p11863_p12 = scmp.ne.s32.totalorder %s12247_s29, %s11862_s0  ;;  %p11866_p13 = scmp.lt.u32.totalorder %s11862_s0, %s12247_s29 }
 0x2c7   :  { %p11868_p0 = pnand %p11866_p13, %p11863_p12 }
 0x2c9   :  { %11871 = shalt.err (!%p11868_p0)
}
 0x2ca   :  { %s11872_s19 = scalar_lea.vmem %s12504_s5, 4096  ;;  %p11877_p2 = scmp.lt.s32.totalorder %s12504_s5, %s12504_s5 }
 0x2cb   :  { %p11873_p1 = scmp.ne.s32.totalorder %s12504_s5, %s11872_s19  ;;  %p11878_p3 = scmp.lt.s32.totalorder %s11872_s19, %s11872_s19 }
 0x2cd   :  { %p11879_p4 = por %p11878_p3, %p11877_p2 }
 0x2cf   :  { %p11880_p5 = pnand %p11879_p4, %p11873_p1 }
 0x2d1   :  { %11883 = shalt.err (!%p11880_p5)
}
 0x2d2   :  { %499 = dma.hbm_to_vmem [thread:$0]  %s12247_s29, 4096, %s12504_s5, [#allocation50], %s11997_s11, %s11997_s11, %s11998_s13  }
 0x2d3   :  { %s12025_s18 = smov [#allocation54]   ;;  %s11884_s7 = scalar_lea.hbm %s12257_s8, 4096 }
 0x2d4   :  { %s515_s22 = sshll.u32 %s12025_s18, 4  ;;  %p11885_p6 = scmp.ne.s32.totalorder %s12257_s8, %s11884_s7  ;;  %s516_s22 = int_to_ptr.vmem [resolvable:$true] %s515_s22 }
 0x2d5   :  { %p11888_p7 = scmp.lt.u32.totalorder %s11884_s7, %s12257_s8 }
 0x2d7   :  { %p11890_p8 = pnand %p11888_p7, %p11885_p6 }
 0x2d9   :  { %11893 = shalt.err (!%p11890_p8)
}
 0x2da   :  { %s11894_s10 = scalar_lea.vmem %s516_s22, 4096  ;;  %p11899_p10 = scmp.lt.s32.totalorder %s516_s22, %s516_s22 }
 0x2db   :  { %p11895_p9 = scmp.ne.s32.totalorder %s516_s22, %s11894_s10  ;;  %p11900_p11 = scmp.lt.s32.totalorder %s11894_s10, %s11894_s10 }
 0x2dd   :  { %p11901_p12 = por %p11900_p11, %p11899_p10 }
 0x2df   :  { %p11902_p13 = pnand %p11901_p12, %p11895_p9 }
 0x2e1   :  { %11905 = shalt.err (!%p11902_p13)
}
 0x2e2   :  { %521 = dma.hbm_to_vmem [thread:$0]  %s12257_s8, 4096, %s516_s22, [#allocation53], %s11997_s11, %s11997_s11, %s11998_s13  }
 0x2e3   :  { %11906 = dma.done.wait [#allocation3], 1024  }
 0x2e4   :  { %11907 = vsyncadd [#allocation3], 4294966272 }
 0x2e5   :  { %11908 = dma.done.wait [#allocation5], 4096  }
 0x2e6   :  { %11909 = vsyncadd [#allocation5], 4294963200 }
 0x2e7   :  { %11910 = dma.done.wait [#allocation8], 3088  }
 0x2e8   :  { %11911 = vsyncadd [#allocation8], 4294964208 }
 0x2e9   :  { %11912 = dma.done.wait [#allocation11], 32  }
 0x2ea   :  { %11913 = vsyncadd [#allocation11], 4294967264 }
 0x2eb   :  { %11914 = dma.done.wait [#allocation14], 4112  }
 0x2ec   :  { %11915 = vsyncadd [#allocation14], 4294963184 }
 0x2ed   :  { %11916 = dma.done.wait [#allocation17], 1280  }
 0x2ee   :  { %11917 = vsyncadd [#allocation17], 4294966016 }
 0x2ef   :  { %11918 = dma.done.wait [#allocation20], 512  }
 0x2f0   :  { %11919 = vsyncadd [#allocation20], 4294966784 }
 0x2f1   :  { %11920 = dma.done.wait [#allocation23], 128  }
 0x2f2   :  { %11921 = vsyncadd [#allocation23], 4294967168 }
 0x2f3   :  { %11922 = dma.done.wait [#allocation26], 4112  }
 0x2f4   :  { %11923 = vsyncadd [#allocation26], 4294963184 }
 0x2f5   :  { %11924 = dma.done.wait [#allocation29], 3088  }
 0x2f6   :  { %11925 = vsyncadd [#allocation29], 4294964208 }
 0x2f7   :  { %11926 = dma.done.wait [#allocation32], 3088  }
 0x2f8   :  { %11927 = vsyncadd [#allocation32], 4294964208 }
 0x2f9   :  { %11928 = dma.done.wait [#allocation35], 3088  }
 0x2fa   :  { %11929 = vsyncadd [#allocation35], 4294964208 }
 0x2fb   :  { %11930 = dma.done.wait [#allocation38], 3088  }
 0x2fc   :  { %11931 = vsyncadd [#allocation38], 4294964208 }
 0x2fd   :  { %11932 = dma.done.wait [#allocation41], 3088  }
 0x2fe   :  { %11933 = vsyncadd [#allocation41], 4294964208 }
 0x2ff   :  { %11934 = dma.done.wait [#allocation44], 32  }
 0x300   :  { %11935 = vsyncadd [#allocation44], 4294967264 }
 0x301   :  { %11936 = dma.done.wait [#allocation47], 9216  }
 0x302   :  { %11937 = vsyncadd [#allocation47], 4294958080 }
 0x303   :  { %11938 = dma.done.wait [#allocation50], 4160  }
 0x304   :  { %11939 = vsyncadd [#allocation50], 4294963136 }
 0x305   :  { %11940 = dma.done.wait [#allocation53], 4160  }
 0x306   :  { %11941 = vsyncadd [#allocation53], 4294963136  ;;  %s13253_s29 = sld [smem:[#allocation73_spill]]  ;;  %v10550_v6 = vld [vmem:[#allocation21] sm:$0xff]   ;;  %vm648_vm0 = vcmask 261120   ;;  %v10551_v8 = vld [vmem:[#allocation21 + $0x8] sm:$0xff]  }
 0x307   :  { %v10552_v7 = vld [vmem:[#allocation18] sm:$0xff]   ;;  %v10553_v9 = vld [vmem:[#allocation18 + $0x8] sm:$0xff]   ;;  %9867 = vmatprep.mubr.msk.bf16.mxu0 %vm648_vm0, %v10550_v6  ;;  %v10563_v19 = vld [vmem:[#allocation30 + $0x58] sm:$0xff]   ;;  %vm12027_vm1 = vmmov 0   ;;  %s13254_s8 = sld [smem:[#allocation80_spill]]  ;;  %s13255_s11 = sld [smem:[#allocation84_spill]] }
 0x308   :  { %9875 = vmatprep.mubr.msk.bf16.mxu1 %vm648_vm0, %v10552_v7  ;;  %v10554_v10 = vld [vmem:[#allocation30 + $0x40] sm:$0xff]   ;;  %v10557_v13 = vld [vmem:[#allocation30 + $0x48] sm:$0xff]   ;;  %v10560_v16 = vld [vmem:[#allocation30 + $0x50] sm:$0xff]   ;;  %vm2017_vm2 = vcmask 1043456   ;;  %vm2013_vm3 = vcmask 64512   ;;  %s13256_s13 = sld [smem:[#allocation87_spill]] }
 0x309   :  { %v10555_v11 = vld [vmem:[#allocation30] sm:$0xff]   ;;  %v10559_v14 = vld [vmem:[#allocation30 + $0x88] sm:$0xff]   ;;  %v10562_v17 = vld [vmem:[#allocation30 + $0x90] sm:$0xff]   ;;  %s13257_s15 = sld [smem:[#allocation77_spill]]  ;;  %s13259_s4 = sld [smem:[#allocation74_spill]]  ;;  %vm5185_vm4 = vcmask 1040384  }
 0x30a   :  { %v10556_v12 = vld [vmem:[#allocation30 + $0x80] sm:$0xff]   ;;  %v10558_v15 = vld [vmem:[#allocation30 + $0x8] sm:$0xff]   ;;  %v10561_v18 = vld [vmem:[#allocation30 + $0x10] sm:$0xff]   ;;  %s13258_s27 = sld [smem:[#allocation85_spill]]  ;;  %s13260_s20 = sld [smem:[#allocation75_spill]]  ;;  %vm5181_vm5 = vcmask 15360  }
 0x30b   :  { %v10565_v20 = vld [vmem:[#allocation30 + $0x98] sm:$0xff]   ;;  %v10566_v22 = vld [vmem:[#allocation30 + $0x60] sm:$0xff]   ;;  %v10569_v25 = vld [vmem:[#allocation30 + $0x68] sm:$0xff]   ;;  %s13261_s3 = sld [smem:[#allocation86_spill]]  ;;  %s13262_s14 = sld [smem:[#allocation95_spill]] }
 0x30c   :  { %v628_v0 = vld [vmem:[%s13253_s29] sm:$0xff]  ;;  %v629_v1 = vld [vmem:[%s13253_s29 + $0x8] sm:$0xff]  ;;  %v630_v2 = vld [vmem:[%s13253_s29 + $0x10] sm:$0xff] }
 0x30d   :  { %v12535_v3 = vpack.c.bf16 %v629_v1, %v628_v0  ;;  %v631_v4 = vld [vmem:[%s13253_s29 + $0x18] sm:$0xff]  ;;  %v10568_v23 = vld [vmem:[#allocation30 + $0xa0] sm:$0xff]   ;;  %v10571_v26 = vld [vmem:[#allocation30 + $0xa8] sm:$0xff]  }
 0x30e   :  { %v12538_v5 = vpack.c.bf16 %v631_v4, %v630_v2  ;;  %v10564_v21 = vld [vmem:[#allocation30 + $0x18] sm:$0xff]   ;;  %v10567_v24 = vld [vmem:[#allocation30 + $0x20] sm:$0xff]   ;;  %v10570_v27 = vld [vmem:[#allocation30 + $0x28] sm:$0xff]  }
 0x30f   :  { %9863 = vmatprep.subr.bf16.mxu0 %v12535_v3  ;;  %9871 = vmatprep.subr.bf16.mxu1 %v12535_v3  ;;  %v10572_v28 = vld [vmem:[#allocation30 + $0x70] sm:$0xff]   ;;  %v10575_v31 = vld [vmem:[#allocation30 + $0x78] sm:$0xff]   ;;  %v11082_v46 = vld [vmem:[#allocation21] sm:$0xff]  }
 0x310   :  { %9864 = vmatpush3.bf16.msra.mxu0 %v12535_v3  ;;  %9872 = vmatpush3.bf16.msra.mxu1 %v12535_v3  ;;  %v10573_v29 = vld [vmem:[#allocation30 + $0x30] sm:$0xff]   ;;  %v10576_v32 = vld [vmem:[#allocation30 + $0x38] sm:$0xff]   ;;  %v10583_v47 = vld [vmem:[#allocation31 + $0x80] sm:$0xff]  }
 0x311   :  { %9865 = vmatprep.subr.bf16.mxu0 %v12538_v5  ;;  %9873 = vmatprep.subr.bf16.mxu1 %v12538_v5  ;;  %v10574_v30 = vld [vmem:[#allocation30 + $0xb0] sm:$0xff]   ;;  %v10577_v33 = vld [vmem:[#allocation30 + $0xb8] sm:$0xff]   ;;  %v10586_v48 = vld [vmem:[#allocation31 + $0x88] sm:$0xff]  }
 0x312   :  { %v10589_v49 = vld [vmem:[#allocation31 + $0x90] sm:$0xff]   ;;  %v10592_v50 = vld [vmem:[#allocation31 + $0x98] sm:$0xff]   ;;  %v10595_v51 = vld [vmem:[#allocation31 + $0xa0] sm:$0xff]  }
 0x313   :  { %v8604_v55 = vld [vmem:[#allocation27] ss:$0 sm:$0xff] }
 0x314   :  { %9866 = vmatpush3.bf16.msra.mxu0 %v12538_v5  ;;  %9874 = vmatpush3.bf16.msra.mxu1 %v12538_v5 }
 0x315   :  { %9193 = vmatprep.subr.bf16.mxu0 %v10554_v10  ;;  %9879 = vmatprep.subr.bf16.mxu1 %v10556_v12 }
 0x317   :  { %9868 = vmatmul.mubr.msk.bf16.vlgmr.msra.gmra.mrb[0].mxu0 %vm648_vm0, %v10551_v8  ;;  %9876 = vmatmul.mubr.msk.bf16.vlgmr.msra.gmra.mrb[0].mxu1 %vm648_vm0, %v10553_v9 }
 0x318   :  { %9194 = vmatpush3.bf16.msra.mxu0 %v10555_v11  ;;  %9880 = vmatpush3.bf16.msra.mxu1 %v10556_v12 }
 0x319   :  { %9195 = vmatprep.subr.bf16.mxu0 %v10557_v13  ;;  %9881 = vmatprep.subr.bf16.mxu1 %v10559_v14 }
 0x31c   :  { %9196 = vmatpush3.bf16.msra.mxu0 %v10558_v15  ;;  %9882 = vmatpush3.bf16.msra.mxu1 %v10559_v14 }
 0x31d   :  { %9197 = vmatprep.subr.bf16.mxu0 %v10560_v16  ;;  %9883 = vmatprep.subr.bf16.mxu1 %v10562_v17 }
 0x320   :  { %9198 = vmatpush3.bf16.msra.mxu0 %v10561_v18  ;;  %9884 = vmatpush3.bf16.msra.mxu1 %v10562_v17 }
 0x321   :  { %9199 = vmatprep.subr.bf16.mxu0 %v10563_v19  ;;  %9885 = vmatprep.subr.bf16.mxu1 %v10565_v20  ;;  %v11083_v19 = vld [vmem:[#allocation21 + $0x8] sm:$0xff]  }
 0x324   :  { %9200 = vmatpush3.bf16.msra.mxu0 %v10564_v21  ;;  %9886 = vmatpush3.bf16.msra.mxu1 %v10565_v20  ;;  %v11084_v20 = vld [vmem:[#allocation18] sm:$0xff]  }
 0x325   :  { %9201 = vmatprep.subr.bf16.mxu0 %v10566_v22  ;;  %9887 = vmatprep.subr.bf16.mxu1 %v10568_v23  ;;  %v10578_v21 = vld [vmem:[#allocation31 + $0x40] sm:$0xff]  }
 0x326   :  { %v10579_v22 = vld [vmem:[#allocation31] sm:$0xff]  }
 0x328   :  { %9202 = vmatpush3.bf16.msra.mxu0 %v10567_v24  ;;  %9888 = vmatpush3.bf16.msra.mxu1 %v10568_v23  ;;  %v10580_v23 = vld [vmem:[#allocation31 + $0x48] sm:$0xff]  }
 0x329   :  { %9203 = vmatprep.subr.bf16.mxu0 %v10569_v25  ;;  %9889 = vmatprep.subr.bf16.mxu1 %v10571_v26  ;;  %v11085_v24 = vld [vmem:[#allocation18 + $0x8] sm:$0xff]  }
 0x32a   :  { %v10581_v25 = vld [vmem:[#allocation31 + $0x8] sm:$0xff]  }
 0x32c   :  { %9204 = vmatpush3.bf16.msra.mxu0 %v10570_v27  ;;  %9890 = vmatpush3.bf16.msra.mxu1 %v10571_v26  ;;  %v10582_v26 = vld [vmem:[#allocation31 + $0x50] sm:$0xff]  }
 0x32d   :  { %9205 = vmatprep.subr.bf16.mxu0 %v10572_v28  ;;  %9891 = vmatprep.subr.bf16.mxu1 %v10574_v30  ;;  %v10584_v27 = vld [vmem:[#allocation31 + $0x10] sm:$0xff]   ;;  %v10585_v28 = vld [vmem:[#allocation31 + $0x58] sm:$0xff]  }
 0x330   :  { %9206 = vmatpush3.bf16.msra.mxu0 %v10573_v29  ;;  %9892 = vmatpush3.bf16.msra.mxu1 %v10574_v30  ;;  %v10587_v29 = vld [vmem:[#allocation31 + $0x18] sm:$0xff]   ;;  %v10588_v30 = vld [vmem:[#allocation31 + $0x60] sm:$0xff]  }
 0x331   :  { %9207 = vmatprep.subr.bf16.mxu0 %v10575_v31  ;;  %9893 = vmatprep.subr.bf16.mxu1 %v10577_v33  ;;  %v10590_v31 = vld [vmem:[#allocation31 + $0x20] sm:$0xff]  }
 0x334   :  { %9208 = vmatpush3.bf16.msra.mxu0 %v10576_v32  ;;  %9894 = vmatpush3.bf16.msra.mxu1 %v10577_v33  ;;  %v10591_v32 = vld [vmem:[#allocation31 + $0x68] sm:$0xff]  }
 0x335   :  { %9915 = vmatprep.subr.bf16.mxu0 %v10583_v47  ;;  %v10593_v33 = vld [vmem:[#allocation31 + $0x28] sm:$0xff]  }
 0x3ea   :  { %v9869_v34 = vpop.f32.mrb[0].mxu0  ;;  %v9877_v35 = vpop.f32.mrb[0].mxu1 }
 0x3eb   :  { %v689_v36 = vpop.f32.mrb[1].mxu0  ;;  %v760_v37 = vpop.f32.mrb[1].mxu1 }
 0x3ec   :  { %v9870_v38 = vpop.f32.mrb[2].mxu0  ;;  %v9878_v39 = vpop.f32.mrb[2].mxu1 }
 0x3ed   :  { %v705_v40 = vpack.c.bf16 %v9870_v38, %v9869_v34  ;;  %v692_v41 = vpop.f32.mrb[3].mxu0  ;;  %v776_v42 = vpack.c.bf16 %v9878_v39, %v9877_v35  ;;  %v763_v43 = vpop.f32.mrb[3].mxu1  ;;  %v10594_v34 = vld [vmem:[#allocation31 + $0x70] sm:$0xff]   ;;  %v10599_v38 = vld [vmem:[#allocation31 + $0x38] sm:$0xff]  }
 0x3ee   :  { %v704_v44 = vpack.c.bf16 %v692_v41, %v689_v36  ;;  %v775_v45 = vpack.c.bf16 %v763_v43, %v760_v37  ;;  %v10596_v35 = vld [vmem:[#allocation31 + $0x30] sm:$0xff]   ;;  %v10597_v36 = vld [vmem:[#allocation31 + $0x78] sm:$0xff]   ;;  %v10598_v37 = vld [vmem:[#allocation31 + $0xa8] sm:$0xff]  }
 0x3ef   :  { %v10600_v39 = vld [vmem:[#allocation31 + $0xb0] sm:$0xff]  }
 0x3f0   :  { %1008 = vmatprep.mubr.bf16.mxu0 %v704_v44  ;;  %9895 = vmatprep.mubr.bf16.mxu1 %v775_v45 }
 0x3f1   :  { %1009 = vmatmul.mubr.bf16.vlgmr.msra.gmra.mrb[4].mxu0 %v12535_v3  ;;  %9896 = vmatmul.mubr.bf16.vlgmr.msra.gmra.mrb[4].mxu1 %v776_v42 }
 0x3f2   :  { %1016 = vmatprep.mubr.bf16.mxu0 %v705_v40  ;;  %9903 = vmatprep.mubr.msk.bf16.mxu1 %vm648_vm0, %v11082_v46  ;;  %v10601_v40 = vld [vmem:[#allocation31 + $0xb8] sm:$0xff]  }
 0x3f3   :  { %9916 = vmatpush3.bf16.msra.mxu0 %v10583_v47 }
 0x3f4   :  { %9917 = vmatprep.subr.bf16.mxu0 %v10586_v48 }
 0x3f7   :  { %9918 = vmatpush3.bf16.msra.mxu0 %v10586_v48 }
 0x3f8   :  { %9919 = vmatprep.subr.bf16.mxu0 %v10589_v49 }
 0x3f9   :  { %1017 = vmatmul.mubr.bf16.gmra.mrb[8].mxu0 %v12538_v5 }
 0x3fb   :  { %9920 = vmatpush3.bf16.msra.mxu0 %v10589_v49 }
 0x3fc   :  { %9921 = vmatprep.subr.bf16.mxu0 %v10592_v50 }
 0x3ff   :  { %9922 = vmatpush3.bf16.msra.mxu0 %v10592_v50 }
 0x400   :  { %9923 = vmatprep.subr.bf16.mxu0 %v10595_v51 }
 0x403   :  { %9924 = vmatpush3.bf16.msra.mxu0 %v10595_v51 }
 0x404   :  { %9925 = vmatprep.subr.bf16.mxu0 %v10598_v37 }
 0x407   :  { %9926 = vmatpush3.bf16.msra.mxu0 %v10598_v37  ;;  %v10611_v37 = vld [vmem:[%s13254_s8 + $0x58] sm:$0xff]  }
 0x408   :  { %9927 = vmatprep.subr.bf16.mxu0 %v10600_v39 }
 0x40b   :  { %9928 = vmatpush3.bf16.msra.mxu0 %v10600_v39  ;;  %v10613_v39 = vld [vmem:[%s13254_s8 + $0x18] sm:$0xff]  }
 0x40c   :  { %9929 = vmatprep.subr.bf16.mxu0 %v10601_v40 }
 0x40f   :  { %9930 = vmatpush3.bf16.msra.mxu0 %v10601_v40  ;;  %v10620_v40 = vld [vmem:[%s13254_s8 + $0x98] sm:$0xff]  }
 0x4c4   :  { %v9209_v52 = vpop.f32.mrb[4].mxu0  ;;  %v9897_v53 = vpop.f32.mrb[4].mxu1 }
 0x4c5   :  { %v9210_v54 = vpop.f32.mrb[5].mxu0  ;;  %v1059_v56 = vpop.f32.mrb[5].mxu1 }
 0x4c6   :  { %v9211_v57 = vadd.f32 %v9210_v54, %v9209_v52  ;;  %v9212_v58 = vpop.f32.mrb[6].mxu0  ;;  %v9898_v59 = vpop.f32.mrb[6].mxu1 }
 0x4c7   :  { %v9213_v60 = vpop.f32.mrb[7].mxu0  ;;  %v1062_v61 = vpop.f32.mrb[7].mxu1 }
 0x4c8   :  { %v1011_v62 = vadd.f32 %v9211_v57, %v8604_v55  ;;  %v9214_v63 = vadd.f32 %v9213_v60, %v9212_v58  ;;  %v8633_v60 = vld [vmem:[#allocation28] ss:$0 sm:$0xff] }
 0x4ca   :  { %v1060_v0 = vadd.f32 %v1059_v56, %v1011_v62  ;;  %v1014_v1 = vadd.f32 %v9214_v63, %v8604_v55 }
 0x4cc   :  { %v1063_v2 = vadd.f32 %v1062_v61, %v1014_v1  ;;  %v9215_v3 = vpop.f32.mrb[8].mxu0  ;;  %v1074_v5 = vmax.f32 %v1060_v0, 0.0 }
 0x4cd   :  { %v9216_v4 = vpop.f32.mrb[9].mxu0 }
 0x4ce   :  { %v1075_v6 = vmax.f32 %v1063_v2, 0.0  ;;  %v9217_v7 = vadd.f32 %v9216_v4, %v9215_v3  ;;  %v9218_v8 = vpop.f32.mrb[10].mxu0 }
 0x4cf   :  { %v9219_v9 = vpop.f32.mrb[11].mxu0 }
 0x4d0   :  { %v12555_v10 = vpack.c.bf16 %v1075_v6, %v1074_v5  ;;  %v1019_v11 = vadd.f32 %v9217_v7, %v8604_v55  ;;  %v9220_v12 = vadd.f32 %v9219_v9, %v9218_v8 }
 0x4d2   :  { %v1068_v13 = vadd.f32 %v9897_v53, %v1019_v11  ;;  %v1022_v14 = vadd.f32 %v9220_v12, %v8604_v55  ;;  %9899 = vmatprep.subr.bf16.mxu1 %v12555_v10  ;;  %v12026_v53 = vmov 0.0  }
 0x4d3   :  { %9900 = vmatpush3.bf16.msra.mxu1 %v12555_v10  ;;  %9935 = vmatprep.subr.bf16.mxu0 %v12026_v53 }
 0x4d4   :  { %v1071_v15 = vadd.f32 %v9898_v59, %v1022_v14  ;;  %v1076_v16 = vmax.f32 %v1068_v13, 0.0 }
 0x4d6   :  { %v1077_v17 = vmax.f32 %v1071_v15, 0.0 }
 0x4d8   :  { %v12559_v18 = vpack.c.bf16 %v1077_v17, %v1076_v16 }
 0x4da   :  { %9901 = vmatprep.subr.bf16.mxu1 %v12559_v18 }
 0x4db   :  { %9902 = vmatpush3.bf16.msra.mxu1 %v12559_v18 }
 0x4dc   :  { %9907 = vmatprep.subr.bf16.mxu1 %v12555_v10 }
 0x4de   :  { %9904 = vmatmul.mubr.msk.bf16.vlgmr.msra.gmra.mrb[8].mxu1 %vm648_vm0, %v11083_v19 }
 0x4df   :  { %9908 = vmatpush3.bf16.msra.mxu1 %v12555_v10  ;;  %9911 = vmatprep.mubr.msk.bf16.mxu1 %vm648_vm0, %v11084_v20 }
 0x4e0   :  { %9909 = vmatprep.subr.bf16.mxu1 %v12559_v18 }
 0x4e3   :  { %9910 = vmatpush3.bf16.msra.mxu1 %v12559_v18 }
 0x4e4   :  { %9239 = vmatprep.subr.bf16.mxu1 %v10578_v21  ;;  %v1531_v21 = vld [vmem:[#allocation19 + $0x4] sm:$0xf] }
 0x4e6   :  { %9912 = vmatmul.mubr.msk.bf16.vlgmr.msra.gmra.mrb[12].mxu1 %vm648_vm0, %v11085_v24  ;;  %v10606_v24 = vld [vmem:[%s13254_s8 + $0xc0] sm:$0xff]  }
 0x4e7   :  { %9240 = vmatpush3.bf16.msra.mxu1 %v10579_v22  ;;  %v1485_v22 = vld [vmem:[#allocation19] sm:$0xf] }
 0x4e8   :  { %9241 = vmatprep.subr.bf16.mxu1 %v10580_v23  ;;  %v10602_v23 = vld [vmem:[%s13254_s8 + $0x40] sm:$0xff]  }
 0x4eb   :  { %9242 = vmatpush3.bf16.msra.mxu1 %v10581_v25  ;;  %v1623_v25 = vld [vmem:[#allocation19 + $0xc] sm:$0xf] }
 0x4ec   :  { %9243 = vmatprep.subr.bf16.mxu1 %v10582_v26  ;;  %v1577_v26 = vld [vmem:[#allocation19 + $0x8] sm:$0xf] }
 0x4ef   :  { %9244 = vmatpush3.bf16.msra.mxu1 %v10584_v27  ;;  %v10603_v27 = vld [vmem:[%s13254_s8] sm:$0xff]  }
 0x4f0   :  { %9245 = vmatprep.subr.bf16.mxu1 %v10585_v28  ;;  %v10608_v28 = vld [vmem:[%s13254_s8 + $0x80] sm:$0xff]  }
 0x4f3   :  { %9246 = vmatpush3.bf16.msra.mxu1 %v10587_v29  ;;  %v10604_v29 = vld [vmem:[%s13254_s8 + $0x48] sm:$0xff]  }
 0x4f4   :  { %9247 = vmatprep.subr.bf16.mxu1 %v10588_v30  ;;  %v10610_v30 = vld [vmem:[%s13254_s8 + $0xc8] sm:$0xff]  }
 0x4f7   :  { %9248 = vmatpush3.bf16.msra.mxu1 %v10590_v31  ;;  %v10605_v31 = vld [vmem:[%s13254_s8 + $0x8] sm:$0xff]  }
 0x4f8   :  { %9249 = vmatprep.subr.bf16.mxu1 %v10591_v32  ;;  %v10612_v32 = vld [vmem:[%s13254_s8 + $0x88] sm:$0xff]  }
 0x4fb   :  { %9250 = vmatpush3.bf16.msra.mxu1 %v10593_v33  ;;  %v10607_v33 = vld [vmem:[%s13254_s8 + $0x50] sm:$0xff]  }
 0x4fc   :  { %9251 = vmatprep.subr.bf16.mxu1 %v10594_v34  ;;  %v10614_v34 = vld [vmem:[%s13254_s8 + $0xd0] sm:$0xff]  }
 0x4ff   :  { %9252 = vmatpush3.bf16.msra.mxu1 %v10596_v35  ;;  %v10609_v35 = vld [vmem:[%s13254_s8 + $0x10] sm:$0xff]  }
 0x500   :  { %9253 = vmatprep.subr.bf16.mxu1 %v10597_v36  ;;  %v10616_v36 = vld [vmem:[%s13254_s8 + $0x90] sm:$0xff]  }
 0x503   :  { %9254 = vmatpush3.bf16.msra.mxu1 %v10599_v38  ;;  %v10618_v38 = vld [vmem:[%s13254_s8 + $0xd8] sm:$0xff]  }
 0x504   :  { %9943 = vmatprep.subr.bf16.mxu1 %v12026_v53 }
 0x5b1   :  { %v9905_v41 = vpop.f32.mrb[8].mxu1 }
 0x5b2   :  { %v1114_v42 = vpop.f32.mrb[9].mxu1 }
 0x5b3   :  { %v9906_v43 = vpop.f32.mrb[10].mxu1 }
 0x5b4   :  { %v1130_v44 = vpack.c.bf16 %v9906_v43, %v9905_v41  ;;  %v1117_v45 = vpop.f32.mrb[11].mxu1  ;;  %v10615_v41 = vld [vmem:[%s13254_s8 + $0x60] sm:$0xff]  }
 0x5b5   :  { %v1129_v46 = vpack.c.bf16 %v1117_v45, %v1114_v42  ;;  %v10622_v42 = vld [vmem:[%s13254_s8 + $0xe0] sm:$0xff]   ;;  %v10619_v45 = vld [vmem:[%s13254_s8 + $0x68] sm:$0xff]  }
 0x5b6   :  { %v10617_v43 = vld [vmem:[%s13254_s8 + $0x20] sm:$0xff]  }
 0x5b7   :  { %1413 = vmatprep.mubr.bf16.mxu1 %v1129_v46  ;;  %v10626_v46 = vld [vmem:[%s13254_s8 + $0xe8] sm:$0xff]  }
 0x5b8   :  { %1414 = vmatmul.mubr.bf16.vlgmr.msra.gmra.mrb[16].mxu1 %v12555_v10 }
 0x5b9   :  { %v9913_v47 = vpop.f32.mrb[12].mxu1  ;;  %1421 = vmatprep.mubr.bf16.mxu1 %v1130_v44  ;;  %v10624_v44 = vld [vmem:[%s13254_s8 + $0xa0] sm:$0xff]  }
 0x5ba   :  { %v1165_v48 = vpop.f32.mrb[13].mxu1 }
 0x5bb   :  { %v9914_v49 = vpop.f32.mrb[14].mxu1 }
 0x5bc   :  { %v1181_v50 = vpack.c.bf16 %v9914_v49, %v9913_v47  ;;  %v1168_v51 = vpop.f32.mrb[15].mxu1  ;;  %v10621_v47 = vld [vmem:[%s13254_s8 + $0x28] sm:$0xff]   ;;  %v10625_v49 = vld [vmem:[%s13254_s8 + $0x30] sm:$0xff]  }
 0x5bd   :  { %v1180_v52 = vpack.c.bf16 %v1168_v51, %v1165_v48  ;;  %v10623_v48 = vld [vmem:[%s13254_s8 + $0x70] sm:$0xff]   ;;  %v10628_v51 = vld [vmem:[%s13254_s8 + $0xa8] sm:$0xff]  }
 0x5bf   :  { %9931 = vmatprep.mubr.bf16.mxu0 %v1180_v52  ;;  %v10629_v52 = vld [vmem:[%s13254_s8 + $0x38] sm:$0xff]  }
 0x5c0   :  { %1422 = vmatmul.mubr.bf16.gmra.mrb[20].mxu1 %v12559_v18  ;;  %9932 = vmatmul.mubr.bf16.vlgmr.msra.gmra.mrb[12].mxu0 %v1181_v50  ;;  %v10627_v50 = vld [vmem:[%s13254_s8 + $0x78] sm:$0xff]  }
 0x5c1   :  { %9947 = vmatprep.mubr.msk.bf16.mxu1 %vm12027_vm1, %v12026_v53  ;;  %9939 = vmatprep.mubr.msk.bf16.mxu0 %vm12027_vm1, %v12026_v53 }
 0x68b   :  { %v9255_v54 = vpop.f32.mrb[16].mxu1 }
 0x68c   :  { %v9256_v55 = vpop.f32.mrb[17].mxu1 }
 0x68d   :  { %v9257_v56 = vadd.f32 %v9256_v55, %v9255_v54  ;;  %v9258_v57 = vpop.f32.mrb[18].mxu1  ;;  %v10630_v54 = vld [vmem:[%s13254_s8 + $0xf0] sm:$0xff]  }
 0x68e   :  { %v9259_v58 = vpop.f32.mrb[19].mxu1  ;;  %v10631_v55 = vld [vmem:[%s13254_s8 + $0xb0] sm:$0xff]  }
 0x68f   :  { %v9260_v59 = vadd.f32 %v9259_v58, %v9258_v57  ;;  %v1416_v63 = vadd.f32 %v9257_v56, %v8633_v60  ;;  %v10632_v56 = vld [vmem:[%s13254_s8 + $0xf8] sm:$0xff]  }
 0x690   :  { %v10633_v57 = vld [vmem:[%s13254_s8 + $0xb8] sm:$0xff]  }
 0x691   :  { %v1419_v6 = vadd.f32 %v9260_v59, %v8633_v60 }
 0x693   :  { %v9261_v61 = vpop.f32.mrb[20].mxu1  ;;  %v9933_v62 = vpop.f32.mrb[12].mxu0 }
 0x694   :  { %v9262_v0 = vpop.f32.mrb[21].mxu1  ;;  %v1464_v1 = vpop.f32.mrb[13].mxu0 }
 0x695   :  { %v9263_v2 = vadd.f32 %v9262_v0, %v9261_v61  ;;  %v12578_v3 = vadd.f32 %v1464_v1, %v1416_v63  ;;  %v9264_v4 = vpop.f32.mrb[22].mxu1  ;;  %v9934_v5 = vpop.f32.mrb[14].mxu0 }
 0x696   :  { %v9265_v7 = vpop.f32.mrb[23].mxu1  ;;  %v1467_v8 = vpop.f32.mrb[15].mxu0 }
 0x697   :  { %v1424_v9 = vadd.f32 %v9263_v2, %v8633_v60  ;;  %v9266_v10 = vadd.f32 %v9265_v7, %v9264_v4  ;;  %v12580_v11 = vadd.f32 %v1467_v8, %v1419_v6  ;;  %v1479_v13 = vmax.f32 %v12578_v3, 0.0  ;;  %v11088_v3 = vld [vmem:[#allocation18] sm:$0xff]  }
 0x699   :  { %v12582_v12 = vadd.f32 %v9933_v62, %v1424_v9  ;;  %v1427_v14 = vadd.f32 %v9266_v10, %v8633_v60  ;;  %v1480_v15 = vmax.f32 %v12580_v11, 0.0  ;;  %v10738_v11 = vld [vmem:[#allocation6 + $0x40] sm:$0xff]  }
 0x69b   :  { %v12586_v16 = vadd.f32 %v9934_v5, %v1427_v14  ;;  %v1483_v17 = vpack.c.bf16 %v1480_v15, %v1479_v13  ;;  %v1481_v18 = vmax.f32 %v12582_v12, 0.0  ;;  %v11087_v12 = vld [vmem:[#allocation21 + $0x8] sm:$0xff]  }
 0x69d   :  { %v1482_v19 = vmax.f32 %v12586_v16, 0.0  ;;  %9936 = vmatpush3.bf16.msra.mxu0 %v1483_v17  ;;  %9944 = vmatpush3.bf16.msra.mxu1 %v1483_v17  ;;  %v11089_v16 = vld [vmem:[#allocation18 + $0x8] sm:$0xff]  }
 0x69e   :  { %9937 = vmatprep.subr.bf16.mxu0 %v12026_v53  ;;  %9945 = vmatprep.subr.bf16.mxu1 %v12026_v53 }
 0x69f   :  { %v1484_v20 = vpack.c.bf16 %v1482_v19, %v1481_v18 }
 0x6a1   :  { %9938 = vmatpush3.bf16.msra.mxu0 %v1484_v20  ;;  %9946 = vmatpush3.bf16.msra.mxu1 %v1484_v20 }
 0x6a2   :  { %9951 = vmatprep.subr.bf16.mxu0 %v12026_v53  ;;  %9959 = vmatprep.subr.bf16.mxu1 %v12026_v53 }
 0x6a4   :  { %9948 = vmatmul.mubr.msk.bf16.vlgmr.msra.gmra.mrb[24].mxu1 %vm648_vm0, %v1531_v21  ;;  %9940 = vmatmul.mubr.msk.bf16.vlgmr.msra.gmra.mrb[16].mxu0 %vm648_vm0, %v1485_v22 }
 0x6a5   :  { %9952 = vmatpush3.bf16.msra.mxu0 %v1483_v17  ;;  %9960 = vmatpush3.bf16.msra.mxu1 %v1483_v17 }
 0x6a6   :  { %9953 = vmatprep.subr.bf16.mxu0 %v12026_v53  ;;  %9961 = vmatprep.subr.bf16.mxu1 %v12026_v53 }
 0x6a7   :  { %9963 = vmatprep.mubr.msk.bf16.mxu1 %vm12027_vm1, %v12026_v53  ;;  %9955 = vmatprep.mubr.msk.bf16.mxu0 %vm12027_vm1, %v12026_v53 }
 0x6a9   :  { %9954 = vmatpush3.bf16.msra.mxu0 %v1484_v20  ;;  %9962 = vmatpush3.bf16.msra.mxu1 %v1484_v20 }
 0x6aa   :  { %9289 = vmatprep.subr.bf16.mxu0 %v10602_v23  ;;  %9311 = vmatprep.subr.bf16.mxu1 %v10606_v24 }
 0x6ac   :  { %9964 = vmatmul.mubr.msk.bf16.vlgmr.msra.gmra.mrb[28].mxu1 %vm648_vm0, %v1623_v25  ;;  %9956 = vmatmul.mubr.msk.bf16.vlgmr.msra.gmra.mrb[20].mxu0 %vm648_vm0, %v1577_v26 }
 0x6ad   :  { %9290 = vmatpush3.bf16.msra.mxu0 %v10603_v27  ;;  %9312 = vmatpush3.bf16.msra.mxu1 %v10608_v28  ;;  %v8662_v27 = vld [vmem:[#allocation10] ss:$0 sm:$0xff] }
 0x6ae   :  { %9291 = vmatprep.subr.bf16.mxu0 %v10604_v29  ;;  %9313 = vmatprep.subr.bf16.mxu1 %v10610_v30 }
 0x6b1   :  { %9292 = vmatpush3.bf16.msra.mxu0 %v10605_v31  ;;  %9314 = vmatpush3.bf16.msra.mxu1 %v10612_v32 }
 0x6b2   :  { %9293 = vmatprep.subr.bf16.mxu0 %v10607_v33  ;;  %9315 = vmatprep.subr.bf16.mxu1 %v10614_v34 }
 0x6b5   :  { %9294 = vmatpush3.bf16.msra.mxu0 %v10609_v35  ;;  %9316 = vmatpush3.bf16.msra.mxu1 %v10616_v36  ;;  %v10634_v36 = vld [vmem:[#allocation36 + $0x40] sm:$0xff]  }
 0x6b6   :  { %9295 = vmatprep.subr.bf16.mxu0 %v10611_v37  ;;  %9317 = vmatprep.subr.bf16.mxu1 %v10618_v38  ;;  %v12654_v38 = vld [vmem:[#allocation22] sm:$0xf] }
 0x6b9   :  { %9296 = vmatpush3.bf16.msra.mxu0 %v10613_v39  ;;  %9318 = vmatpush3.bf16.msra.mxu1 %v10620_v40  ;;  %v12657_v39 = vld [vmem:[%s13255_s11] sm:$0xf]  ;;  %v10635_v40 = vld [vmem:[#allocation36] sm:$0xff]  }
 0x6ba   :  { %9297 = vmatprep.subr.bf16.mxu0 %v10615_v41  ;;  %9319 = vmatprep.subr.bf16.mxu1 %v10622_v42  ;;  %v10638_v41 = vld [vmem:[#allocation36 + $0x80] sm:$0xff]   ;;  %v10636_v42 = vld [vmem:[#allocation36 + $0x48] sm:$0xff]  }
 0x6bd   :  { %9298 = vmatpush3.bf16.msra.mxu0 %v10617_v43  ;;  %9320 = vmatpush3.bf16.msra.mxu1 %v10624_v44  ;;  %v10637_v43 = vld [vmem:[#allocation36 + $0x8] sm:$0xff]  }
 0x6be   :  { %9299 = vmatprep.subr.bf16.mxu0 %v10619_v45  ;;  %9321 = vmatprep.subr.bf16.mxu1 %v10626_v46  ;;  %v10641_v44 = vld [vmem:[#allocation36 + $0x88] sm:$0xff]   ;;  %v10639_v45 = vld [vmem:[#allocation36 + $0x50] sm:$0xff]  }
 0x6bf   :  { %v10640_v46 = vld [vmem:[#allocation36 + $0x10] sm:$0xff]  }
 0x6c1   :  { %9300 = vmatpush3.bf16.msra.mxu0 %v10621_v47  ;;  %9322 = vmatpush3.bf16.msra.mxu1 %v10628_v51  ;;  %v10644_v47 = vld [vmem:[#allocation36 + $0x90] sm:$0xff]   ;;  %v10645_v51 = vld [vmem:[#allocation36 + $0x60] sm:$0xff]  }
 0x6c2   :  { %9301 = vmatprep.subr.bf16.mxu0 %v10623_v48  ;;  %9323 = vmatprep.subr.bf16.mxu1 %v10630_v54  ;;  %v10642_v48 = vld [vmem:[#allocation36 + $0x58] sm:$0xff]   ;;  %v10650_v54 = vld [vmem:[#allocation36 + $0xa0] sm:$0xff]  }
 0x6c5   :  { %9302 = vmatpush3.bf16.msra.mxu0 %v10625_v49  ;;  %9324 = vmatpush3.bf16.msra.mxu1 %v10631_v55  ;;  %v10643_v49 = vld [vmem:[#allocation36 + $0x18] sm:$0xff]   ;;  %v10648_v55 = vld [vmem:[#allocation36 + $0x68] sm:$0xff]  }
 0x6c6   :  { %9303 = vmatprep.subr.bf16.mxu0 %v10627_v50  ;;  %9325 = vmatprep.subr.bf16.mxu1 %v10632_v56  ;;  %v10647_v50 = vld [vmem:[#allocation36 + $0x98] sm:$0xff]   ;;  %v10649_v56 = vld [vmem:[#allocation36 + $0x28] sm:$0xff]  }
 0x6c9   :  { %9304 = vmatpush3.bf16.msra.mxu0 %v10629_v52  ;;  %9326 = vmatpush3.bf16.msra.mxu1 %v10633_v57  ;;  %v10646_v52 = vld [vmem:[#allocation36 + $0x20] sm:$0xff]   ;;  %v10653_v57 = vld [vmem:[#allocation36 + $0xa8] sm:$0xff]  }
 0x6ca   :  { %9967 = vmatprep.subr.bf16.mxu0 %v12026_v53  ;;  %9973 = vmatprep.subr.bf16.mxu1 %v12026_v53 }
 0x777   :  { %v1569_v58 = vpop.f32.mrb[24].mxu1  ;;  %v1523_v59 = vpop.f32.mrb[16].mxu0 }
 0x778   :  { %v1575_v60 = vpack.c.bf16 %v1569_v58, %v1569_v58  ;;  %v1529_v61 = vpack.c.bf16 %v1523_v59, %v1523_v59  ;;  %v9949_v62 = vpop.f32.mrb[25].mxu1  ;;  %v9941_v63 = vpop.f32.mrb[17].mxu0  ;;  %v10651_v58 = vld [vmem:[#allocation36 + $0x70] sm:$0xff]  }
 0x779   :  { %v1572_v0 = vpop.f32.mrb[26].mxu1  ;;  %v1526_v1 = vpop.f32.mrb[18].mxu0  ;;  %v10652_v59 = vld [vmem:[#allocation36 + $0x30] sm:$0xff]   ;;  %v10655_v62 = vld [vmem:[#allocation36 + $0x38] sm:$0xff]  }
 0x77a   :  { %v9950_v2 = vpop.f32.mrb[27].mxu1  ;;  %1963 = vmatprep.mubr.bf16.mxu0 %v1575_v60  ;;  %v9942_v4 = vpop.f32.mrb[19].mxu0  ;;  %v10656_v60 = vld [vmem:[#allocation36 + $0xb0] sm:$0xff]   ;;  %v10657_v63 = vld [vmem:[#allocation36 + $0xb8] sm:$0xff]  }
 0x77b   :  { %1964 = vmatmul.mubr.bf16.vlgmr.msra.gmra.mrb[24].mxu0 %v1529_v61  ;;  %v10654_v61 = vld [vmem:[#allocation36 + $0x78] sm:$0xff]  }
 0x77c   :  { %9969 = vmatprep.mubr.msk.bf16.mxu0 %vm12027_vm1, %v12026_v53 }
 0x77f   :  { %v1661_v5 = vpop.f32.mrb[28].mxu1  ;;  %v1615_v6 = vpop.f32.mrb[20].mxu0 }
 0x780   :  { %v1667_v7 = vpack.c.bf16 %v1661_v5, %v1661_v5  ;;  %v1621_v8 = vpack.c.bf16 %v1615_v6, %v1615_v6  ;;  %v9965_v9 = vpop.f32.mrb[29].mxu1  ;;  %v9957_v10 = vpop.f32.mrb[21].mxu0 }
 0x781   :  { %v1664_v14 = vpop.f32.mrb[30].mxu1  ;;  %v1618_v17 = vpop.f32.mrb[22].mxu0 }
 0x782   :  { %2003 = vmatprep.mubr.bf16.mxu1 %v1667_v7  ;;  %v9966_v20 = vpop.f32.mrb[31].mxu1  ;;  %v9958_v21 = vpop.f32.mrb[23].mxu0 }
 0x783   :  { %2004 = vmatmul.mubr.bf16.vlgmr.msra.gmra.mrb[32].mxu1 %v1621_v8 }
 0x784   :  { %9975 = vmatprep.mubr.msk.bf16.mxu1 %vm12027_vm1, %v12026_v53 }
 0x84e   :  { %v9305_v22 = vpop.f32.mrb[24].mxu0 }
 0x84f   :  { %v9306_v23 = vpop.f32.mrb[25].mxu0 }
 0x850   :  { %v9307_v24 = vadd.f32 %v9306_v23, %v9305_v22  ;;  %v9308_v25 = vpop.f32.mrb[26].mxu0  ;;  %v8697_v22 = vld [vmem:[#allocation33] ss:$0 sm:$0xff] }
 0x851   :  { %v9309_v26 = vpop.f32.mrb[27].mxu0 }
 0x852   :  { %v1966_v30 = vadd.f32 %v9307_v24, %v8662_v27 }
 0x856   :  { %v9327_v28 = vpop.f32.mrb[32].mxu1 }
 0x857   :  { %v9328_v29 = vpop.f32.mrb[33].mxu1 }
 0x858   :  { %v9329_v31 = vadd.f32 %v9328_v29, %v9327_v28  ;;  %v9330_v32 = vpop.f32.mrb[34].mxu1 }
 0x859   :  { %v9331_v33 = vpop.f32.mrb[35].mxu1  ;;  %v10658_v32 = vld [vmem:[#allocation37 + $0x40] sm:$0xff]  }
 0x85a   :  { %v2006_v34 = vadd.f32 %v9329_v31, %v1966_v30 }
 0x85c   :  { %v12650_v35 = vpack.c.bf16 %v2006_v34, %v2006_v34  ;;  %v10659_v34 = vld [vmem:[#allocation37] sm:$0xff]  }
 0x85e   :  { %v2019_v37 = vsel %vm2017_vm2, %v12650_v35, 0 }
 0x85f   :  { %9968 = vmatpush3.bf16.msra.mxu0 %v2019_v37  ;;  %9974 = vmatpush3.bf16.msra.mxu1 %v2019_v37  ;;  %v10661_v37 = vld [vmem:[#allocation37 + $0x8] sm:$0xff]  }
 0x860   :  { %9337 = vmatprep.subr.bf16.mxu0 %v10634_v36  ;;  %9979 = vmatprep.subr.bf16.mxu1 %v12026_v53  ;;  %v10660_v36 = vld [vmem:[#allocation37 + $0x48] sm:$0xff]  }
 0x862   :  { %9970 = vmatmul.mubr.msk.bf16.vlgmr.msra.gmra.mrb[28].mxu0 %vm2013_vm3, %v12654_v38  ;;  %9976 = vmatmul.mubr.msk.bf16.vlgmr.msra.gmra.mrb[36].mxu1 %vm2013_vm3, %v12657_v39 }
 0x863   :  { %9338 = vmatpush3.bf16.msra.mxu0 %v10635_v40  ;;  %9980 = vmatpush3.bf16.msra.mxu1 %v10638_v41  ;;  %v10665_v40 = vld [vmem:[#allocation37 + $0x88] sm:$0xff]   ;;  %v10663_v41 = vld [vmem:[#allocation37 + $0x50] sm:$0xff]  }
 0x864   :  { %9339 = vmatprep.subr.bf16.mxu0 %v10636_v42  ;;  %9981 = vmatprep.subr.bf16.mxu1 %v12026_v53  ;;  %v10664_v42 = vld [vmem:[#allocation37 + $0x10] sm:$0xff]  }
 0x865   :  { %9995 = vmatprep.mubr.msk.bf16.mxu1 %vm12027_vm1, %v12026_v53 }
 0x867   :  { %9340 = vmatpush3.bf16.msra.mxu0 %v10637_v43  ;;  %9982 = vmatpush3.bf16.msra.mxu1 %v10641_v44  ;;  %v10668_v43 = vld [vmem:[#allocation37 + $0x90] sm:$0xff]   ;;  %v10666_v44 = vld [vmem:[#allocation37 + $0x58] sm:$0xff]  }
 0x868   :  { %9341 = vmatprep.subr.bf16.mxu0 %v10639_v45  ;;  %9983 = vmatprep.subr.bf16.mxu1 %v12026_v53  ;;  %v10667_v45 = vld [vmem:[#allocation37 + $0x18] sm:$0xff]  }
 0x86b   :  { %9342 = vmatpush3.bf16.msra.mxu0 %v10640_v46  ;;  %9984 = vmatpush3.bf16.msra.mxu1 %v10644_v47  ;;  %v10671_v46 = vld [vmem:[#allocation37 + $0x98] sm:$0xff]   ;;  %v10669_v47 = vld [vmem:[#allocation37 + $0x60] sm:$0xff]  }
 0x86c   :  { %9343 = vmatprep.subr.bf16.mxu0 %v10642_v48  ;;  %9985 = vmatprep.subr.bf16.mxu1 %v12026_v53  ;;  %v10670_v48 = vld [vmem:[#allocation37 + $0x20] sm:$0xff]  }
 0x86f   :  { %9344 = vmatpush3.bf16.msra.mxu0 %v10643_v49  ;;  %9986 = vmatpush3.bf16.msra.mxu1 %v10647_v50  ;;  %v10674_v49 = vld [vmem:[#allocation37 + $0xa0] sm:$0xff]   ;;  %v10672_v50 = vld [vmem:[#allocation37 + $0x68] sm:$0xff]  }
 0x870   :  { %9345 = vmatprep.subr.bf16.mxu0 %v10645_v51  ;;  %9987 = vmatprep.subr.bf16.mxu1 %v12026_v53  ;;  %v10673_v51 = vld [vmem:[#allocation37 + $0x28] sm:$0xff]  }
 0x873   :  { %9346 = vmatpush3.bf16.msra.mxu0 %v10646_v52  ;;  %9988 = vmatpush3.bf16.msra.mxu1 %v10650_v54  ;;  %v10677_v52 = vld [vmem:[#allocation37 + $0xa8] sm:$0xff]   ;;  %v10675_v54 = vld [vmem:[#allocation37 + $0x70] sm:$0xff]  }
 0x874   :  { %9347 = vmatprep.subr.bf16.mxu0 %v10648_v55  ;;  %9989 = vmatprep.subr.bf16.mxu1 %v12026_v53  ;;  %v10676_v55 = vld [vmem:[#allocation37 + $0x30] sm:$0xff]  }
 0x877   :  { %9348 = vmatpush3.bf16.msra.mxu0 %v10649_v56  ;;  %9990 = vmatpush3.bf16.msra.mxu1 %v10653_v57  ;;  %v10680_v56 = vld [vmem:[#allocation37 + $0xb0] sm:$0xff]   ;;  %v10678_v57 = vld [vmem:[#allocation37 + $0x78] sm:$0xff]  }
 0x878   :  { %9349 = vmatprep.subr.bf16.mxu0 %v10651_v58  ;;  %9991 = vmatprep.subr.bf16.mxu1 %v12026_v53  ;;  %v10679_v58 = vld [vmem:[#allocation37 + $0x38] sm:$0xff]  }
 0x87b   :  { %9350 = vmatpush3.bf16.msra.mxu0 %v10652_v59  ;;  %9992 = vmatpush3.bf16.msra.mxu1 %v10656_v60  ;;  %v10681_v59 = vld [vmem:[#allocation37 + $0xb8] sm:$0xff]  }
 0x87c   :  { %9351 = vmatprep.subr.bf16.mxu0 %v10654_v61  ;;  %9993 = vmatprep.subr.bf16.mxu1 %v12026_v53  ;;  %v10684_v60 = vld [vmem:[#allocation25 + $0x4] ss:$16 sps:$4 sm:$0xff]   ;;  %v10687_v61 = vld [vmem:[#allocation25 + $0xc] ss:$16 sps:$4 sm:$0xff]  }
 0x87f   :  { %9352 = vmatpush3.bf16.msra.mxu0 %v10655_v62  ;;  %9994 = vmatpush3.bf16.msra.mxu1 %v10657_v63 }
 0x880   :  { %9999 = vmatprep.subr.bf16.mxu0 %v12026_v53  ;;  %10005 = vmatprep.subr.bf16.mxu1 %v12026_v53 }
 0x935   :  { %v2055_v0 = vpop.f32.mrb[28].mxu0  ;;  %v2100_v1 = vpop.f32.mrb[36].mxu1 }
 0x936   :  { %v2061_v2 = vpack.c.bf16 %v2055_v0, %v2055_v0  ;;  %v9971_v4 = vpop.f32.mrb[29].mxu0  ;;  %v2106_v5 = vpack.c.bf16 %v2100_v1, %v2100_v1  ;;  %v9977_v6 = vpop.f32.mrb[37].mxu1  ;;  %v10685_v0 = vld [vmem:[#allocation25 + $0x8] ss:$16 sps:$4 sm:$0xff]  }
 0x937   :  { %v2058_v7 = vpop.f32.mrb[30].mxu0  ;;  %v2103_v8 = vpop.f32.mrb[38].mxu1  ;;  %v10682_v6 = vld [vmem:[#allocation25] ss:$16 sps:$4 sm:$0xff]  }
 0x938   :  { %2338 = vmatprep.mubr.bf16.mxu0 %v2061_v2  ;;  %v9972_v9 = vpop.f32.mrb[31].mxu0  ;;  %9996 = vmatmul.mubr.bf16.vlgmr.msra.gmra.mrb[40].mxu1 %v2106_v5  ;;  %v9978_v10 = vpop.f32.mrb[39].mxu1  ;;  %v10693_v7 = vld [vmem:[#allocation25 + $0x2c] ss:$16 sps:$4 sm:$0xff]  }
 0x939   :  { %2339 = vmatmul.mubr.bf16.vlgmr.msra.gmra.mrb[32].mxu0 %v12650_v35  ;;  %10007 = vmatprep.mubr.msk.bf16.mxu1 %vm12027_vm1, %v12026_v53  ;;  %v10662_v35 = vld [vmem:[#allocation37 + $0x80] sm:$0xff]   ;;  %v10690_v10 = vld [vmem:[#allocation25 + $0x24] ss:$16 sps:$4 sm:$0xff]  }
 0x93a   :  { %10001 = vmatprep.mubr.msk.bf16.mxu0 %vm12027_vm1, %v12026_v53 }
 0xa0b   :  { %v2380_v14 = vpop.f32.mrb[40].mxu1 }
 0xa0c   :  { %v9353_v17 = vpop.f32.mrb[32].mxu0  ;;  %v9997_v20 = vpop.f32.mrb[41].mxu1 }
 0xa0d   :  { %v9354_v21 = vpop.f32.mrb[33].mxu0  ;;  %v2383_v23 = vpop.f32.mrb[42].mxu1  ;;  %v10691_v20 = vld [vmem:[#allocation25 + $0x28] ss:$16 sps:$4 sm:$0xff]  }
 0xa0e   :  { %v9355_v24 = vadd.f32 %v9354_v21, %v9353_v17  ;;  %v9356_v25 = vpop.f32.mrb[34].mxu0  ;;  %v9998_v26 = vpop.f32.mrb[43].mxu1  ;;  %v10688_v21 = vld [vmem:[#allocation25 + $0x20] ss:$16 sps:$4 sm:$0xff]   ;;  %v10696_v23 = vld [vmem:[#allocation25 + $0x44] ss:$16 sps:$4 sm:$0xff]  }
 0xa0f   :  { %v9357_v27 = vpop.f32.mrb[35].mxu0  ;;  %v10694_v25 = vld [vmem:[#allocation25 + $0x40] ss:$16 sps:$4 sm:$0xff]   ;;  %v10705_v26 = vld [vmem:[#allocation25 + $0x6c] ss:$16 sps:$4 sm:$0xff]  }
 0xa10   :  { %v2341_v28 = vadd.f32 %v9355_v24, %v8697_v22  ;;  %v10699_v22 = vld [vmem:[#allocation25 + $0x4c] ss:$16 sps:$4 sm:$0xff]   ;;  %v10697_v24 = vld [vmem:[#allocation25 + $0x48] ss:$16 sps:$4 sm:$0xff]   ;;  %v10702_v27 = vld [vmem:[#allocation25 + $0x64] ss:$16 sps:$4 sm:$0xff]  }
 0xa12   :  { %v2381_v29 = vadd.f32 %v2380_v14, %v2341_v28  ;;  %v10703_v28 = vld [vmem:[#allocation25 + $0x68] ss:$16 sps:$4 sm:$0xff]  }
 0xa14   :  { %v2386_v30 = vmax.f32 %v2381_v29, 0.0  ;;  %v10700_v29 = vld [vmem:[#allocation25 + $0x60] ss:$16 sps:$4 sm:$0xff]  }
 0xa16   :  { %v12680_v31 = vpack.c.bf16 %v2386_v30, %v2386_v30  ;;  %v10711_v30 = vld [vmem:[#allocation25 + $0x8c] ss:$16 sps:$4 sm:$0xff]  }
 0xa18   :  { %v2389_v33 = vsel %vm2017_vm2, %v12680_v31, 0 }
 0xa19   :  { %10000 = vmatpush3.bf16.msra.mxu0 %v2389_v33  ;;  %10006 = vmatpush3.bf16.msra.mxu1 %v2389_v33  ;;  %v10706_v33 = vld [vmem:[#allocation25 + $0x80] ss:$16 sps:$4 sm:$0xff]  }
 0xa1a   :  { %9372 = vmatprep.subr.bf16.mxu0 %v10658_v32  ;;  %10011 = vmatprep.subr.bf16.mxu1 %v12026_v53  ;;  %v10709_v32 = vld [vmem:[#allocation25 + $0x88] ss:$16 sps:$4 sm:$0xff]  }
 0xa1c   :  { %10002 = vmatmul.mubr.msk.bf16.vlgmr.msra.gmra.mrb[36].mxu0 %vm2013_vm3, %v12654_v38  ;;  %10008 = vmatmul.mubr.msk.bf16.vlgmr.msra.gmra.mrb[44].mxu1 %vm2013_vm3, %v12657_v39 }
 0xa1d   :  { %9373 = vmatpush3.bf16.msra.mxu0 %v10659_v34  ;;  %10012 = vmatpush3.bf16.msra.mxu1 %v10662_v35  ;;  %v10714_v34 = vld [vmem:[#allocation25 + $0xa4] ss:$16 sps:$4 sm:$0xff]   ;;  %v10717_v35 = vld [vmem:[#allocation25 + $0xac] ss:$16 sps:$4 sm:$0xff]  }
 0xa1e   :  { %9374 = vmatprep.subr.bf16.mxu0 %v10660_v36  ;;  %10013 = vmatprep.subr.bf16.mxu1 %v12026_v53  ;;  %v10712_v36 = vld [vmem:[#allocation25 + $0xa0] ss:$16 sps:$4 sm:$0xff]  }
 0xa1f   :  { %10027 = vmatprep.mubr.msk.bf16.mxu1 %vm12027_vm1, %v12026_v53 }
 0xa21   :  { %9375 = vmatpush3.bf16.msra.mxu0 %v10661_v37  ;;  %10014 = vmatpush3.bf16.msra.mxu1 %v10665_v40  ;;  %v10715_v37 = vld [vmem:[#allocation25 + $0xa8] ss:$16 sps:$4 sm:$0xff]   ;;  %v10720_v40 = vld [vmem:[#allocation25 + $0xc4] ss:$16 sps:$4 sm:$0xff]  }
 0xa22   :  { %9376 = vmatprep.subr.bf16.mxu0 %v10663_v41  ;;  %10015 = vmatprep.subr.bf16.mxu1 %v12026_v53  ;;  %v10723_v41 = vld [vmem:[#allocation25 + $0xcc] ss:$16 sps:$4 sm:$0xff]  }
 0xa25   :  { %9377 = vmatpush3.bf16.msra.mxu0 %v10664_v42  ;;  %10016 = vmatpush3.bf16.msra.mxu1 %v10668_v43  ;;  %v10718_v42 = vld [vmem:[#allocation25 + $0xc0] ss:$16 sps:$4 sm:$0xff]   ;;  %v10721_v43 = vld [vmem:[#allocation25 + $0xc8] ss:$16 sps:$4 sm:$0xff]  }
 0xa26   :  { %9378 = vmatprep.subr.bf16.mxu0 %v10666_v44  ;;  %10017 = vmatprep.subr.bf16.mxu1 %v12026_v53  ;;  %v10726_v44 = vld [vmem:[#allocation25 + $0xe4] ss:$16 sps:$4 sm:$0xff]  }
 0xa29   :  { %9379 = vmatpush3.bf16.msra.mxu0 %v10667_v45  ;;  %10018 = vmatpush3.bf16.msra.mxu1 %v10671_v46  ;;  %v10729_v45 = vld [vmem:[#allocation25 + $0xec] ss:$16 sps:$4 sm:$0xff]   ;;  %v10724_v46 = vld [vmem:[#allocation25 + $0xe0] ss:$16 sps:$4 sm:$0xff]  }
 0xa2a   :  { %9380 = vmatprep.subr.bf16.mxu0 %v10669_v47  ;;  %10019 = vmatprep.subr.bf16.mxu1 %v12026_v53  ;;  %v10727_v47 = vld [vmem:[#allocation25 + $0xe8] ss:$16 sps:$4 sm:$0xff]  }
 0xa2d   :  { %9381 = vmatpush3.bf16.msra.mxu0 %v10670_v48  ;;  %10020 = vmatpush3.bf16.msra.mxu1 %v10674_v49  ;;  %v12028_v48 = vmov 0  }
 0xa2e   :  { %9382 = vmatprep.subr.bf16.mxu0 %v10672_v50  ;;  %10021 = vmatprep.subr.bf16.mxu1 %v12026_v53 }
 0xa31   :  { %9383 = vmatpush3.bf16.msra.mxu0 %v10673_v51  ;;  %10022 = vmatpush3.bf16.msra.mxu1 %v10677_v52 }
 0xa32   :  { %9384 = vmatprep.subr.bf16.mxu0 %v10675_v54  ;;  %10023 = vmatprep.subr.bf16.mxu1 %v12026_v53  ;;  %v8724_v54 = vld [vmem:[#allocation34] ss:$0 sm:$0xff] }
 0xa35   :  { %9385 = vmatpush3.bf16.msra.mxu0 %v10676_v55  ;;  %10024 = vmatpush3.bf16.msra.mxu1 %v10680_v56 }
 0xa36   :  { %9386 = vmatprep.subr.bf16.mxu0 %v10678_v57  ;;  %10025 = vmatprep.subr.bf16.mxu1 %v12026_v53 }
 0xa39   :  { %9387 = vmatpush3.bf16.msra.mxu0 %v10679_v58  ;;  %10026 = vmatpush3.bf16.msra.mxu1 %v10681_v59 }
 0xa3a   :  { %2968 = vmatprep.subr.bf16.mxu0 %v10684_v60  ;;  %3009 = vmatprep.subr.bf16.mxu1 %v10687_v61 }
 0xaef   :  { %v2425_v62 = vpop.f32.mrb[36].mxu0  ;;  %v2466_v63 = vpop.f32.mrb[44].mxu1 }
 0xaf0   :  { %v2431_v1 = vpack.c.bf16 %v2425_v62, %v2425_v62  ;;  %v10003_v2 = vpop.f32.mrb[37].mxu0  ;;  %v2472_v4 = vpack.c.bf16 %v2466_v63, %v2466_v63  ;;  %v10009_v5 = vpop.f32.mrb[45].mxu1 }
 0xaf1   :  { %v2428_v8 = vpop.f32.mrb[38].mxu0  ;;  %v2469_v9 = vpop.f32.mrb[46].mxu1  ;;  %v2788_v2 = vlaneseq }
 0xaf2   :  { %2704 = vmatprep.mubr.bf16.mxu0 %v2431_v1  ;;  %v10004_v14 = vpop.f32.mrb[39].mxu0  ;;  %10028 = vmatmul.mubr.bf16.vlgmr.msra.gmra.mrb[48].mxu1 %v2472_v4  ;;  %v10010_v17 = vpop.f32.mrb[47].mxu1  ;;  %v10730_v1 = vld [vmem:[%s13256_s13 + $0x10] sm:$0xff]  }
 0xaf3   :  { %2705 = vmatmul.mubr.bf16.vlgmr.msra.gmra.mrb[40].mxu0 %v12680_v31  ;;  %3010 = vmatpush1.bf16.msra.mxu1 %v10685_v0  ;;  %v10708_v31 = vld [vmem:[#allocation25 + $0x84] ss:$16 sps:$4 sm:$0xff]   ;;  %v11086_v0 = vld [vmem:[#allocation21] sm:$0xff]   ;;  %v2789_v4 = vshrl.u32 %v2788_v2, 7 }
 0xaf4   :  { %2969 = vmatpush1.bf16.msra.mxu0 %v10682_v6  ;;  %3011 = vmatprep.subr.bf16.mxu1 %v10693_v7  ;;  %v2786_v7 = vld [vmem:[#allocation24] sm:$0xf] }
 0xaf5   :  { %2970 = vmatprep.subr.bf16.mxu0 %v10690_v10  ;;  %3000 = vmatprep.mubr.bf16.mxu0 %v12028_v48  ;;  %v12708_v5 = vsub.s32 0, %v2789_v4  ;;  %v12710_v6 = vsub.s32 1, %v2789_v4  ;;  %v12715_v9 = vsub.s32 2, %v2789_v4 }
 0xaf6   :  { %3041 = vmatprep.mubr.bf16.mxu1 %v12028_v48 }
 0xaf7   :  { %3012 = vmatpush1.bf16.msra.mxu1 %v10691_v20  ;;  %v12713_v8 = vrot.slane %v2786_v7, %v12708_v5  ;;  %v12718_v10 = vrot.slane %v2786_v7, %v12710_v6 }
 0xaf8   :  { %2971 = vmatpush1.bf16.msra.mxu0 %v10688_v21  ;;  %3013 = vmatprep.subr.bf16.mxu1 %v10699_v22 }
 0xaf9   :  { %2972 = vmatprep.subr.bf16.mxu0 %v10696_v23  ;;  %v12722_v23 = vrot.slane %v2786_v7, %v12715_v9 }
 0xafb   :  { %3014 = vmatpush1.bf16.msra.mxu1 %v10697_v24 }
 0xafc   :  { %2973 = vmatpush1.bf16.msra.mxu0 %v10694_v25  ;;  %3015 = vmatprep.subr.bf16.mxu1 %v10705_v26 }
 0xafd   :  { %2974 = vmatprep.subr.bf16.mxu0 %v10702_v27 }
 0xaff   :  { %3016 = vmatpush1.bf16.msra.mxu1 %v10703_v28 }
 0xb00   :  { %2975 = vmatpush1.bf16.msra.mxu0 %v10700_v29  ;;  %3017 = vmatprep.subr.bf16.mxu1 %v10711_v30 }
 0xb01   :  { %2976 = vmatprep.subr.bf16.mxu0 %v10708_v31 }
 0xb03   :  { %3018 = vmatpush1.bf16.msra.mxu1 %v10709_v32 }
 0xb04   :  { %2977 = vmatpush1.bf16.msra.mxu0 %v10706_v33  ;;  %3019 = vmatprep.subr.bf16.mxu1 %v10717_v35  ;;  %v10731_v33 = vld [vmem:[%s13256_s13 + $0x18] sm:$0xff]  }
 0xb05   :  { %2978 = vmatprep.subr.bf16.mxu0 %v10714_v34  ;;  %v10732_v34 = vld [vmem:[%s13256_s13] sm:$0xff]  }
 0xb07   :  { %3020 = vmatpush1.bf16.msra.mxu1 %v10715_v37  ;;  %v12732_v37 = vsub.s32 3, %v2789_v4 }
 0xb08   :  { %2979 = vmatpush1.bf16.msra.mxu0 %v10712_v36  ;;  %3021 = vmatprep.subr.bf16.mxu1 %v10723_v41 }
 0xb09   :  { %2980 = vmatprep.subr.bf16.mxu0 %v10720_v40  ;;  %v12738_v40 = vrot.slane %v2786_v7, %v12732_v37  ;;  %v10744_v7 = vld [vmem:[#allocation6 + $0x10] sm:$0xff]  }
 0xb0b   :  { %3022 = vmatpush1.bf16.msra.mxu1 %v10721_v43  ;;  %v10734_v43 = vld [vmem:[%s13256_s13 + $0x20] sm:$0xff]  }
 0xb0c   :  { %2981 = vmatpush1.bf16.msra.mxu0 %v10718_v42  ;;  %3023 = vmatprep.subr.bf16.mxu1 %v10729_v45  ;;  %v10733_v42 = vld [vmem:[%s13256_s13 + $0x8] sm:$0xff]  }
 0xb0d   :  { %2982 = vmatprep.subr.bf16.mxu0 %v10726_v44 }
 0xb0f   :  { %3024 = vmatpush1.bf16.msra.mxu1 %v10727_v47  ;;  %v10736_v47 = vld [vmem:[%s13256_s13 + $0x30] sm:$0xff]  }
 0xb10   :  { %2983 = vmatpush1.bf16.msra.mxu0 %v10724_v46  ;;  %v10735_v46 = vld [vmem:[%s13256_s13 + $0x28] sm:$0xff]  }
 0xbc5   :  { %v2746_v49 = vpop.f32.mrb[48].mxu1 }
 0xbc6   :  { %v9388_v50 = vpop.f32.mrb[40].mxu0  ;;  %v10029_v51 = vpop.f32.mrb[49].mxu1 }
 0xbc7   :  { %v9389_v52 = vpop.f32.mrb[41].mxu0  ;;  %v2749_v55 = vpop.f32.mrb[50].mxu1  ;;  %v10743_v51 = vld [vmem:[#allocation6 + $0x80] sm:$0xff]  }
 0xbc8   :  { %v9390_v56 = vadd.f32 %v9389_v52, %v9388_v50  ;;  %v9391_v57 = vpop.f32.mrb[42].mxu0  ;;  %v10030_v58 = vpop.f32.mrb[51].mxu1  ;;  %v10737_v50 = vld [vmem:[%s13256_s13 + $0x38] sm:$0xff]   ;;  %v10746_v52 = vld [vmem:[#allocation6 + $0x88] sm:$0xff]  }
 0xbc9   :  { %v9392_v59 = vpop.f32.mrb[43].mxu0  ;;  %v10752_v55 = vld [vmem:[#allocation6 + $0x98] sm:$0xff]  }
 0xbca   :  { %v2707_v60 = vadd.f32 %v9390_v56, %v8724_v54  ;;  %v10749_v54 = vld [vmem:[#allocation6 + $0x90] sm:$0xff]   ;;  %v10755_v56 = vld [vmem:[#allocation6 + $0xa0] sm:$0xff]  }
 0xbcc   :  { %v2747_v61 = vadd.f32 %v2746_v49, %v2707_v60 }
 0xbce   :  { %v2752_v62 = vmax.f32 %v2747_v61, 0.0 }
 0xbd0   :  { %v12701_v63 = vpack.c.bf16 %v2752_v62, %v2752_v62 }
 0xbd2   :  { %3001 = vmatmul.mubr.bf16.vlgmr.msra.gmra.mrb[44].mxu0 %v12701_v63  ;;  %3042 = vmatmul.mubr.bf16.vlgmr.msra.gmra.mrb[52].mxu1 %v12701_v63 }
 0xbd3   :  { %10059 = vmatprep.mubr.msk.bf16.mxu1 %vm648_vm0, %v11086_v0  ;;  %10033 = vmatprep.mubr.msk.bf16.mxu0 %vm2013_vm3, %v10730_v1 }
 0xca5   :  { %v3002_v14 = vpop.f32.mrb[44].mxu0  ;;  %v3043_v17 = vpop.f32.mrb[52].mxu1 }
 0xca6   :  { %v3004_v20 = vpop.f32.mrb[45].mxu0  ;;  %v3045_v21 = vpop.f32.mrb[53].mxu1  ;;  %v3003_v22 = vadd.f32 %v3002_v14, %v12713_v8  ;;  %v3044_v31 = vadd.f32 %v3043_v17, %v12722_v23  ;;  %v10745_v14 = vld [vmem:[#allocation6 + $0x58] sm:$0xff]  }
 0xca7   :  { %v3005_v24 = vadd.f32 %v3004_v20, %v12718_v10  ;;  %v3006_v25 = vpop.f32.mrb[46].mxu0  ;;  %v3047_v26 = vpop.f32.mrb[54].mxu1  ;;  %v3046_v41 = vadd.f32 %v3045_v21, %v12738_v40  ;;  %v10747_v17 = vld [vmem:[#allocation6 + $0x18] sm:$0xff]   ;;  %v10748_v20 = vld [vmem:[#allocation6 + $0x60] sm:$0xff]  }
 0xca8   :  { %v3007_v27 = vpop.f32.mrb[47].mxu0  ;;  %v3048_v28 = vpop.f32.mrb[55].mxu1  ;;  %v3050_v30 = vpack.c.bf16 %v3003_v22, %v3003_v22  ;;  %v3197_v36 = vpack.c.bf16 %v3044_v31, %v3044_v31  ;;  %v10750_v21 = vld [vmem:[#allocation6 + $0x20] sm:$0xff]   ;;  %v10751_v22 = vld [vmem:[#allocation6 + $0x68] sm:$0xff]   ;;  %v10754_v25 = vld [vmem:[#allocation6 + $0x70] sm:$0xff]  }
 0xca9   :  { %v3055_v29 = vpack.c.bf16 %v3005_v24, %v3005_v24  ;;  %v3275_v45 = vpack.c.bf16 %v3046_v41, %v3046_v41  ;;  %v10753_v24 = vld [vmem:[#allocation6 + $0x28] sm:$0xff]   ;;  %v10756_v26 = vld [vmem:[#allocation6 + $0x30] sm:$0xff]   ;;  %v10757_v27 = vld [vmem:[#allocation6 + $0x78] sm:$0xff]  }
 0xcaa   :  { %v3146_v35 = vsel %vm2017_vm2, %v3050_v30, 0  ;;  %v3220_v44 = vsel %vm2017_vm2, %v3197_v36, 0  ;;  %v10758_v28 = vld [vmem:[#allocation6 + $0xa8] sm:$0xff]   ;;  %v10761_v31 = vld [vmem:[#allocation6 + $0xb8] sm:$0xff]  }
 0xcab   :  { %v3078_v32 = vsel %vm2017_vm2, %v3055_v29, 0  ;;  %10451 = vmatprep.subr.msk.bf16.mxu0 %vm2017_vm2, %v3055_v29  ;;  %v3298_v49 = vsel %vm2017_vm2, %v3275_v45, 0  ;;  %v10759_v29 = vld [vmem:[#allocation6 + $0x38] sm:$0xff]  }
 0xcac   :  { %10032 = vmatpush3.bf16.msra.mxu0 %v3078_v32 }
 0xcad   :  { %10452 = vmatprep.subr.msk.bf16.mxu0 %vm2017_vm2, %v3050_v30  ;;  %v10760_v30 = vld [vmem:[#allocation6 + $0xb0] sm:$0xff]  }
 0xcaf   :  { %10034 = vmatmul.mubr.msk.bf16.vlgmr.msra.gmra.mrb[48].mxu0 %vm2013_vm3, %v10731_v33 }
 0xcb0   :  { %10038 = vmatpush3.bf16.msra.mxu0 %v3146_v35  ;;  %10039 = vmatprep.mubr.msk.bf16.mxu0 %vm2013_vm3, %v10732_v34 }
 0xcb1   :  { %10453 = vmatprep.subr.msk.bf16.mxu0 %vm2017_vm2, %v3197_v36 }
 0xcbb   :  { %10040 = vmatmul.mubr.msk.bf16.vlgmr.msra.gmra.mrb[48].mxu0 %vm2013_vm3, %v10733_v42  ;;  %v10762_v42 = vld [vmem:[#allocation9 + $0x40] sm:$0xff]  }
 0xcbc   :  { %10044 = vmatpush3.bf16.msra.mxu0 %v3220_v44  ;;  %10045 = vmatprep.mubr.msk.bf16.mxu0 %vm2013_vm3, %v10734_v43  ;;  %v12782_v43 = vsel %vm2017_vm2, %v12701_v63, 0 }
 0xcbd   :  { %10454 = vmatprep.subr.msk.bf16.mxu0 %vm2017_vm2, %v3275_v45 }
 0xcc7   :  { %10046 = vmatmul.mubr.msk.bf16.vlgmr.msra.gmra.mrb[48].mxu0 %vm2013_vm3, %v10735_v46 }
 0xcc8   :  { %10050 = vmatpush3.bf16.msra.mxu0 %v3298_v49  ;;  %10051 = vmatprep.mubr.msk.bf16.mxu0 %vm2013_vm3, %v10736_v47 }
 0xcc9   :  { %10071 = vmatprep.subr.bf16.mxu0 %v10743_v51 }
 0xcd3   :  { %10052 = vmatmul.mubr.msk.bf16.vlgmr.msra.gmra.mrb[48].mxu0 %vm2013_vm3, %v10737_v50 }
 0xcd4   :  { %10072 = vmatpush3.bf16.msra.mxu0 %v10743_v51  ;;  %v10763_v51 = vld [vmem:[#allocation9 + $0x80] sm:$0xff]  }
 0xcd5   :  { %10073 = vmatprep.subr.bf16.mxu0 %v10746_v52 }
 0xcd8   :  { %10074 = vmatpush3.bf16.msra.mxu0 %v10746_v52  ;;  %v10764_v52 = vld [vmem:[#allocation9] sm:$0xff]  }
 0xcd9   :  { %10075 = vmatprep.subr.bf16.mxu0 %v10749_v54 }
 0xcdc   :  { %10076 = vmatpush3.bf16.msra.mxu0 %v10749_v54  ;;  %v10765_v54 = vld [vmem:[#allocation9 + $0x48] sm:$0xff]  }
 0xcdd   :  { %10077 = vmatprep.subr.bf16.mxu0 %v10752_v55 }
 0xce0   :  { %10078 = vmatpush3.bf16.msra.mxu0 %v10752_v55  ;;  %v10766_v55 = vld [vmem:[#allocation9 + $0x88] sm:$0xff]  }
 0xce1   :  { %10079 = vmatprep.subr.bf16.mxu0 %v10755_v56 }
 0xce4   :  { %10080 = vmatpush3.bf16.msra.mxu0 %v10755_v56  ;;  %v10767_v56 = vld [vmem:[#allocation9 + $0x8] sm:$0xff]  }
 0xce5   :  { %10081 = vmatprep.subr.bf16.mxu0 %v10758_v28 }
 0xce8   :  { %10082 = vmatpush3.bf16.msra.mxu0 %v10758_v28 }
 0xce9   :  { %10083 = vmatprep.subr.bf16.mxu0 %v10760_v30 }
 0xcec   :  { %10084 = vmatpush3.bf16.msra.mxu0 %v10760_v30 }
 0xced   :  { %10085 = vmatprep.subr.bf16.mxu0 %v10761_v31 }
 0xcf0   :  { %10086 = vmatpush3.bf16.msra.mxu0 %v10761_v31 }
 0xcf1   :  { %10097 = vmatprep.subr.bf16.mxu0 %v12026_v53 }
 0xda6   :  { %v10053_v57 = vpop.f32.mrb[48].mxu0 }
 0xda7   :  { %v3334_v58 = vpop.f32.mrb[49].mxu0  ;;  %v3355_v60 = vadd.f32 %v10053_v57, %v1481_v18  ;;  %v10741_v18 = vld [vmem:[#allocation6 + $0x8] sm:$0xff]   ;;  %v10768_v57 = vld [vmem:[#allocation9 + $0x50] sm:$0xff]  }
 0xda8   :  { %v10054_v59 = vpop.f32.mrb[50].mxu0  ;;  %v3353_v0 = vadd.f32 %v3334_v58, %v1479_v13  ;;  %v10739_v13 = vld [vmem:[#allocation6] sm:$0xff]   ;;  %v10769_v58 = vld [vmem:[#allocation9 + $0x90] sm:$0xff]  }
 0xda9   :  { %v3356_v61 = vadd.f32 %v10054_v59, %v1482_v19  ;;  %v3337_v62 = vpop.f32.mrb[51].mxu0  ;;  %v10742_v19 = vld [vmem:[#allocation6 + $0x50] sm:$0xff]  }
 0xdaa   :  { %v3354_v1 = vadd.f32 %v3337_v62, %v1480_v15  ;;  %v10740_v15 = vld [vmem:[#allocation6 + $0x48] sm:$0xff]   ;;  %v10770_v59 = vld [vmem:[#allocation9 + $0x10] sm:$0xff]  }
 0xdab   :  { %v12762_v2 = vpack.c.bf16 %v3356_v61, %v3355_v60  ;;  %v10773_v60 = vld [vmem:[#allocation9 + $0x18] sm:$0xff]   ;;  %v10774_v61 = vld [vmem:[#allocation9 + $0x60] sm:$0xff]  }
 0xdac   :  { %v12764_v4 = vpack.c.bf16 %v3354_v1, %v3353_v0  ;;  %v10775_v62 = vld [vmem:[#allocation9 + $0xa0] sm:$0xff]   ;;  %v10777_v1 = vld [vmem:[#allocation9 + $0x68] sm:$0xff]  }
 0xdad   :  { %v10776_v0 = vld [vmem:[#allocation9 + $0x20] sm:$0xff]  }
 0xdae   :  { %10055 = vmatprep.subr.bf16.mxu1 %v12764_v4 }
 0xdaf   :  { %10056 = vmatpush3.bf16.msra.mxu1 %v12764_v4 }
 0xdb0   :  { %10057 = vmatprep.subr.bf16.mxu1 %v12762_v2 }
 0xdb3   :  { %10058 = vmatpush3.bf16.msra.mxu1 %v12762_v2 }
 0xdb4   :  { %10063 = vmatprep.subr.bf16.mxu1 %v12764_v4 }
 0xdb6   :  { %10060 = vmatmul.mubr.msk.bf16.vlgmr.msra.gmra.mrb[56].mxu1 %vm648_vm0, %v11087_v12  ;;  %v10780_v12 = vld [vmem:[#allocation9 + $0x70] sm:$0xff]  }
 0xdb7   :  { %10064 = vmatpush3.bf16.msra.mxu1 %v12764_v4  ;;  %10067 = vmatprep.mubr.msk.bf16.mxu1 %vm648_vm0, %v11088_v3  ;;  %v10781_v3 = vld [vmem:[#allocation9 + $0xb0] sm:$0xff]  }
 0xdb8   :  { %10065 = vmatprep.subr.bf16.mxu1 %v12762_v2 }
 0xdbb   :  { %10066 = vmatpush3.bf16.msra.mxu1 %v12762_v2 }
 0xdbc   :  { %9423 = vmatprep.subr.bf16.mxu1 %v10738_v11  ;;  %v10782_v11 = vld [vmem:[#allocation9 + $0x30] sm:$0xff]  }
 0xdbe   :  { %10068 = vmatmul.mubr.msk.bf16.vlgmr.msra.gmra.mrb[60].mxu1 %vm648_vm0, %v11089_v16  ;;  %v10785_v16 = vld [vmem:[#allocation9 + $0x38] sm:$0xff]  }
 0xdbf   :  { %9424 = vmatpush3.bf16.msra.mxu1 %v10739_v13  ;;  %v10783_v13 = vld [vmem:[#allocation9 + $0x78] sm:$0xff]  }
 0xdc0   :  { %9425 = vmatprep.subr.bf16.mxu1 %v10740_v15  ;;  %v10784_v15 = vld [vmem:[#allocation9 + $0xb8] sm:$0xff]  }
 0xdc3   :  { %9426 = vmatpush3.bf16.msra.mxu1 %v10741_v18 }
 0xdc4   :  { %9427 = vmatprep.subr.bf16.mxu1 %v10742_v19 }
 0xdc7   :  { %9428 = vmatpush3.bf16.msra.mxu1 %v10744_v7 }
 0xdc8   :  { %9429 = vmatprep.subr.bf16.mxu1 %v10745_v14 }
 0xdcb   :  { %9430 = vmatpush3.bf16.msra.mxu1 %v10747_v17 }
 0xdcc   :  { %9431 = vmatprep.subr.bf16.mxu1 %v10748_v20 }
 0xdcf   :  { %9432 = vmatpush3.bf16.msra.mxu1 %v10750_v21  ;;  %v8813_v21 = vld [vmem:[%s13257_s15] ss:$0 sm:$0xff] }
 0xdd0   :  { %9433 = vmatprep.subr.bf16.mxu1 %v10751_v22 }
 0xdd3   :  { %9434 = vmatpush3.bf16.msra.mxu1 %v10753_v24 }
 0xdd4   :  { %9435 = vmatprep.subr.bf16.mxu1 %v10754_v25 }
 0xdd7   :  { %9436 = vmatpush3.bf16.msra.mxu1 %v10756_v26 }
 0xdd8   :  { %9437 = vmatprep.subr.bf16.mxu1 %v10757_v27 }
 0xddb   :  { %9438 = vmatpush3.bf16.msra.mxu1 %v10759_v29 }
 0xddc   :  { %10091 = vmatprep.subr.bf16.mxu1 %v12026_v53 }
 0xe89   :  { %v10061_v32 = vpop.f32.mrb[56].mxu1 }
 0xe8a   :  { %v3393_v33 = vpop.f32.mrb[57].mxu1 }
 0xe8b   :  { %v10062_v34 = vpop.f32.mrb[58].mxu1 }
 0xe8c   :  { %v3409_v35 = vpack.c.bf16 %v10062_v34, %v10061_v32  ;;  %v3396_v36 = vpop.f32.mrb[59].mxu1 }
 0xe8d   :  { %v3408_v41 = vpack.c.bf16 %v3396_v36, %v3393_v33 }
 0xe8f   :  { %3692 = vmatprep.mubr.bf16.mxu1 %v3408_v41 }
 0xe90   :  { %3693 = vmatmul.mubr.bf16.vlgmr.msra.gmra.mrb[64].mxu1 %v12764_v4  ;;  %v10779_v4 = vld [vmem:[#allocation9 + $0x28] sm:$0xff]  }
 0xe91   :  { %10092 = vmatpush3.bf16.msra.mxu1 %v12782_v43  ;;  %v10069_v44 = vpop.f32.mrb[60].mxu1  ;;  %3700 = vmatprep.mubr.bf16.mxu1 %v3409_v35 }
 0xe92   :  { %v3444_v45 = vpop.f32.mrb[61].mxu1  ;;  %9465 = vmatprep.subr.bf16.mxu1 %v10762_v42 }
 0xe93   :  { %v10070_v46 = vpop.f32.mrb[62].mxu1 }
 0xe94   :  { %v3460_v47 = vpack.c.bf16 %v10070_v46, %v10069_v44  ;;  %v3447_v49 = vpop.f32.mrb[63].mxu1 }
 0xe95   :  { %v3459_v50 = vpack.c.bf16 %v3447_v49, %v3444_v45 }
 0xe97   :  { %10087 = vmatprep.mubr.bf16.mxu0 %v3459_v50 }
 0xe98   :  { %3701 = vmatmul.mubr.bf16.gmra.mrb[68].mxu1 %v12762_v2  ;;  %10088 = vmatmul.mubr.bf16.vlgmr.msra.gmra.mrb[52].mxu0 %v3460_v47  ;;  %v10778_v2 = vld [vmem:[#allocation9 + $0xa8] sm:$0xff]  }
 0xe99   :  { %10098 = vmatpush3.bf16.msra.mxu0 %v12782_v43  ;;  %10093 = vmatprep.mubr.msk.bf16.mxu1 %vm12027_vm1, %v12026_v53 }
 0xe9a   :  { %10099 = vmatprep.mubr.msk.bf16.mxu0 %vm12027_vm1, %v12026_v53  ;;  %10103 = vmatprep.subr.bf16.mxu0 %v12026_v53 }
 0xea0   :  { %10094 = vmatmul.mubr.msk.bf16.vlgmr.msra.gmra.mrb[72].mxu1 %vm2013_vm3, %v12654_v38  ;;  %10100 = vmatmul.mubr.msk.bf16.vlgmr.msra.gmra.mrb[56].mxu0 %vm2013_vm3, %v12657_v39  ;;  %v10771_v38 = vld [vmem:[#allocation9 + $0x58] sm:$0xff]  }
 0xea1   :  { %10104 = vmatpush3.bf16.msra.mxu0 %v10763_v51  ;;  %9466 = vmatpush3.bf16.msra.mxu1 %v10764_v52  ;;  %v10772_v39 = vld [vmem:[#allocation9 + $0x98] sm:$0xff]  }
 0xea2   :  { %10105 = vmatprep.subr.bf16.mxu0 %v12026_v53  ;;  %9467 = vmatprep.subr.bf16.mxu1 %v10765_v54 }
 0xea3   :  { %10119 = vmatprep.mubr.msk.bf16.mxu0 %vm12027_vm1, %v12026_v53 }
 0xea5   :  { %10106 = vmatpush3.bf16.msra.mxu0 %v10766_v55  ;;  %9468 = vmatpush3.bf16.msra.mxu1 %v10767_v56 }
 0xea6   :  { %10107 = vmatprep.subr.bf16.mxu0 %v12026_v53  ;;  %9469 = vmatprep.subr.bf16.mxu1 %v10768_v57 }
 0xea9   :  { %10108 = vmatpush3.bf16.msra.mxu0 %v10769_v58  ;;  %9470 = vmatpush3.bf16.msra.mxu1 %v10770_v59  ;;  %v8866_v58 = vld [vmem:[%s13258_s27 + $0x1] sm:$0x1]  ;;  %v4127_v59 = vld [vmem:[%s13258_s27] sm:$0x1] }
 0xeaa   :  { %10109 = vmatprep.subr.bf16.mxu0 %v12026_v53  ;;  %9471 = vmatprep.subr.bf16.mxu1 %v10771_v38  ;;  %v10786_v38 = vld [vmem:[#allocation13 + $0x40] sm:$0xff]  }
 0xead   :  { %10110 = vmatpush3.bf16.msra.mxu0 %v10772_v39  ;;  %9472 = vmatpush3.bf16.msra.mxu1 %v10773_v60  ;;  %v8870_v39 = vld [vmem:[%s13258_s27 + $0x3] sm:$0x1]  ;;  %v10792_v60 = vld [vmem:[#allocation13 + $0x80] sm:$0xff]  }
 0xeae   :  { %10111 = vmatprep.subr.bf16.mxu0 %v12026_v53  ;;  %9473 = vmatprep.subr.bf16.mxu1 %v10774_v61  ;;  %v8868_v61 = vld [vmem:[%s13258_s27 + $0x2] sm:$0x1] }
 0xeb1   :  { %10112 = vmatpush3.bf16.msra.mxu0 %v10775_v62  ;;  %9474 = vmatpush3.bf16.msra.mxu1 %v10776_v0  ;;  %v10787_v62 = vld [vmem:[#allocation13] sm:$0xff]   ;;  %v10794_v0 = vld [vmem:[#allocation13 + $0xc8] sm:$0xff]  }
 0xeb2   :  { %10113 = vmatprep.subr.bf16.mxu0 %v12026_v53  ;;  %9475 = vmatprep.subr.bf16.mxu1 %v10777_v1  ;;  %v10788_v1 = vld [vmem:[#allocation13 + $0x48] sm:$0xff]  }
 0xeb5   :  { %10114 = vmatpush3.bf16.msra.mxu0 %v10778_v2  ;;  %9476 = vmatpush3.bf16.msra.mxu1 %v10779_v4  ;;  %v10789_v2 = vld [vmem:[#allocation13 + $0x8] sm:$0xff]   ;;  %v10798_v4 = vld [vmem:[#allocation13 + $0xd0] sm:$0xff]  }
 0xeb6   :  { %10115 = vmatprep.subr.bf16.mxu0 %v12026_v53  ;;  %9477 = vmatprep.subr.bf16.mxu1 %v10780_v12  ;;  %v10791_v12 = vld [vmem:[#allocation13 + $0x50] sm:$0xff]  }
 0xeb9   :  { %10116 = vmatpush3.bf16.msra.mxu0 %v10781_v3  ;;  %9478 = vmatpush3.bf16.msra.mxu1 %v10782_v11  ;;  %v10800_v3 = vld [vmem:[#allocation13 + $0x90] sm:$0xff]  }
 0xeba   :  { %10117 = vmatprep.subr.bf16.mxu0 %v12026_v53  ;;  %9479 = vmatprep.subr.bf16.mxu1 %v10783_v13  ;;  %v10793_v11 = vld [vmem:[#allocation13 + $0x10] sm:$0xff]   ;;  %v10802_v13 = vld [vmem:[#allocation13 + $0xd8] sm:$0xff]  }
 0xebd   :  { %10118 = vmatpush3.bf16.msra.mxu0 %v10784_v15  ;;  %9480 = vmatpush3.bf16.msra.mxu1 %v10785_v16  ;;  %v10795_v15 = vld [vmem:[#allocation13 + $0x58] sm:$0xff]  }
 0xebe   :  { %10129 = vmatprep.subr.bf16.mxu0 %v12026_v53  ;;  %10123 = vmatprep.subr.bf16.mxu1 %v12026_v53  ;;  %v10797_v16 = vld [vmem:[#allocation13 + $0x18] sm:$0xff]  }
 0xf63   :  { %v9439_v18 = vpop.f32.mrb[64].mxu1 }
 0xf64   :  { %v9440_v19 = vpop.f32.mrb[65].mxu1 }
 0xf65   :  { %v9441_v7 = vadd.f32 %v9440_v19, %v9439_v18  ;;  %v9442_v14 = vpop.f32.mrb[66].mxu1  ;;  %v10799_v18 = vld [vmem:[#allocation13 + $0x60] sm:$0xff]  }
 0xf66   :  { %v9443_v17 = vpop.f32.mrb[67].mxu1  ;;  %v10801_v19 = vld [vmem:[#allocation13 + $0x20] sm:$0xff]  }
 0xf67   :  { %v9444_v20 = vadd.f32 %v9443_v17, %v9442_v14  ;;  %v3695_v25 = vadd.f32 %v9441_v7, %v8813_v21  ;;  %v10803_v7 = vld [vmem:[#allocation13 + $0x68] sm:$0xff]   ;;  %v10804_v14 = vld [vmem:[#allocation13 + $0x98] sm:$0xff]  }
 0xf68   :  { %v10805_v17 = vld [vmem:[#allocation13 + $0x28] sm:$0xff]  }
 0xf69   :  { %v3698_v32 = vadd.f32 %v9444_v20, %v8813_v21  ;;  %v10806_v20 = vld [vmem:[#allocation13 + $0xe0] sm:$0xff]  }
 0xf6b   :  { %v9445_v22 = vpop.f32.mrb[68].mxu1  ;;  %v10089_v24 = vpop.f32.mrb[52].mxu0 }
 0xf6c   :  { %v9446_v26 = vpop.f32.mrb[69].mxu1  ;;  %v3743_v27 = vpop.f32.mrb[53].mxu0 }
 0xf6d   :  { %v9447_v28 = vadd.f32 %v9446_v26, %v9445_v22  ;;  %v12808_v29 = vadd.f32 %v3743_v27, %v3695_v25  ;;  %v9448_v30 = vpop.f32.mrb[70].mxu1  ;;  %v10090_v31 = vpop.f32.mrb[54].mxu0  ;;  %v10808_v22 = vld [vmem:[#allocation13 + $0xa0] sm:$0xff]   ;;  %v10810_v25 = vld [vmem:[#allocation13 + $0xe8] sm:$0xff]   ;;  %v10811_v26 = vld [vmem:[#allocation13 + $0x78] sm:$0xff]  }
 0xf6e   :  { %v9449_v33 = vpop.f32.mrb[71].mxu1  ;;  %v3746_v34 = vpop.f32.mrb[55].mxu0  ;;  %v10812_v27 = vld [vmem:[#allocation13 + $0xa8] sm:$0xff]  }
 0xf6f   :  { %v3703_v35 = vadd.f32 %v9447_v28, %v8813_v21  ;;  %v9450_v36 = vadd.f32 %v9449_v33, %v9448_v30  ;;  %v12810_v41 = vadd.f32 %v3746_v34, %v3698_v32  ;;  %v10813_v28 = vld [vmem:[#allocation13 + $0x38] sm:$0xff]   ;;  %v10814_v30 = vld [vmem:[#allocation13 + $0xf0] sm:$0xff]  }
 0xf70   :  { %v10816_v32 = vld [vmem:[#allocation13 + $0xf8] sm:$0xff]  }
 0xf71   :  { %v3706_v42 = vadd.f32 %v9450_v36, %v8813_v21  ;;  %v12812_v44 = vadd.f32 %v10089_v24, %v3703_v35  ;;  %v10807_v21 = vld [vmem:[#allocation13 + $0x70] sm:$0xff]   ;;  %v10817_v33 = vld [vmem:[#allocation13 + $0xb8] sm:$0xff]  }
 0xf72   :  { %v10809_v24 = vld [vmem:[#allocation13 + $0x30] sm:$0xff]  }
 0xf73   :  { %v3799_v45 = vpop.f32.mrb[72].mxu1  ;;  %v3840_v46 = vpop.f32.mrb[56].mxu0  ;;  %v12814_v47 = vadd.f32 %v10090_v31, %v3706_v42  ;;  %v10815_v31 = vld [vmem:[#allocation13 + $0xb0] sm:$0xff]   ;;  %v8840_v42 = vld [vmem:[#allocation7] ss:$0 sm:$0xff] }
 0xf74   :  { %v3805_v49 = vpack.c.bf16 %v3799_v45, %v3799_v45  ;;  %v3846_v50 = vpack.c.bf16 %v3840_v46, %v3840_v46  ;;  %v10095_v51 = vpop.f32.mrb[73].mxu1  ;;  %v10101_v52 = vpop.f32.mrb[57].mxu0 }
 0xf75   :  { %v3802_v54 = vpop.f32.mrb[74].mxu1  ;;  %v3843_v55 = vpop.f32.mrb[58].mxu0 }
 0xf76   :  { %4078 = vmatprep.mubr.bf16.mxu1 %v3805_v49  ;;  %10120 = vmatmul.mubr.bf16.vlgmr.msra.gmra.mrb[60].mxu0 %v3846_v50  ;;  %v10096_v56 = vpop.f32.mrb[75].mxu1  ;;  %v10102_v57 = vpop.f32.mrb[59].mxu0 }
 0xf77   :  { %10130 = vmatpush3.bf16.msra.mxu0 %v12782_v43  ;;  %4079 = vmatmul.mubr.bf16.vlgmr.msra.gmra.mrb[76].mxu1 %v12701_v63  ;;  %v10790_v63 = vld [vmem:[#allocation13 + $0xc0] sm:$0xff]  }
 0xf78   :  { %10124 = vmatpush3.bf16.msra.mxu1 %v12782_v43  ;;  %10131 = vmatprep.mubr.msk.bf16.mxu0 %vm12027_vm1, %v12026_v53 }
 0xf79   :  { %10141 = vmatprep.subr.bf16.mxu0 %v12026_v53  ;;  %10125 = vmatprep.mubr.msk.bf16.mxu1 %vm12027_vm1, %v12026_v53 }
 0xf7a   :  { %10135 = vmatprep.subr.bf16.mxu1 %v12026_v53 }
 0xf7e   :  { %10132 = vmatmul.mubr.msk.bf16.vlgmr.msra.gmra.mrb[64].mxu0 %vm2013_vm3, %v8866_v58 }
 0xf7f   :  { %10142 = vmatpush3.bf16.msra.mxu0 %v12782_v43  ;;  %10126 = vmatmul.mubr.msk.bf16.vlgmr.msra.gmra.mrb[80].mxu1 %vm2013_vm3, %v4127_v59 }
 0xf80   :  { %10136 = vmatpush3.bf16.msra.mxu1 %v12782_v43  ;;  %10143 = vmatprep.mubr.msk.bf16.mxu0 %vm12027_vm1, %v12026_v53  ;;  %v10796_v43 = vld [vmem:[#allocation13 + $0x88] sm:$0xff]  }
 0xf81   :  { %10137 = vmatprep.mubr.msk.bf16.mxu1 %vm12027_vm1, %v12026_v53  ;;  %9504 = vmatprep.subr.bf16.mxu1 %v10786_v38  ;;  %v10818_v38 = vld [vmem:[#allocation2] sm:$0xff]  }
 0xf82   :  { %9526 = vmatprep.subr.bf16.mxu0 %v10790_v63 }
 0xf86   :  { %10144 = vmatmul.mubr.msk.bf16.vlgmr.msra.gmra.mrb[68].mxu0 %vm2013_vm3, %v8870_v39 }
 0xf87   :  { %10138 = vmatmul.mubr.msk.bf16.vlgmr.msra.gmra.mrb[84].mxu1 %vm2013_vm3, %v8868_v61  ;;  %9527 = vmatpush3.bf16.msra.mxu0 %v10792_v60 }
 0xf88   :  { %9505 = vmatpush3.bf16.msra.mxu1 %v10787_v62  ;;  %9528 = vmatprep.subr.bf16.mxu0 %v10794_v0 }
 0xf89   :  { %9506 = vmatprep.subr.bf16.mxu1 %v10788_v1  ;;  %v10819_v1 = vld [vmem:[#allocation2 + $0x8] sm:$0xff]  }
 0xf8b   :  { %9529 = vmatpush3.bf16.msra.mxu0 %v10796_v43 }
 0xf8c   :  { %9507 = vmatpush3.bf16.msra.mxu1 %v10789_v2  ;;  %9530 = vmatprep.subr.bf16.mxu0 %v10798_v4 }
 0xf8d   :  { %9508 = vmatprep.subr.bf16.mxu1 %v10791_v12 }
 0xf8f   :  { %9531 = vmatpush3.bf16.msra.mxu0 %v10800_v3  ;;  %v10820_v3 = vld [vmem:[#allocation2 + $0x10] sm:$0xff]  }
 0xf90   :  { %9509 = vmatpush3.bf16.msra.mxu1 %v10793_v11  ;;  %9532 = vmatprep.subr.bf16.mxu0 %v10802_v13 }
 0xf91   :  { %9510 = vmatprep.subr.bf16.mxu1 %v10795_v15 }
 0xf93   :  { %9533 = vmatpush3.bf16.msra.mxu0 %v10804_v14  ;;  %v10822_v14 = vld [vmem:[#allocation2 + $0x20] sm:$0xff]  }
 0xf94   :  { %9511 = vmatpush3.bf16.msra.mxu1 %v10797_v16  ;;  %9534 = vmatprep.subr.bf16.mxu0 %v10806_v20  ;;  %v10824_v20 = vld [vmem:[#allocation2 + $0x30] sm:$0xff]  }
 0xf95   :  { %9512 = vmatprep.subr.bf16.mxu1 %v10799_v18 }
 0xf97   :  { %9535 = vmatpush3.bf16.msra.mxu0 %v10808_v22  ;;  %v10826_v22 = vld [vmem:[#allocation4] sm:$0xff]  }
 0xf98   :  { %9513 = vmatpush3.bf16.msra.mxu1 %v10801_v19  ;;  %9536 = vmatprep.subr.bf16.mxu0 %v10810_v25  ;;  %v10828_v25 = vld [vmem:[#allocation4 + $0x10] sm:$0xff]  }
 0xf99   :  { %9514 = vmatprep.subr.bf16.mxu1 %v10803_v7  ;;  %v10821_v7 = vld [vmem:[#allocation2 + $0x18] sm:$0xff]  }
 0xf9b   :  { %9537 = vmatpush3.bf16.msra.mxu0 %v10812_v27  ;;  %v10830_v27 = vld [vmem:[#allocation4 + $0x20] sm:$0xff]  }
 0xf9c   :  { %9515 = vmatpush3.bf16.msra.mxu1 %v10805_v17  ;;  %9538 = vmatprep.subr.bf16.mxu0 %v10814_v30  ;;  %v10823_v17 = vld [vmem:[#allocation2 + $0x28] sm:$0xff]  }
 0xf9d   :  { %9516 = vmatprep.subr.bf16.mxu1 %v10807_v21  ;;  %v10825_v21 = vld [vmem:[#allocation2 + $0x38] sm:$0xff]  }
 0xf9f   :  { %9539 = vmatpush3.bf16.msra.mxu0 %v10815_v31 }
 0xfa0   :  { %9517 = vmatpush3.bf16.msra.mxu1 %v10809_v24  ;;  %9540 = vmatprep.subr.bf16.mxu0 %v10816_v32  ;;  %v10827_v24 = vld [vmem:[#allocation4 + $0x8] sm:$0xff]  }
 0xfa1   :  { %9518 = vmatprep.subr.bf16.mxu1 %v10811_v26  ;;  %v10829_v26 = vld [vmem:[#allocation4 + $0x18] sm:$0xff]  }
 0xfa3   :  { %9541 = vmatpush3.bf16.msra.mxu0 %v10817_v33 }
 0xfa4   :  { %9519 = vmatpush3.bf16.msra.mxu1 %v10813_v28  ;;  %10167 = vmatprep.subr.bf16.mxu0 %v12026_v53  ;;  %v10831_v28 = vld [vmem:[#allocation4 + $0x28] sm:$0xff]  }
 0xfa5   :  { %10147 = vmatprep.subr.bf16.mxu1 %v12026_v53 }
0x1049   :  { %v4120_v34 = vpop.f32.mrb[60].mxu0 }
0x104a   :  { %v9481_v35 = vpop.f32.mrb[76].mxu1  ;;  %v10121_v36 = vpop.f32.mrb[61].mxu0 }
0x104b   :  { %v9482_v45 = vpop.f32.mrb[77].mxu1  ;;  %v4123_v46 = vpop.f32.mrb[62].mxu0 }
0x104c   :  { %v9483_v49 = vadd.f32 %v9482_v45, %v9481_v35  ;;  %v9484_v50 = vpop.f32.mrb[78].mxu1  ;;  %v10122_v51 = vpop.f32.mrb[63].mxu0  ;;  %v8872_v35 = vld [vmem:[#allocation12] ss:$0 sm:$0xff] }
0x104d   :  { %v9485_v52 = vpop.f32.mrb[79].mxu1 }
0x104e   :  { %v4081_v54 = vadd.f32 %v9483_v49, %v8840_v42 }
0x1050   :  { %v12841_v55 = vadd.f32 %v4120_v34, %v4081_v54  ;;  %v10832_v54 = vld [vmem:[#allocation4 + $0x30] sm:$0xff]  }
0x1051   :  { %v4211_v56 = vpop.f32.mrb[64].mxu0 }
0x1052   :  { %v4217_v57 = vpack.c.bf16 %v4211_v56, %v4211_v56  ;;  %v4165_v58 = vpop.f32.mrb[80].mxu1  ;;  %v10133_v59 = vpop.f32.mrb[65].mxu0  ;;  %v10833_v56 = vld [vmem:[#allocation4 + $0x38] sm:$0xff]  }
0x1053   :  { %v4171_v63 = vpack.c.bf16 %v4165_v58, %v4165_v58  ;;  %v10127_v39 = vpop.f32.mrb[81].mxu1  ;;  %v4214_v60 = vpop.f32.mrb[66].mxu0  ;;  %v10836_v58 = vld [vmem:[#allocation51 + $0x4] ss:$16 sps:$4 sm:$0xff]   ;;  %v10839_v59 = vld [vmem:[#allocation51 + $0xc] ss:$16 sps:$4 sm:$0xff]  }
0x1054   :  { %v4168_v61 = vpop.f32.mrb[82].mxu1  ;;  %v10134_v62 = vpop.f32.mrb[67].mxu0  ;;  %4605 = vmatprep.mubr.bf16.mxu1 %v4217_v57  ;;  %v10834_v57 = vld [vmem:[#allocation51] ss:$16 sps:$4 sm:$0xff]   ;;  %v10848_v39 = vld [vmem:[#allocation51 + $0x44] ss:$16 sps:$4 sm:$0xff]  }
0x1055   :  { %v10128_v0 = vpop.f32.mrb[83].mxu1  ;;  %4606 = vmatmul.mubr.bf16.vlgmr.msra.gmra.mrb[88].mxu1 %v4171_v63  ;;  %v10840_v63 = vld [vmem:[#allocation51 + $0x20] ss:$16 sps:$4 sm:$0xff]   ;;  %v10854_v61 = vld [vmem:[#allocation51 + $0x64] ss:$16 sps:$4 sm:$0xff]  }
0x1056   :  { %10148 = vmatpush3.bf16.msra.mxu1 %v10818_v38  ;;  %10163 = vmatprep.mubr.msk.bf16.mxu1 %vm12027_vm1, %v12026_v53  ;;  %v10842_v38 = vld [vmem:[#allocation51 + $0x24] ss:$16 sps:$4 sm:$0xff]   ;;  %v10846_v60 = vld [vmem:[#allocation51 + $0x40] ss:$16 sps:$4 sm:$0xff]  }
0x1057   :  { %10149 = vmatprep.subr.bf16.mxu1 %v12026_v53  ;;  %v10852_v62 = vld [vmem:[#allocation51 + $0x60] ss:$16 sps:$4 sm:$0xff]   ;;  %v10860_v0 = vld [vmem:[#allocation51 + $0x84] ss:$16 sps:$4 sm:$0xff]  }
0x1059   :  { %v4303_v43 = vpop.f32.mrb[68].mxu0 }
0x105a   :  { %v4309_v2 = vpack.c.bf16 %v4303_v43, %v4303_v43  ;;  %v4257_v4 = vpop.f32.mrb[84].mxu1  ;;  %v10145_v12 = vpop.f32.mrb[69].mxu0  ;;  %10150 = vmatpush3.bf16.msra.mxu1 %v10819_v1  ;;  %v10858_v1 = vld [vmem:[#allocation51 + $0x80] ss:$16 sps:$4 sm:$0xff]   ;;  %v10866_v43 = vld [vmem:[#allocation51 + $0xa4] ss:$16 sps:$4 sm:$0xff]  }
0x105b   :  { %v4263_v11 = vpack.c.bf16 %v4257_v4, %v4257_v4  ;;  %v10139_v13 = vpop.f32.mrb[85].mxu1  ;;  %v4306_v15 = vpop.f32.mrb[70].mxu0  ;;  %10151 = vmatprep.subr.bf16.mxu1 %v12026_v53  ;;  %v10872_v4 = vld [vmem:[#allocation51 + $0xc4] ss:$16 sps:$4 sm:$0xff]   ;;  %v10870_v12 = vld [vmem:[#allocation51 + $0xc0] ss:$16 sps:$4 sm:$0xff]  }
0x105c   :  { %4645 = vmatprep.mubr.bf16.mxu0 %v4309_v2  ;;  %v4260_v16 = vpop.f32.mrb[86].mxu1  ;;  %v10146_v18 = vpop.f32.mrb[71].mxu0  ;;  %v10864_v2 = vld [vmem:[#allocation51 + $0xa0] ss:$16 sps:$4 sm:$0xff]  }
0x105d   :  { %4646 = vmatmul.mubr.bf16.vlgmr.msra.gmra.mrb[72].mxu0 %v4263_v11  ;;  %v10140_v19 = vpop.f32.mrb[87].mxu1 }
0x105e   :  { %10152 = vmatpush3.bf16.msra.mxu1 %v10820_v3  ;;  %10183 = vmatprep.mubr.msk.bf16.mxu0 %vm12027_vm1, %v12026_v53  ;;  %v8905_v3 = vld [vmem:[%s13259_s4] ss:$0 sm:$0xff] }
0x105f   :  { %10153 = vmatprep.subr.bf16.mxu1 %v12026_v53  ;;  %10168 = vmatpush3.bf16.msra.mxu0 %v10826_v22  ;;  %v10849_v22 = vld [vmem:[#allocation51 + $0x48] ss:$16 sps:$4 sm:$0xff]  }
0x1060   :  { %10169 = vmatprep.subr.bf16.mxu0 %v12026_v53 }
0x1062   :  { %10154 = vmatpush3.bf16.msra.mxu1 %v10821_v7  ;;  %v10837_v7 = vld [vmem:[#allocation51 + $0x8] ss:$16 sps:$4 sm:$0xff]  }
0x1063   :  { %10155 = vmatprep.subr.bf16.mxu1 %v12026_v53  ;;  %10170 = vmatpush3.bf16.msra.mxu0 %v10827_v24  ;;  %v10857_v24 = vld [vmem:[#allocation51 + $0x6c] ss:$16 sps:$4 sm:$0xff]  }
0x1064   :  { %10171 = vmatprep.subr.bf16.mxu0 %v12026_v53 }
0x1066   :  { %10156 = vmatpush3.bf16.msra.mxu1 %v10822_v14 }
0x1067   :  { %10157 = vmatprep.subr.bf16.mxu1 %v12026_v53  ;;  %10172 = vmatpush3.bf16.msra.mxu0 %v10828_v25  ;;  %v10855_v25 = vld [vmem:[#allocation51 + $0x68] ss:$16 sps:$4 sm:$0xff]  }
0x1068   :  { %10173 = vmatprep.subr.bf16.mxu0 %v12026_v53 }
0x106a   :  { %10158 = vmatpush3.bf16.msra.mxu1 %v10823_v17  ;;  %v10845_v17 = vld [vmem:[#allocation51 + $0x2c] ss:$16 sps:$4 sm:$0xff]  }
0x106b   :  { %10159 = vmatprep.subr.bf16.mxu1 %v12026_v53  ;;  %10174 = vmatpush3.bf16.msra.mxu0 %v10829_v26  ;;  %v10863_v26 = vld [vmem:[#allocation51 + $0x8c] ss:$16 sps:$4 sm:$0xff]  }
0x106c   :  { %10175 = vmatprep.subr.bf16.mxu0 %v12026_v53 }
0x106e   :  { %10160 = vmatpush3.bf16.msra.mxu1 %v10824_v20  ;;  %v10843_v20 = vld [vmem:[#allocation51 + $0x28] ss:$16 sps:$4 sm:$0xff]  }
0x106f   :  { %10161 = vmatprep.subr.bf16.mxu1 %v12026_v53  ;;  %10176 = vmatpush3.bf16.msra.mxu0 %v10830_v27  ;;  %v10861_v27 = vld [vmem:[#allocation51 + $0x88] ss:$16 sps:$4 sm:$0xff]  }
0x1070   :  { %10177 = vmatprep.subr.bf16.mxu0 %v12026_v53 }
0x1072   :  { %10162 = vmatpush3.bf16.msra.mxu1 %v10825_v21  ;;  %v10851_v21 = vld [vmem:[#allocation51 + $0x4c] ss:$16 sps:$4 sm:$0xff]  }
0x1073   :  { %10178 = vmatpush3.bf16.msra.mxu0 %v10831_v28  ;;  %5094 = vmatprep.subr.bf16.mxu1 %v10836_v58  ;;  %v10869_v28 = vld [vmem:[#allocation51 + $0xac] ss:$16 sps:$4 sm:$0xff]   ;;  %v11092_v58 = vld [vmem:[#allocation25 + $0x24] ss:$16 sps:$4 sm:$0xff]  }
0x1074   :  { %10179 = vmatprep.subr.bf16.mxu0 %v12026_v53 }
0x1077   :  { %10180 = vmatpush3.bf16.msra.mxu0 %v10832_v54 }
0x1078   :  { %10181 = vmatprep.subr.bf16.mxu0 %v12026_v53 }
0x107b   :  { %10182 = vmatpush3.bf16.msra.mxu0 %v10833_v56 }
0x107c   :  { %5135 = vmatprep.subr.bf16.mxu0 %v10839_v59  ;;  %v11093_v59 = vld [vmem:[#allocation25 + $0x20] ss:$16 sps:$4 sm:$0xff]  }
0x1128   :  { %v9520_v30 = vpop.f32.mrb[88].mxu1 }
0x1129   :  { %v9521_v31 = vpop.f32.mrb[89].mxu1 }
0x112a   :  { %v9522_v32 = vadd.f32 %v9521_v31, %v9520_v30  ;;  %v9523_v33 = vpop.f32.mrb[90].mxu1  ;;  %v10867_v30 = vld [vmem:[#allocation51 + $0xa8] ss:$16 sps:$4 sm:$0xff]   ;;  %v10875_v31 = vld [vmem:[#allocation51 + $0xcc] ss:$16 sps:$4 sm:$0xff]  }
0x112b   :  { %v9524_v34 = vpop.f32.mrb[91].mxu1  ;;  %v10878_v33 = vld [vmem:[#allocation51 + $0xe4] ss:$16 sps:$4 sm:$0xff]  }
0x112c   :  { %v4608_v45 = vadd.f32 %v9522_v32, %v8872_v35  ;;  %v10873_v32 = vld [vmem:[#allocation51 + $0xc8] ss:$16 sps:$4 sm:$0xff]   ;;  %v10881_v34 = vld [vmem:[#allocation51 + $0xec] ss:$16 sps:$4 sm:$0xff]   ;;  %v10876_v35 = vld [vmem:[#allocation51 + $0xe0] ss:$16 sps:$4 sm:$0xff]  }
0x1130   :  { %v9542_v36 = vpop.f32.mrb[72].mxu0 }
0x1131   :  { %v9543_v42 = vpop.f32.mrb[73].mxu0 }
0x1132   :  { %v9544_v46 = vadd.f32 %v9543_v42, %v9542_v36  ;;  %v9545_v49 = vpop.f32.mrb[74].mxu0  ;;  %v10879_v36 = vld [vmem:[#allocation51 + $0xe8] ss:$16 sps:$4 sm:$0xff]   ;;  %v11090_v42 = vld [vmem:[#allocation25 + $0x4] ss:$16 sps:$4 sm:$0xff]  }
0x1133   :  { %v9546_v50 = vpop.f32.mrb[75].mxu0 }
0x1134   :  { %v4648_v51 = vadd.f32 %v9544_v46, %v4608_v45  ;;  %v8914_v45 = vld [vmem:[%s13260_s20] ss:$0 sm:$0xff] }
0x1136   :  { %v4653_v52 = vpack.c.bf16 %v4648_v51, %v4648_v51 }
0x1138   :  { %10164 = vmatmul.mubr.bf16.vlgmr.msra.gmra.mrb[92].mxu1 %v4653_v52 }
0x1139   :  { %5126 = vmatprep.mubr.bf16.mxu1 %v12028_v48  ;;  %5095 = vmatpush1.bf16.msra.mxu1 %v10834_v57  ;;  %v11091_v57 = vld [vmem:[#allocation25] ss:$16 sps:$4 sm:$0xff]  }
0x113a   :  { %5096 = vmatprep.subr.bf16.mxu1 %v10842_v38  ;;  %v11094_v38 = vld [vmem:[#allocation25 + $0x44] ss:$16 sps:$4 sm:$0xff]  }
0x113d   :  { %5097 = vmatpush1.bf16.msra.mxu1 %v10840_v63  ;;  %v11095_v63 = vld [vmem:[#allocation25 + $0x40] ss:$16 sps:$4 sm:$0xff]  }
0x113e   :  { %5098 = vmatprep.subr.bf16.mxu1 %v10848_v39  ;;  %v11096_v39 = vld [vmem:[#allocation25 + $0x64] ss:$16 sps:$4 sm:$0xff]  }
0x1141   :  { %5099 = vmatpush1.bf16.msra.mxu1 %v10846_v60  ;;  %v11097_v60 = vld [vmem:[#allocation25 + $0x60] ss:$16 sps:$4 sm:$0xff]  }
0x1142   :  { %5100 = vmatprep.subr.bf16.mxu1 %v10854_v61  ;;  %v11098_v61 = vld [vmem:[#allocation25 + $0x84] ss:$16 sps:$4 sm:$0xff]  }
0x1145   :  { %5101 = vmatpush1.bf16.msra.mxu1 %v10852_v62  ;;  %v11099_v62 = vld [vmem:[#allocation25 + $0x80] ss:$16 sps:$4 sm:$0xff]  }
0x1146   :  { %5102 = vmatprep.subr.bf16.mxu1 %v10860_v0  ;;  %v11100_v0 = vld [vmem:[#allocation25 + $0xa4] ss:$16 sps:$4 sm:$0xff]  }
0x1149   :  { %5103 = vmatpush1.bf16.msra.mxu1 %v10858_v1  ;;  %v11101_v1 = vld [vmem:[#allocation25 + $0xa0] ss:$16 sps:$4 sm:$0xff]  }
0x114a   :  { %5104 = vmatprep.subr.bf16.mxu1 %v10866_v43  ;;  %v11102_v43 = vld [vmem:[#allocation25 + $0xc4] ss:$16 sps:$4 sm:$0xff]  }
0x114d   :  { %5105 = vmatpush1.bf16.msra.mxu1 %v10864_v2  ;;  %v11103_v2 = vld [vmem:[#allocation25 + $0xc0] ss:$16 sps:$4 sm:$0xff]  }
0x114e   :  { %5106 = vmatprep.subr.bf16.mxu1 %v10872_v4  ;;  %v11104_v4 = vld [vmem:[#allocation25 + $0xe4] ss:$16 sps:$4 sm:$0xff]  }
0x1151   :  { %5107 = vmatpush1.bf16.msra.mxu1 %v10870_v12  ;;  %v11105_v12 = vld [vmem:[#allocation25 + $0xe0] ss:$16 sps:$4 sm:$0xff]  }
0x1152   :  { %5108 = vmatprep.subr.bf16.mxu1 %v10878_v33  ;;  %v5177_v33 = vld [vmem:[%s13261_s3] sm:$0xf] }
0x1155   :  { %5109 = vmatpush1.bf16.msra.mxu1 %v10876_v35 }
0x1156   :  { %10187 = vmatprep.subr.bf16.mxu1 %v12026_v53 }
0x120b   :  { %v4759_v11 = vpop.f32.mrb[92].mxu1 }
0x120c   :  { %v4760_v13 = vadd.f32 %v8905_v3, %v4759_v11  ;;  %v10165_v15 = vpop.f32.mrb[93].mxu1  ;;  %v4912_v3 = vld [vmem:[#allocation49] sm:$0xf] }
0x120d   :  { %v4762_v16 = vpop.f32.mrb[94].mxu1  ;;  %v4917_v11 = vrot.slane %v4912_v3, %v12708_v5  ;;  %v4929_v35 = vrot.slane %v4912_v3, %v12732_v37 }
0x120e   :  { %v4765_v18 = vmax.f32 %v4760_v13, 0.0  ;;  %v10166_v19 = vpop.f32.mrb[95].mxu1  ;;  %v4921_v13 = vrot.slane %v4912_v3, %v12710_v6 }
0x1210   :  { %v4766_v14 = vpack.c.bf16 %v4765_v18, %v4765_v18 }
0x1212   :  { %10184 = vmatmul.mubr.bf16.vlgmr.msra.gmra.mrb[76].mxu0 %v4766_v14 }
0x1213   :  { %5136 = vmatpush1.bf16.msra.mxu0 %v10837_v7  ;;  %5167 = vmatprep.mubr.bf16.mxu0 %v12028_v48 }
0x1214   :  { %5137 = vmatprep.subr.bf16.mxu0 %v10845_v17 }
0x1217   :  { %5138 = vmatpush1.bf16.msra.mxu0 %v10843_v20 }
0x1218   :  { %5139 = vmatprep.subr.bf16.mxu0 %v10851_v21 }
0x121b   :  { %5140 = vmatpush1.bf16.msra.mxu0 %v10849_v22 }
0x121c   :  { %5141 = vmatprep.subr.bf16.mxu0 %v10857_v24 }
0x121f   :  { %5142 = vmatpush1.bf16.msra.mxu0 %v10855_v25 }
0x1220   :  { %5143 = vmatprep.subr.bf16.mxu0 %v10863_v26 }
0x1223   :  { %5144 = vmatpush1.bf16.msra.mxu0 %v10861_v27  ;;  %v8955_v27 = vld [vmem:[%s13261_s3 + $0x4] sm:$0xf] }
0x1224   :  { %5145 = vmatprep.subr.bf16.mxu0 %v10869_v28 }
0x1227   :  { %5146 = vmatpush1.bf16.msra.mxu0 %v10867_v30  ;;  %v4925_v30 = vrot.slane %v4912_v3, %v12715_v9  ;;  %v4126_v3 = vmax.f32 %v12841_v55, 0.0  ;;  %v12910_v55 = vld [vmem:[%s13256_s13 + $0x10] sm:$0xff]  }
0x1228   :  { %5147 = vmatprep.subr.bf16.mxu0 %v10875_v31 }
0x122b   :  { %5148 = vmatpush1.bf16.msra.mxu0 %v10873_v32 }
0x122c   :  { %5149 = vmatprep.subr.bf16.mxu0 %v10881_v34 }
0x122f   :  { %5150 = vmatpush1.bf16.msra.mxu0 %v10879_v36 }
0x1230   :  { %5376 = vmatprep.subr.bf16.mxu0 %v11090_v42 }
0x12e5   :  { %v4872_v46 = vpop.f32.mrb[76].mxu0 }
0x12e6   :  { %v4873_v49 = vadd.f32 %v8914_v45, %v4872_v46  ;;  %v10185_v50 = vpop.f32.mrb[77].mxu0  ;;  %v8958_v45 = vld [vmem:[%s13261_s3 + $0x8] sm:$0xf] }
0x12e7   :  { %v4875_v51 = vpop.f32.mrb[78].mxu0  ;;  %v8960_v50 = vld [vmem:[%s13261_s3 + $0xc] sm:$0xf] }
0x12e8   :  { %v4878_v52 = vmax.f32 %v4873_v49, 0.0  ;;  %v10186_v54 = vpop.f32.mrb[79].mxu0  ;;  %v11106_v49 = vld [vmem:[#allocation25 + $0xc] ss:$16 sps:$4 sm:$0xff]   ;;  %v11107_v51 = vld [vmem:[#allocation25 + $0x8] ss:$16 sps:$4 sm:$0xff]  }
0x12e9   :  { %v11109_v54 = vld [vmem:[#allocation25 + $0x28] ss:$16 sps:$4 sm:$0xff]  }
0x12ea   :  { %v4879_v56 = vpack.c.bf16 %v4878_v52, %v4878_v52  ;;  %v11108_v52 = vld [vmem:[#allocation25 + $0x2c] ss:$16 sps:$4 sm:$0xff]  }
0x12ec   :  { %5127 = vmatmul.mubr.bf16.vlgmr.msra.gmra.mrb[96].mxu1 %v4879_v56  ;;  %5168 = vmatmul.mubr.bf16.vlgmr.msra.gmra.mrb[80].mxu0 %v4879_v56  ;;  %v11110_v56 = vld [vmem:[#allocation25 + $0x4c] ss:$16 sps:$4 sm:$0xff]  }
0x12ed   :  { %10189 = vmatprep.mubr.msk.bf16.mxu1 %vm12027_vm1, %v12026_v53  ;;  %5377 = vmatpush1.bf16.msra.mxu0 %v11091_v57  ;;  %v11111_v57 = vld [vmem:[#allocation25 + $0x48] ss:$16 sps:$4 sm:$0xff]  }
0x12ee   :  { %5378 = vmatprep.subr.bf16.mxu0 %v11092_v58  ;;  %5408 = vmatprep.mubr.bf16.mxu0 %v12028_v48  ;;  %v11112_v58 = vld [vmem:[#allocation25 + $0x6c] ss:$16 sps:$4 sm:$0xff]  }
0x12f1   :  { %5379 = vmatpush1.bf16.msra.mxu0 %v11093_v59  ;;  %v11113_v59 = vld [vmem:[#allocation25 + $0x68] ss:$16 sps:$4 sm:$0xff]  }
0x12f2   :  { %5380 = vmatprep.subr.bf16.mxu0 %v11094_v38  ;;  %v11114_v38 = vld [vmem:[#allocation25 + $0x8c] ss:$16 sps:$4 sm:$0xff]  }
0x12f5   :  { %5381 = vmatpush1.bf16.msra.mxu0 %v11095_v63  ;;  %v11115_v63 = vld [vmem:[#allocation25 + $0x88] ss:$16 sps:$4 sm:$0xff]  }
0x12f6   :  { %5382 = vmatprep.subr.bf16.mxu0 %v11096_v39  ;;  %v11116_v39 = vld [vmem:[#allocation25 + $0xac] ss:$16 sps:$4 sm:$0xff]  }
0x12f9   :  { %5383 = vmatpush1.bf16.msra.mxu0 %v11097_v60  ;;  %v11117_v60 = vld [vmem:[#allocation25 + $0xa8] ss:$16 sps:$4 sm:$0xff]  }
0x12fa   :  { %5384 = vmatprep.subr.bf16.mxu0 %v11098_v61  ;;  %v11118_v61 = vld [vmem:[#allocation25 + $0xcc] ss:$16 sps:$4 sm:$0xff]  }
0x12fd   :  { %5385 = vmatpush1.bf16.msra.mxu0 %v11099_v62  ;;  %v11119_v62 = vld [vmem:[#allocation25 + $0xc8] ss:$16 sps:$4 sm:$0xff]  }
0x12fe   :  { %5386 = vmatprep.subr.bf16.mxu0 %v11100_v0  ;;  %v11120_v0 = vld [vmem:[#allocation25 + $0xec] ss:$16 sps:$4 sm:$0xff]  }
0x1301   :  { %5387 = vmatpush1.bf16.msra.mxu0 %v11101_v1  ;;  %v11121_v1 = vld [vmem:[#allocation25 + $0xe8] ss:$16 sps:$4 sm:$0xff]  }
0x1302   :  { %5388 = vmatprep.subr.bf16.mxu0 %v11102_v43 }
0x1305   :  { %5389 = vmatpush1.bf16.msra.mxu0 %v11103_v2 }
0x1306   :  { %5390 = vmatprep.subr.bf16.mxu0 %v11104_v4 }
0x1309   :  { %5391 = vmatpush1.bf16.msra.mxu0 %v11105_v12 }
0x13bf   :  { %v5128_v15 = vpop.f32.mrb[96].mxu1  ;;  %v5169_v16 = vpop.f32.mrb[80].mxu0 }
0x13c0   :  { %v5130_v18 = vpop.f32.mrb[97].mxu1  ;;  %v5171_v19 = vpop.f32.mrb[81].mxu0  ;;  %v5129_v7 = vadd.f32 %v5128_v15, %v4917_v11  ;;  %v5170_v31 = vadd.f32 %v5169_v16, %v4925_v30  ;;  %v12914_v15 = vpack.c.bf16 %v4126_v3, %v4126_v3  ;;  %v10882_v16 = vld [vmem:[%s13262_s14 + $0x40] sm:$0xff]   ;;  %v10894_v30 = vld [vmem:[%s13262_s14 + $0x70] sm:$0xff]  }
0x13c1   :  { %v5131_v14 = vadd.f32 %v5130_v18, %v4921_v13  ;;  %v5132_v17 = vpop.f32.mrb[98].mxu1  ;;  %v5173_v20 = vpop.f32.mrb[82].mxu0  ;;  %v5172_v36 = vadd.f32 %v5171_v19, %v4929_v35  ;;  %v12917_v18 = vld [vmem:[#allocation22] sm:$0xf] }
0x13c2   :  { %v5133_v21 = vpop.f32.mrb[99].mxu1  ;;  %v5174_v22 = vpop.f32.mrb[83].mxu0  ;;  %v5176_v25 = vpack.c.bf16 %v5129_v7, %v5129_v7  ;;  %v5275_v32 = vpack.c.bf16 %v5170_v31, %v5170_v31  ;;  %v12923_v19 = vsel %vm2017_vm2, %v12914_v15, 0  ;;  %v10883_v7 = vld [vmem:[%s13262_s14] sm:$0xff]   ;;  %v10885_v17 = vld [vmem:[%s13262_s14 + $0x8] sm:$0xff]   ;;  %v10886_v20 = vld [vmem:[%s13262_s14 + $0x50] sm:$0xff]  }
0x13c3   :  { %v5178_v24 = vpack.c.bf16 %v5131_v14, %v5131_v14  ;;  %v5325_v42 = vpack.c.bf16 %v5172_v36, %v5172_v36  ;;  %v10884_v14 = vld [vmem:[%s13262_s14 + $0x48] sm:$0xff]   ;;  %v10887_v21 = vld [vmem:[%s13262_s14 + $0x10] sm:$0xff]   ;;  %v10888_v22 = vld [vmem:[%s13262_s14 + $0x58] sm:$0xff]  }
0x13c4   :  { %v5233_v28 = vsel %vm5185_vm4, %v5176_v25, 0  ;;  %v5282_v34 = vsel %vm5185_vm4, %v5275_v32, 0  ;;  %v10890_v25 = vld [vmem:[%s13262_s14 + $0x60] sm:$0xff]   ;;  %v10895_v31 = vld [vmem:[%s13262_s14 + $0x30] sm:$0xff]   ;;  %v10896_v32 = vld [vmem:[%s13262_s14 + $0x78] sm:$0xff]  }
0x13c5   :  { %v5187_v26 = vsel %vm5185_vm4, %v5178_v24, 0  ;;  %v5332_v46 = vsel %vm5185_vm4, %v5325_v42, 0  ;;  %v10889_v24 = vld [vmem:[%s13262_s14 + $0x18] sm:$0xff]  }
0x13c6   :  { %10188 = vmatpush3.bf16.msra.mxu1 %v5187_v26  ;;  %v10891_v26 = vld [vmem:[%s13262_s14 + $0x20] sm:$0xff]  }
0x13c7   :  { %10193 = vmatprep.subr.bf16.mxu1 %v12026_v53 }
0x13c9   :  { %10190 = vmatmul.mubr.msk.bf16.vlgmr.msra.gmra.mrb[100].mxu1 %vm5181_vm5, %v8955_v27  ;;  %v10892_v27 = vld [vmem:[%s13262_s14 + $0x68] sm:$0xff]  }
0x13ca   :  { %10194 = vmatpush3.bf16.msra.mxu1 %v5233_v28  ;;  %10195 = vmatprep.mubr.msk.bf16.mxu1 %vm12027_vm1, %v12026_v53  ;;  %v10893_v28 = vld [vmem:[%s13262_s14 + $0x28] sm:$0xff]  }
0x13cb   :  { %10199 = vmatprep.subr.bf16.mxu1 %v12026_v53 }
0x13d5   :  { %10196 = vmatmul.mubr.msk.bf16.vlgmr.msra.gmra.mrb[100].mxu1 %vm5181_vm5, %v5177_v33  ;;  %v10897_v33 = vld [vmem:[%s13262_s14 + $0x38] sm:$0xff]  }
0x13d6   :  { %10200 = vmatpush3.bf16.msra.mxu1 %v5282_v34  ;;  %10201 = vmatprep.mubr.msk.bf16.mxu1 %vm12027_vm1, %v12026_v53 }
0x13d7   :  { %10205 = vmatprep.subr.bf16.mxu1 %v12026_v53 }
0x13e1   :  { %10202 = vmatmul.mubr.msk.bf16.vlgmr.msra.gmra.mrb[100].mxu1 %vm5181_vm5, %v8958_v45 }
0x13e2   :  { %10206 = vmatpush3.bf16.msra.mxu1 %v5332_v46  ;;  %10207 = vmatprep.mubr.msk.bf16.mxu1 %vm12027_vm1, %v12026_v53 }
0x13e3   :  { %5417 = vmatprep.subr.bf16.mxu1 %v11106_v49 }
0x13ed   :  { %10208 = vmatmul.mubr.msk.bf16.vlgmr.msra.gmra.mrb[100].mxu1 %vm5181_vm5, %v8960_v50 }
0x13ee   :  { %5418 = vmatpush1.bf16.msra.mxu1 %v11107_v51  ;;  %5449 = vmatprep.mubr.bf16.mxu1 %v12028_v48 }
0x13ef   :  { %5419 = vmatprep.subr.bf16.mxu1 %v11108_v52 }
0x13f2   :  { %5420 = vmatpush1.bf16.msra.mxu1 %v11109_v54 }
0x13f3   :  { %5421 = vmatprep.subr.bf16.mxu1 %v11110_v56 }
0x13f6   :  { %5422 = vmatpush1.bf16.msra.mxu1 %v11111_v57 }
0x13f7   :  { %5423 = vmatprep.subr.bf16.mxu1 %v11112_v58 }
0x13fa   :  { %5424 = vmatpush1.bf16.msra.mxu1 %v11113_v59 }
0x13fb   :  { %5425 = vmatprep.subr.bf16.mxu1 %v11114_v38 }
0x13fe   :  { %5426 = vmatpush1.bf16.msra.mxu1 %v11115_v63 }
0x13ff   :  { %5427 = vmatprep.subr.bf16.mxu1 %v11116_v39  ;;  %v12953_v39 = vld [vmem:[%s13256_s13 + $0x18] sm:$0xff]  }
0x1402   :  { %5428 = vmatpush1.bf16.msra.mxu1 %v11117_v60 }
0x1403   :  { %5429 = vmatprep.subr.bf16.mxu1 %v11118_v61  ;;  %v12960_v61 = vld [vmem:[%s13256_s13] sm:$0xff]  }
0x1406   :  { %5430 = vmatpush1.bf16.msra.mxu1 %v11119_v62 }
0x1407   :  { %5431 = vmatprep.subr.bf16.mxu1 %v11120_v0 }
0x140a   :  { %5432 = vmatpush1.bf16.msra.mxu1 %v11121_v1 }
0x140b   :  { %10235 = vmatprep.subr.bf16.mxu1 %v12026_v53 }
0x14c0   :  { %v5368_v43 = vpop.f32.mrb[100].mxu1 }
0x14c1   :  { %v12896_v2 = vpack.c.bf16 %v5368_v43, %v5368_v43  ;;  %v10209_v4 = vpop.f32.mrb[101].mxu1 }
0x14c2   :  { %v5371_v12 = vpop.f32.mrb[102].mxu1 }
0x14c3   :  { %v10210_v11 = vpop.f32.mrb[103].mxu1  ;;  %5409 = vmatmul.mubr.bf16.vlgmr.msra.gmra.mrb[84].mxu0 %v12896_v2  ;;  %5450 = vmatmul.mubr.bf16.vlgmr.msra.gmra.mrb[104].mxu1 %v12896_v2  ;;  %v12903_v13 = vsel %vm2017_vm2, %v12896_v2, 0 }
0x14c4   :  { %10236 = vmatpush3.bf16.msra.mxu1 %v12903_v13  ;;  %10237 = vmatprep.mubr.msk.bf16.mxu1 %vm12027_vm1, %v12026_v53  ;;  %v12969_v11 = vld [vmem:[%s13256_s13 + $0x8] sm:$0xff]  }
0x14c5   :  { %10247 = vmatprep.subr.bf16.mxu1 %v12026_v53  ;;  %10213 = vmatprep.mubr.msk.bf16.mxu0 %vm2013_vm3, %v12910_v55 }
0x14cb   :  { %10238 = vmatmul.mubr.msk.bf16.vlgmr.msra.gmra.mrb[108].mxu1 %vm2013_vm3, %v12917_v18 }
0x14cc   :  { %10248 = vmatpush3.bf16.msra.mxu1 %v12923_v19  ;;  %10249 = vmatprep.mubr.msk.bf16.mxu1 %vm12027_vm1, %v12026_v53 }
0x14cd   :  { %9594 = vmatprep.subr.bf16.mxu1 %v10882_v16  ;;  %v12981_v16 = vld [vmem:[%s13256_s13 + $0x28] sm:$0xff]  }
0x14d3   :  { %10250 = vmatmul.mubr.msk.bf16.vlgmr.msra.gmra.mrb[112].mxu1 %vm2013_vm3, %v12917_v18 }
0x14d4   :  { %9595 = vmatpush3.bf16.msra.mxu1 %v10883_v7  ;;  %v12986_v7 = vld [vmem:[%s13256_s13 + $0x30] sm:$0xff]  }
0x14d5   :  { %9596 = vmatprep.subr.bf16.mxu1 %v10884_v14  ;;  %v12992_v14 = vld [vmem:[%s13256_s13 + $0x38] sm:$0xff]  }
0x14d8   :  { %9597 = vmatpush3.bf16.msra.mxu1 %v10885_v17  ;;  %v13001_v17 = vld [vmem:[%s13255_s11] sm:$0xf] }
0x14d9   :  { %9598 = vmatprep.subr.bf16.mxu1 %v10886_v20  ;;  %v10899_v20 = vld [vmem:[%s13262_s14 + $0x80] sm:$0xff]  }
0x14dc   :  { %9599 = vmatpush3.bf16.msra.mxu1 %v10887_v21  ;;  %v10900_v21 = vld [vmem:[%s13262_s14 + $0xc8] sm:$0xff]  }
0x14dd   :  { %9600 = vmatprep.subr.bf16.mxu1 %v10888_v22  ;;  %v10904_v22 = vld [vmem:[%s13262_s14 + $0x140] sm:$0xff]  }
0x14e0   :  { %9601 = vmatpush3.bf16.msra.mxu1 %v10889_v24  ;;  %v10905_v24 = vld [vmem:[%s13262_s14 + $0x100] sm:$0xff]  }
0x14e1   :  { %9602 = vmatprep.subr.bf16.mxu1 %v10890_v25  ;;  %v10908_v25 = vld [vmem:[%s13262_s14 + $0x148] sm:$0xff]  }
0x14e4   :  { %9603 = vmatpush3.bf16.msra.mxu1 %v10891_v26  ;;  %v10902_v26 = vld [vmem:[%s13262_s14 + $0xd0] sm:$0xff]  }
0x14e5   :  { %9604 = vmatprep.subr.bf16.mxu1 %v10892_v27  ;;  %v10912_v27 = vld [vmem:[%s13262_s14 + $0x150] sm:$0xff]  }
0x14e8   :  { %9605 = vmatpush3.bf16.msra.mxu1 %v10893_v28  ;;  %v10903_v28 = vld [vmem:[%s13262_s14 + $0x90] sm:$0xff]  }
0x14e9   :  { %9606 = vmatprep.subr.bf16.mxu1 %v10894_v30  ;;  %v10906_v30 = vld [vmem:[%s13262_s14 + $0xd8] sm:$0xff]  }
0x14ec   :  { %9607 = vmatpush3.bf16.msra.mxu1 %v10895_v31  ;;  %v10913_v31 = vld [vmem:[%s13262_s14 + $0x110] sm:$0xff]  }
0x14ed   :  { %9608 = vmatprep.subr.bf16.mxu1 %v10896_v32  ;;  %v10907_v32 = vld [vmem:[%s13262_s14 + $0x98] sm:$0xff]  }
0x14f0   :  { %9609 = vmatpush3.bf16.msra.mxu1 %v10897_v33  ;;  %v10910_v33 = vld [vmem:[%s13262_s14 + $0xe0] sm:$0xff]  }
0x14f1   :  { %9638 = vmatprep.subr.bf16.mxu1 %v10904_v22 }
0x1596   :  { %v5410_v34 = vpop.f32.mrb[84].mxu0  ;;  %v5451_v35 = vpop.f32.mrb[104].mxu1 }
0x1597   :  { %v5412_v36 = vpop.f32.mrb[85].mxu0  ;;  %v5453_v42 = vpop.f32.mrb[105].mxu1  ;;  %v5411_v45 = vadd.f32 %v5410_v34, %v12713_v8  ;;  %v5452_v57 = vadd.f32 %v5451_v35, %v12722_v23  ;;  %v10911_v34 = vld [vmem:[%s13262_s14 + $0xa0] sm:$0xff]   ;;  %v10914_v35 = vld [vmem:[%s13262_s14 + $0xe8] sm:$0xff]  }
0x1598   :  { %v5413_v46 = vadd.f32 %v5412_v36, %v12718_v10  ;;  %v5414_v49 = vpop.f32.mrb[86].mxu0  ;;  %v5455_v50 = vpop.f32.mrb[106].mxu1  ;;  %v5454_v1 = vadd.f32 %v5453_v42, %v12738_v40  ;;  %v10915_v36 = vld [vmem:[%s13262_s14 + $0xa8] sm:$0xff]   ;;  %v10916_v42 = vld [vmem:[%s13262_s14 + $0x158] sm:$0xff]  }
0x1599   :  { %v5415_v51 = vpop.f32.mrb[87].mxu0  ;;  %v5456_v52 = vpop.f32.mrb[107].mxu1  ;;  %v5458_v56 = vpack.c.bf16 %v5411_v45, %v5411_v45  ;;  %v5564_v63 = vpack.c.bf16 %v5452_v57, %v5452_v57  ;;  %v10917_v45 = vld [vmem:[%s13262_s14 + $0x118] sm:$0xff]   ;;  %v10919_v49 = vld [vmem:[%s13262_s14 + $0xb0] sm:$0xff]   ;;  %v10920_v50 = vld [vmem:[%s13262_s14 + $0x160] sm:$0xff]  }
0x159a   :  { %v5459_v54 = vpack.c.bf16 %v5413_v46, %v5413_v46  ;;  %v5621_v3 = vpack.c.bf16 %v5454_v1, %v5454_v1  ;;  %v10918_v46 = vld [vmem:[%s13262_s14 + $0xf0] sm:$0xff]   ;;  %v10921_v51 = vld [vmem:[%s13262_s14 + $0x120] sm:$0xff]   ;;  %v10922_v52 = vld [vmem:[%s13262_s14 + $0xf8] sm:$0xff]   ;;  %v3760_v1 = vmax.f32 %v12812_v44, 0.0 }
0x159b   :  { %v5513_v38 = vsel %vm2017_vm2, %v5458_v56, 0  ;;  %v5566_v12 = vsel %vm2017_vm2, %v5564_v63, 0  ;;  %v10925_v57 = vld [vmem:[%s13262_s14 + $0x128] sm:$0xff]  }
0x159c   :  { %v5461_v58 = vsel %vm2017_vm2, %v5459_v54, 0  ;;  %10455 = vmatprep.subr.msk.bf16.mxu0 %vm2017_vm2, %v5459_v54  ;;  %v5623_v40 = vsel %vm2017_vm2, %v5621_v3, 0  ;;  %v10923_v54 = vld [vmem:[%s13262_s14 + $0xb8] sm:$0xff]  }
0x159d   :  { %10212 = vmatpush3.bf16.msra.mxu0 %v5461_v58  ;;  %v10926_v58 = vld [vmem:[%s13262_s14 + $0x170] sm:$0xff]  }
0x159e   :  { %10456 = vmatprep.subr.msk.bf16.mxu0 %vm2017_vm2, %v5458_v56  ;;  %v5715_v8 = vpop.f32.mrb[108].mxu1  ;;  %v10924_v56 = vld [vmem:[%s13262_s14 + $0x168] sm:$0xff]  }
0x159f   :  { %v5721_v59 = vpack.c.bf16 %v5715_v8, %v5715_v8  ;;  %v10239_v10 = vpop.f32.mrb[109].mxu1  ;;  %v10927_v8 = vld [vmem:[%s13262_s14 + $0x130] sm:$0xff]  }
0x15a0   :  { %10214 = vmatmul.mubr.msk.bf16.vlgmr.msra.gmra.mrb[88].mxu0 %vm2013_vm3, %v12953_v39  ;;  %v5718_v23 = vpop.f32.mrb[110].mxu1  ;;  %v10929_v10 = vld [vmem:[%s13262_s14 + $0x138] sm:$0xff]  }
0x15a1   :  { %10218 = vmatpush3.bf16.msra.mxu0 %v5513_v38  ;;  %6272 = vmatprep.mubr.bf16.mxu1 %v5721_v59  ;;  %v10240_v60 = vpop.f32.mrb[111].mxu1  ;;  %v10928_v59 = vld [vmem:[%s13262_s14 + $0x178] sm:$0xff]  }
0x15a2   :  { %10457 = vmatprep.subr.msk.bf16.mxu0 %vm2017_vm2, %v5564_v63  ;;  %6273 = vmatmul.mubr.bf16.vlgmr.msra.gmra.mrb[116].mxu1 %v12896_v2  ;;  %v12974_v2 = vld [vmem:[%s13256_s13 + $0x20] sm:$0xff]  }
0x15a3   :  { %10219 = vmatprep.mubr.msk.bf16.mxu0 %vm2013_vm3, %v12960_v61  ;;  %9639 = vmatpush3.bf16.msra.mxu1 %v10905_v24 }
0x15a4   :  { %9640 = vmatprep.subr.bf16.mxu1 %v10908_v25 }
0x15a6   :  { %v12964_v62 = vpop.f32.mrb[112].mxu1 }
0x15a7   :  { %v10251_v0 = vpop.f32.mrb[113].mxu1 }
0x15a8   :  { %v5804_v43 = vpop.f32.mrb[114].mxu1 }
0x15a9   :  { %v10252_v4 = vpop.f32.mrb[115].mxu1  ;;  %v3758_v43 = vmax.f32 %v12808_v29, 0.0 }
0x15ac   :  { %10220 = vmatmul.mubr.msk.bf16.vlgmr.msra.gmra.mrb[88].mxu0 %vm2013_vm3, %v12969_v11 }
0x15ad   :  { %10224 = vmatpush3.bf16.msra.mxu0 %v5566_v12  ;;  %10225 = vmatprep.mubr.msk.bf16.mxu0 %vm2013_vm3, %v12974_v2 }
0x15ae   :  { %10458 = vmatprep.subr.msk.bf16.mxu0 %vm2017_vm2, %v5621_v3 }
0x15b8   :  { %10226 = vmatmul.mubr.msk.bf16.vlgmr.msra.gmra.mrb[88].mxu0 %vm2013_vm3, %v12981_v16 }
0x15b9   :  { %10230 = vmatpush3.bf16.msra.mxu0 %v5623_v40  ;;  %10231 = vmatprep.mubr.msk.bf16.mxu0 %vm2013_vm3, %v12986_v7  ;;  %v3761_v40 = vmax.f32 %v12814_v47, 0.0 }
0x15ba   :  { %10241 = vmatprep.subr.bf16.mxu0 %v12026_v53 }
0x15c4   :  { %10232 = vmatmul.mubr.msk.bf16.vlgmr.msra.gmra.mrb[88].mxu0 %vm2013_vm3, %v12992_v14 }
0x15c5   :  { %10242 = vmatpush3.bf16.msra.mxu0 %v12903_v13  ;;  %10243 = vmatprep.mubr.msk.bf16.mxu0 %vm12027_vm1, %v12026_v53  ;;  %v10898_v13 = vld [vmem:[%s13262_s14 + $0xc0] sm:$0xff]  }
0x15c6   :  { %10253 = vmatprep.subr.bf16.mxu0 %v12026_v53 }
0x15cc   :  { %10244 = vmatmul.mubr.msk.bf16.vlgmr.msra.gmra.mrb[92].mxu0 %vm2013_vm3, %v13001_v17 }
0x15cd   :  { %10254 = vmatpush3.bf16.msra.mxu0 %v12923_v19  ;;  %10255 = vmatprep.mubr.msk.bf16.mxu0 %vm12027_vm1, %v12026_v53  ;;  %v10901_v19 = vld [vmem:[%s13262_s14 + $0x88] sm:$0xff]  }
0x15ce   :  { %9616 = vmatprep.subr.bf16.mxu0 %v10898_v13  ;;  %v3759_v13 = vmax.f32 %v12810_v41, 0.0  ;;  %v5807_v41 = vpack.c.bf16 %v12964_v62, %v12964_v62  ;;  %v10944_v62 = vld [vmem:[#allocation42 + $0x98] sm:$0xff]  }
0x15d4   :  { %10256 = vmatmul.mubr.msk.bf16.vlgmr.msra.gmra.mrb[96].mxu0 %vm2013_vm3, %v13001_v17 }
0x15d5   :  { %6312 = vmatprep.mubr.bf16.mxu0 %v12914_v15  ;;  %9617 = vmatpush3.bf16.msra.mxu0 %v10899_v20  ;;  %v10909_v15 = vld [vmem:[%s13262_s14 + $0x108] sm:$0xff]  }
0x15d6   :  { %9618 = vmatprep.subr.bf16.mxu0 %v10900_v21  ;;  %9641 = vmatpush3.bf16.msra.mxu1 %v10909_v15 }
0x15d7   :  { %9642 = vmatprep.subr.bf16.mxu1 %v10912_v27 }
0x15d9   :  { %9619 = vmatpush3.bf16.msra.mxu0 %v10901_v19 }
0x15da   :  { %9620 = vmatprep.subr.bf16.mxu0 %v10902_v26  ;;  %9643 = vmatpush3.bf16.msra.mxu1 %v10913_v31 }
0x15db   :  { %9644 = vmatprep.subr.bf16.mxu1 %v10916_v42  ;;  %v10947_v42 = vld [vmem:[#allocation42 + $0xa0] sm:$0xff]  }
0x15dd   :  { %9621 = vmatpush3.bf16.msra.mxu0 %v10903_v28 }
0x15de   :  { %9622 = vmatprep.subr.bf16.mxu0 %v10906_v30  ;;  %9645 = vmatpush3.bf16.msra.mxu1 %v10917_v45  ;;  %v8974_v45 = vld [vmem:[#allocation39] ss:$0 sm:$0xff] }
0x15df   :  { %9646 = vmatprep.subr.bf16.mxu1 %v10920_v50 }
0x15e1   :  { %9623 = vmatpush3.bf16.msra.mxu0 %v10907_v32 }
0x15e2   :  { %9624 = vmatprep.subr.bf16.mxu0 %v10910_v33  ;;  %9647 = vmatpush3.bf16.msra.mxu1 %v10921_v51 }
0x15e3   :  { %9648 = vmatprep.subr.bf16.mxu1 %v10924_v56 }
0x15e5   :  { %9625 = vmatpush3.bf16.msra.mxu0 %v10911_v34  ;;  %v10935_v34 = vld [vmem:[#allocation42 + $0x80] sm:$0xff]  }
0x15e6   :  { %9626 = vmatprep.subr.bf16.mxu0 %v10914_v35  ;;  %9649 = vmatpush3.bf16.msra.mxu1 %v10925_v57  ;;  %v10938_v35 = vld [vmem:[#allocation42 + $0x88] sm:$0xff]  }
0x15e7   :  { %9650 = vmatprep.subr.bf16.mxu1 %v10926_v58 }
0x15e9   :  { %9627 = vmatpush3.bf16.msra.mxu0 %v10915_v36  ;;  %v10941_v36 = vld [vmem:[#allocation42 + $0x90] sm:$0xff]  }
0x15ea   :  { %9628 = vmatprep.subr.bf16.mxu0 %v10918_v46  ;;  %9651 = vmatpush3.bf16.msra.mxu1 %v10927_v8 }
0x15eb   :  { %9652 = vmatprep.subr.bf16.mxu1 %v10928_v59 }
0x15ed   :  { %9629 = vmatpush3.bf16.msra.mxu0 %v10919_v49 }
0x15ee   :  { %9630 = vmatprep.subr.bf16.mxu0 %v10922_v52  ;;  %9653 = vmatpush3.bf16.msra.mxu1 %v10929_v10 }
0x15ef   :  { %10271 = vmatprep.subr.bf16.mxu1 %v12026_v53 }
0x15f1   :  { %9631 = vmatpush3.bf16.msra.mxu0 %v10923_v54 }
0x15f2   :  { %10259 = vmatprep.subr.bf16.mxu0 %v12026_v53 }
0x1675   :  { %v9610_v38 = vpop.f32.mrb[116].mxu1 }
0x1676   :  { %v9611_v63 = vpop.f32.mrb[117].mxu1 }
0x1677   :  { %v9612_v23 = vadd.f32 %v9611_v63, %v9610_v38  ;;  %v9613_v60 = vpop.f32.mrb[118].mxu1 }
0x1678   :  { %v9614_v0 = vpop.f32.mrb[119].mxu1 }
0x1679   :  { %v6275_v50 = vadd.f32 %v9612_v23, %v8974_v45  ;;  %v10931_v23 = vld [vmem:[#allocation42] sm:$0xff]  }
0x1697   :  { %v10233_v4 = vpop.f32.mrb[88].mxu0 }
0x1698   :  { %v7246_v12 = vadd.f32 %v10233_v4, %v3760_v1  ;;  %v5659_v3 = vpop.f32.mrb[89].mxu0  ;;  %v10930_v1 = vld [vmem:[#allocation42 + $0x40] sm:$0xff]   ;;  %v10933_v4 = vld [vmem:[#allocation42 + $0x8] sm:$0xff]  }
0x1699   :  { %v7244_v20 = vadd.f32 %v5659_v3, %v3758_v43  ;;  %v10234_v21 = vpop.f32.mrb[90].mxu0  ;;  %v10932_v43 = vld [vmem:[#allocation42 + $0x48] sm:$0xff]   ;;  %v10936_v3 = vld [vmem:[#allocation42 + $0x10] sm:$0xff]  }
0x169a   :  { %v7247_v22 = vadd.f32 %v10234_v21, %v3761_v40  ;;  %v5662_v24 = vpop.f32.mrb[91].mxu0  ;;  %v10937_v40 = vld [vmem:[#allocation42 + $0x58] sm:$0xff]   ;;  %v10943_v21 = vld [vmem:[#allocation42 + $0x68] sm:$0xff]  }
0x169b   :  { %v7245_v19 = vadd.f32 %v5662_v24, %v3759_v13  ;;  %v10940_v13 = vld [vmem:[#allocation42 + $0x60] sm:$0xff]   ;;  %v10948_v24 = vld [vmem:[#allocation42 + $0x30] sm:$0xff]  }
0x169c   :  { %v13049_v25 = vpack.c.bf16 %v7247_v22, %v7246_v12  ;;  %v10934_v12 = vld [vmem:[#allocation42 + $0x50] sm:$0xff]   ;;  %v10945_v22 = vld [vmem:[#allocation42 + $0x28] sm:$0xff]  }
0x169d   :  { %v13051_v26 = vpack.c.bf16 %v7245_v19, %v7244_v20  ;;  %v10942_v20 = vld [vmem:[#allocation42 + $0x20] sm:$0xff]   ;;  %v10949_v19 = vld [vmem:[#allocation42 + $0x78] sm:$0xff]  }
0x169f   :  { %v5756_v15 = vpop.f32.mrb[92].mxu0 }
0x16a0   :  { %v5762_v44 = vpack.c.bf16 %v5756_v15, %v5756_v15  ;;  %v10245_v27 = vpop.f32.mrb[93].mxu0  ;;  %v10950_v15 = vld [vmem:[#allocation42 + $0xa8] sm:$0xff]  }
0x16a1   :  { %v5759_v29 = vpop.f32.mrb[94].mxu0  ;;  %v10952_v27 = vld [vmem:[#allocation42 + $0xb0] sm:$0xff]  }
0x16a2   :  { %6313 = vmatmul.mubr.bf16.vlgmr.msra.gmra.mrb[100].mxu0 %v5762_v44  ;;  %v10246_v28 = vpop.f32.mrb[95].mxu0  ;;  %v10951_v44 = vld [vmem:[#allocation42 + $0x38] sm:$0xff]  }
0x16a3   :  { %10261 = vmatprep.mubr.msk.bf16.mxu0 %vm12027_vm1, %v12026_v53  ;;  %v10953_v29 = vld [vmem:[#allocation42 + $0xb8] sm:$0xff]   ;;  %v10956_v28 = vld [vmem:[#allocation54 + $0x4] ss:$16 sps:$4 sm:$0xff]  }
0x16a7   :  { %v5842_v47 = vpop.f32.mrb[96].mxu0 }
0x16a8   :  { %v5848_v30 = vpack.c.bf16 %v5842_v47, %v5842_v47  ;;  %v10257_v31 = vpop.f32.mrb[97].mxu0 }
0x16a9   :  { %v5845_v32 = vpop.f32.mrb[98].mxu0 }
0x16aa   :  { %6352 = vmatprep.mubr.bf16.mxu1 %v5848_v30  ;;  %v10258_v33 = vpop.f32.mrb[99].mxu0  ;;  %v10954_v32 = vld [vmem:[#allocation54] ss:$16 sps:$4 sm:$0xff]  }
0x16ab   :  { %6353 = vmatmul.mubr.bf16.vlgmr.msra.gmra.mrb[120].mxu1 %v5807_v41  ;;  %v10959_v41 = vld [vmem:[#allocation54 + $0xc] ss:$16 sps:$4 sm:$0xff]  }
0x16ac   :  { %10287 = vmatprep.mubr.msk.bf16.mxu1 %vm12027_vm1, %v12026_v53  ;;  %10272 = vmatpush3.bf16.msra.mxu1 %v10935_v34  ;;  %v10962_v34 = vld [vmem:[#allocation54 + $0x24] ss:$16 sps:$4 sm:$0xff]  }
0x16ad   :  { %10273 = vmatprep.subr.bf16.mxu1 %v12026_v53 }
0x16b0   :  { %10274 = vmatpush3.bf16.msra.mxu1 %v10938_v35 }
0x16b1   :  { %10275 = vmatprep.subr.bf16.mxu1 %v12026_v53 }
0x16b4   :  { %10276 = vmatpush3.bf16.msra.mxu1 %v10941_v36  ;;  %v10960_v36 = vld [vmem:[#allocation54 + $0x20] ss:$16 sps:$4 sm:$0xff]  }
0x16b5   :  { %10277 = vmatprep.subr.bf16.mxu1 %v12026_v53 }
0x16b8   :  { %10278 = vmatpush3.bf16.msra.mxu1 %v10944_v62 }
0x16b9   :  { %10279 = vmatprep.subr.bf16.mxu1 %v12026_v53 }
0x16bc   :  { %10280 = vmatpush3.bf16.msra.mxu1 %v10947_v42  ;;  %v10957_v42 = vld [vmem:[#allocation54 + $0x8] ss:$16 sps:$4 sm:$0xff]  }
0x16bd   :  { %10281 = vmatprep.subr.bf16.mxu1 %v12026_v53 }
0x16c0   :  { %10282 = vmatpush3.bf16.msra.mxu1 %v10950_v15 }
0x16c1   :  { %10283 = vmatprep.subr.bf16.mxu1 %v12026_v53 }
0x16c4   :  { %10284 = vmatpush3.bf16.msra.mxu1 %v10952_v27 }
0x16c5   :  { %10285 = vmatprep.subr.bf16.mxu1 %v12026_v53 }
0x16c8   :  { %10286 = vmatpush3.bf16.msra.mxu1 %v10953_v29 }
0x16c9   :  { %6983 = vmatprep.subr.bf16.mxu1 %v10959_v41 }
0x1775   :  { %v9632_v46 = vpop.f32.mrb[100].mxu0 }
0x1776   :  { %v9633_v49 = vpop.f32.mrb[101].mxu0 }
0x1777   :  { %v9634_v51 = vadd.f32 %v9633_v49, %v9632_v46  ;;  %v9635_v52 = vpop.f32.mrb[102].mxu0  ;;  %v10965_v49 = vld [vmem:[#allocation54 + $0x2c] ss:$16 sps:$4 sm:$0xff]  }
0x1778   :  { %v9636_v54 = vpop.f32.mrb[103].mxu0  ;;  %v10974_v52 = vld [vmem:[#allocation54 + $0x64] ss:$16 sps:$4 sm:$0xff]  }
0x1779   :  { %v6315_v56 = vadd.f32 %v9634_v51, %v6275_v50  ;;  %v10966_v50 = vld [vmem:[#allocation54 + $0x40] ss:$16 sps:$4 sm:$0xff]  }
0x177e   :  { %v9654_v57 = vpop.f32.mrb[120].mxu1 }
0x177f   :  { %v9655_v58 = vpop.f32.mrb[121].mxu1 }
0x1780   :  { %v9656_v8 = vadd.f32 %v9655_v58, %v9654_v57  ;;  %v9657_v59 = vpop.f32.mrb[122].mxu1  ;;  %v10971_v57 = vld [vmem:[#allocation54 + $0x4c] ss:$16 sps:$4 sm:$0xff]   ;;  %v10972_v58 = vld [vmem:[#allocation54 + $0x60] ss:$16 sps:$4 sm:$0xff]  }
0x1781   :  { %v9658_v10 = vpop.f32.mrb[123].mxu1  ;;  %v10969_v59 = vld [vmem:[#allocation54 + $0x48] ss:$16 sps:$4 sm:$0xff]  }
0x1782   :  { %v6355_v38 = vadd.f32 %v9656_v8, %v6315_v56  ;;  %v10963_v56 = vld [vmem:[#allocation54 + $0x28] ss:$16 sps:$4 sm:$0xff]   ;;  %v10980_v8 = vld [vmem:[#allocation54 + $0x84] ss:$16 sps:$4 sm:$0xff]   ;;  %v10977_v10 = vld [vmem:[#allocation54 + $0x6c] ss:$16 sps:$4 sm:$0xff]  }
0x1784   :  { %v6360_v63 = vmax.f32 %v6355_v38, 0.0  ;;  %v10978_v38 = vld [vmem:[#allocation54 + $0x80] ss:$16 sps:$4 sm:$0xff]  }
0x1786   :  { %v6361_v60 = vpack.c.bf16 %v6360_v63, %v6360_v63  ;;  %v10975_v63 = vld [vmem:[#allocation54 + $0x68] ss:$16 sps:$4 sm:$0xff]  }
0x1788   :  { %v6363_v0 = vsel %vm2017_vm2, %v6361_v60, 0 }
0x1789   :  { %10260 = vmatpush3.bf16.msra.mxu0 %v6363_v0 }
0x178a   :  { %10265 = vmatprep.subr.bf16.mxu0 %v12026_v53 }
0x178c   :  { %10262 = vmatmul.mubr.msk.bf16.vlgmr.msra.gmra.mrb[104].mxu0 %vm2013_vm3, %v12917_v18  ;;  %v10939_v18 = vld [vmem:[#allocation42 + $0x18] sm:$0xff]  }
0x178d   :  { %10266 = vmatpush3.bf16.msra.mxu0 %v6363_v0  ;;  %10267 = vmatprep.mubr.msk.bf16.mxu0 %vm12027_vm1, %v12026_v53  ;;  %v10968_v53 = vld [vmem:[#allocation54 + $0x44] ss:$16 sps:$4 sm:$0xff]  }
0x178e   :  { %9664 = vmatprep.subr.bf16.mxu0 %v10930_v1  ;;  %v10986_v0 = vld [vmem:[#allocation54 + $0xa4] ss:$16 sps:$4 sm:$0xff]   ;;  %v10989_v1 = vld [vmem:[#allocation54 + $0xac] ss:$16 sps:$4 sm:$0xff]  }
0x1794   :  { %10268 = vmatmul.mubr.msk.bf16.vlgmr.msra.gmra.mrb[108].mxu0 %vm2013_vm3, %v13001_v17  ;;  %v10946_v17 = vld [vmem:[#allocation42 + $0x70] sm:$0xff]  }
0x1795   :  { %9665 = vmatpush3.bf16.msra.mxu0 %v10931_v23  ;;  %v10984_v23 = vld [vmem:[#allocation54 + $0xa0] ss:$16 sps:$4 sm:$0xff]  }
0x1796   :  { %9666 = vmatprep.subr.bf16.mxu0 %v10932_v43  ;;  %v10987_v43 = vld [vmem:[#allocation54 + $0xa8] ss:$16 sps:$4 sm:$0xff]  }
0x1799   :  { %9667 = vmatpush3.bf16.msra.mxu0 %v10933_v4  ;;  %v10992_v4 = vld [vmem:[#allocation54 + $0xc4] ss:$16 sps:$4 sm:$0xff]  }
0x179a   :  { %9668 = vmatprep.subr.bf16.mxu0 %v10934_v12  ;;  %v10990_v12 = vld [vmem:[#allocation54 + $0xc0] ss:$16 sps:$4 sm:$0xff]  }
0x179d   :  { %9669 = vmatpush3.bf16.msra.mxu0 %v10936_v3  ;;  %v10993_v3 = vld [vmem:[#allocation54 + $0xc8] ss:$16 sps:$4 sm:$0xff]  }
0x179e   :  { %9670 = vmatprep.subr.bf16.mxu0 %v10937_v40  ;;  %v10995_v40 = vld [vmem:[#allocation54 + $0xcc] ss:$16 sps:$4 sm:$0xff]  }
0x17a1   :  { %9671 = vmatpush3.bf16.msra.mxu0 %v10939_v18  ;;  %v10998_v18 = vld [vmem:[#allocation54 + $0xe4] ss:$16 sps:$4 sm:$0xff]  }
0x17a2   :  { %9672 = vmatprep.subr.bf16.mxu0 %v10940_v13  ;;  %v11001_v13 = vld [vmem:[#allocation54 + $0xec] ss:$16 sps:$4 sm:$0xff]  }
0x17a5   :  { %9673 = vmatpush3.bf16.msra.mxu0 %v10942_v20  ;;  %v10996_v20 = vld [vmem:[#allocation54 + $0xe0] ss:$16 sps:$4 sm:$0xff]  }
0x17a6   :  { %9674 = vmatprep.subr.bf16.mxu0 %v10943_v21  ;;  %v10999_v21 = vld [vmem:[#allocation54 + $0xe8] ss:$16 sps:$4 sm:$0xff]  }
0x17a9   :  { %9675 = vmatpush3.bf16.msra.mxu0 %v10945_v22 }
0x17aa   :  { %9676 = vmatprep.subr.bf16.mxu0 %v10946_v17 }
0x17ad   :  { %9677 = vmatpush3.bf16.msra.mxu0 %v10948_v24 }
0x17ae   :  { %9678 = vmatprep.subr.bf16.mxu0 %v10949_v19 }
0x17b1   :  { %9679 = vmatpush3.bf16.msra.mxu0 %v10951_v44  ;;  %v9025_v44 = vld [vmem:[#allocation40] ss:$0 sm:$0xff] }
0x17b2   :  { %6942 = vmatprep.subr.bf16.mxu0 %v10956_v28 }
0x185f   :  { %v6399_v47 = vpop.f32.mrb[104].mxu0 }
0x1860   :  { %v6405_v30 = vpack.c.bf16 %v6399_v47, %v6399_v47  ;;  %v10263_v31 = vpop.f32.mrb[105].mxu0 }
0x1861   :  { %v6402_v33 = vpop.f32.mrb[106].mxu0 }
0x1862   :  { %6678 = vmatprep.mubr.bf16.mxu0 %v6405_v30  ;;  %v10264_v35 = vpop.f32.mrb[107].mxu0  ;;  %v13078_v33 = vld [vmem:[#allocation21] sm:$0xff]  }
0x1863   :  { %6679 = vmatmul.mubr.bf16.vlgmr.msra.gmra.mrb[112].mxu0 %v6361_v60  ;;  %v10983_v60 = vld [vmem:[#allocation54 + $0x8c] ss:$16 sps:$4 sm:$0xff]  }
0x1864   :  { %6943 = vmatpush1.bf16.msra.mxu0 %v10954_v32  ;;  %6974 = vmatprep.mubr.bf16.mxu0 %v12028_v48 }
0x1865   :  { %6944 = vmatprep.subr.bf16.mxu0 %v10962_v34  ;;  %v6760_v34 = vld [vmem:[#allocation52] sm:$0xf] }
0x1866   :  { %v6765_v35 = vrot.slane %v6760_v34, %v12708_v5 }
0x1867   :  { %v6440_v62 = vpop.f32.mrb[108].mxu0 }
0x1868   :  { %v6446_v45 = vpack.c.bf16 %v6440_v62, %v6440_v62  ;;  %v10269_v46 = vpop.f32.mrb[109].mxu0  ;;  %6945 = vmatpush1.bf16.msra.mxu0 %v10960_v36  ;;  %v6769_v36 = vrot.slane %v6760_v34, %v12710_v6 }
0x1869   :  { %v6443_v51 = vpop.f32.mrb[110].mxu0  ;;  %6946 = vmatprep.subr.bf16.mxu0 %v10968_v53 }
0x186a   :  { %10288 = vmatmul.mubr.bf16.vlgmr.msra.gmra.mrb[124].mxu1 %v6446_v45  ;;  %v10270_v54 = vpop.f32.mrb[111].mxu0 }
0x186b   :  { %6984 = vmatpush1.bf16.msra.mxu1 %v10957_v42  ;;  %7015 = vmatprep.mubr.bf16.mxu1 %v12028_v48  ;;  %v10981_v48 = vld [vmem:[#allocation54 + $0x88] ss:$16 sps:$4 sm:$0xff]  }
0x186c   :  { %6985 = vmatprep.subr.bf16.mxu1 %v10965_v49  ;;  %6947 = vmatpush1.bf16.msra.mxu0 %v10966_v50  ;;  %v6773_v49 = vrot.slane %v6760_v34, %v12715_v9  ;;  %v6777_v9 = vrot.slane %v6760_v34, %v12732_v37  ;;  %v13110_v37 = vld [vmem:[#allocation18] sm:$0xff]   ;;  %v11030_v34 = vld [vmem:[#allocation46 + $0xf0] sm:$0xff]  }
0x186d   :  { %6948 = vmatprep.subr.bf16.mxu0 %v10974_v52 }
0x186f   :  { %6986 = vmatpush1.bf16.msra.mxu1 %v10963_v56 }
0x1870   :  { %6987 = vmatprep.subr.bf16.mxu1 %v10971_v57  ;;  %6949 = vmatpush1.bf16.msra.mxu0 %v10972_v58 }
0x1871   :  { %6950 = vmatprep.subr.bf16.mxu0 %v10980_v8 }
0x1873   :  { %6988 = vmatpush1.bf16.msra.mxu1 %v10969_v59 }
0x1874   :  { %6989 = vmatprep.subr.bf16.mxu1 %v10977_v10  ;;  %6951 = vmatpush1.bf16.msra.mxu0 %v10978_v38 }
0x1875   :  { %6952 = vmatprep.subr.bf16.mxu0 %v10986_v0  ;;  %v11023_v0 = vld [vmem:[#allocation46 + $0xe0] sm:$0xff]  }
0x1877   :  { %6990 = vmatpush1.bf16.msra.mxu1 %v10975_v63  ;;  %v11017_v63 = vld [vmem:[#allocation46 + $0x90] sm:$0xff]  }
0x1878   :  { %6991 = vmatprep.subr.bf16.mxu1 %v10983_v60  ;;  %6953 = vmatpush1.bf16.msra.mxu0 %v10984_v23  ;;  %v11019_v60 = vld [vmem:[#allocation46 + $0xd8] sm:$0xff]  }
0x1879   :  { %6954 = vmatprep.subr.bf16.mxu0 %v10992_v4 }
0x187b   :  { %6992 = vmatpush1.bf16.msra.mxu1 %v10981_v48  ;;  %v11021_v48 = vld [vmem:[#allocation46 + $0x98] sm:$0xff]  }
0x187c   :  { %6993 = vmatprep.subr.bf16.mxu1 %v10989_v1  ;;  %6955 = vmatpush1.bf16.msra.mxu0 %v10990_v12  ;;  %v11025_v1 = vld [vmem:[#allocation46 + $0xa0] sm:$0xff]  }
0x187d   :  { %6956 = vmatprep.subr.bf16.mxu0 %v10998_v18  ;;  %v13130_v18 = vld [vmem:[#allocation21 + $0x8] sm:$0xff]  }
0x187f   :  { %6994 = vmatpush1.bf16.msra.mxu1 %v10987_v43 }
0x1880   :  { %6995 = vmatprep.subr.bf16.mxu1 %v10995_v40  ;;  %6957 = vmatpush1.bf16.msra.mxu0 %v10996_v20  ;;  %v11003_v20 = vld [vmem:[#allocation46] sm:$0xff]  }
0x1883   :  { %6996 = vmatpush1.bf16.msra.mxu1 %v10993_v3 }
0x1884   :  { %6997 = vmatprep.subr.bf16.mxu1 %v11001_v13  ;;  %v11002_v13 = vld [vmem:[#allocation46 + $0x40] sm:$0xff]  }
0x1887   :  { %6998 = vmatpush1.bf16.msra.mxu1 %v10999_v21  ;;  %v11004_v21 = vld [vmem:[#allocation46 + $0x48] sm:$0xff]  }
0x1936   :  { %v9680_v22 = vpop.f32.mrb[112].mxu0 }
0x1937   :  { %v9681_v17 = vpop.f32.mrb[113].mxu0 }
0x1938   :  { %v9682_v24 = vadd.f32 %v9681_v17, %v9680_v22  ;;  %v9683_v19 = vpop.f32.mrb[114].mxu0  ;;  %v11005_v22 = vld [vmem:[#allocation46 + $0x8] sm:$0xff]   ;;  %v11006_v17 = vld [vmem:[#allocation46 + $0x50] sm:$0xff]  }
0x1939   :  { %v9684_v15 = vpop.f32.mrb[115].mxu0  ;;  %v11012_v19 = vld [vmem:[#allocation46 + $0x18] sm:$0xff]  }
0x193a   :  { %v6681_v27 = vadd.f32 %v9682_v24, %v9025_v44  ;;  %v11010_v24 = vld [vmem:[#allocation46 + $0x58] sm:$0xff]   ;;  %v11014_v15 = vld [vmem:[#allocation46 + $0x60] sm:$0xff]  }
0x193b   :  { %v11016_v44 = vld [vmem:[#allocation46 + $0x20] sm:$0xff]  }
0x193d   :  { %v6720_v29 = vpop.f32.mrb[124].mxu1 }
0x193e   :  { %v6721_v28 = vadd.f32 %v6720_v29, %v6681_v27  ;;  %v10289_v41 = vpop.f32.mrb[125].mxu1  ;;  %v11018_v27 = vld [vmem:[#allocation46 + $0x68] sm:$0xff]  }
0x193f   :  { %v6723_v47 = vpop.f32.mrb[126].mxu1  ;;  %v11020_v29 = vld [vmem:[#allocation46 + $0x28] sm:$0xff]   ;;  %v11024_v41 = vld [vmem:[#allocation46 + $0x30] sm:$0xff]  }
0x1940   :  { %v6726_v30 = vmax.f32 %v6721_v28, 0.0  ;;  %v10290_v31 = vpop.f32.mrb[127].mxu1  ;;  %v11022_v28 = vld [vmem:[#allocation46 + $0x70] sm:$0xff]   ;;  %v11026_v47 = vld [vmem:[#allocation46 + $0x78] sm:$0xff]  }
0x1941   :  { %v11028_v31 = vld [vmem:[#allocation46 + $0x38] sm:$0xff]  }
0x1942   :  { %v6727_v32 = vpack.c.bf16 %v6726_v30, %v6726_v30  ;;  %v11027_v30 = vld [vmem:[#allocation46 + $0xe8] sm:$0xff]  }
0x1944   :  { %6975 = vmatmul.mubr.bf16.vlgmr.msra.gmra.mrb[116].mxu0 %v6727_v32  ;;  %7016 = vmatmul.mubr.bf16.vlgmr.msra.gmra.mrb[128].mxu1 %v6727_v32  ;;  %v11029_v32 = vld [vmem:[#allocation46 + $0xa8] sm:$0xff]  }
0x1945   :  { %10293 = vmatprep.mubr.msk.bf16.mxu0 %vm2013_vm3, %v12910_v55  ;;  %10319 = vmatprep.mubr.msk.bf16.mxu1 %vm648_vm0, %v13078_v33 }
0x1a17   :  { %v6976_v53 = vpop.f32.mrb[116].mxu0  ;;  %v7017_v62 = vpop.f32.mrb[128].mxu1 }
0x1a18   :  { %v6978_v42 = vpop.f32.mrb[117].mxu0  ;;  %v7019_v45 = vpop.f32.mrb[129].mxu1  ;;  %v6977_v46 = vadd.f32 %v6976_v53, %v6765_v35  ;;  %v7018_v58 = vadd.f32 %v7017_v62, %v6773_v49  ;;  %v11031_v35 = vld [vmem:[#allocation46 + $0x140] sm:$0xff]   ;;  %v11034_v53 = vld [vmem:[#allocation46 + $0xf8] sm:$0xff]  }
0x1a19   :  { %v6979_v50 = vadd.f32 %v6978_v42, %v6769_v36  ;;  %v6980_v51 = vpop.f32.mrb[118].mxu0  ;;  %v7021_v55 = vpop.f32.mrb[130].mxu1  ;;  %v7020_v59 = vadd.f32 %v7019_v45, %v6777_v9  ;;  %v11032_v36 = vld [vmem:[#allocation46 + $0xb0] sm:$0xff]   ;;  %v11036_v62 = vld [vmem:[#allocation46 + $0xb8] sm:$0xff]   ;;  %v11037_v9 = vld [vmem:[#allocation46 + $0x108] sm:$0xff]  }
0x1a1a   :  { %v6981_v52 = vpop.f32.mrb[119].mxu0  ;;  %v7022_v54 = vpop.f32.mrb[131].mxu1  ;;  %v7024_v57 = vpack.c.bf16 %v6977_v46, %v6977_v46  ;;  %v7130_v6 = vpack.c.bf16 %v7018_v58, %v7018_v58 }
0x1a1b   :  { %v7025_v56 = vpack.c.bf16 %v6979_v50, %v6979_v50  ;;  %v7187_v38 = vpack.c.bf16 %v7020_v59, %v7020_v59 }
0x1a1c   :  { %v7079_v5 = vsel %vm2017_vm2, %v7024_v57, 0  ;;  %v7132_v10 = vsel %vm2017_vm2, %v7130_v6, 0 }
0x1a1d   :  { %v7027_v8 = vsel %vm2017_vm2, %v7025_v56, 0  ;;  %10459 = vmatprep.subr.msk.bf16.mxu0 %vm2017_vm2, %v7025_v56 }
0x1a1e   :  { %10292 = vmatpush3.bf16.msra.mxu0 %v7027_v8  ;;  %v11033_v8 = vld [vmem:[#allocation46 + $0x100] sm:$0xff]  }
0x1a1f   :  { %10460 = vmatprep.subr.msk.bf16.mxu0 %vm2017_vm2, %v7024_v57 }
0x1a21   :  { %10294 = vmatmul.mubr.msk.bf16.vlgmr.msra.gmra.mrb[120].mxu0 %vm2013_vm3, %v12953_v39  ;;  %v7189_v39 = vsel %vm2017_vm2, %v7187_v38, 0 }
0x1a22   :  { %10298 = vmatpush3.bf16.msra.mxu0 %v7079_v5  ;;  %10299 = vmatprep.mubr.msk.bf16.mxu0 %vm2013_vm3, %v12960_v61  ;;  %v13116_v61 = vld [vmem:[#allocation18 + $0x8] sm:$0xff]   ;;  %v11035_v5 = vld [vmem:[#allocation46 + $0x148] sm:$0xff]  }
0x1a23   :  { %10461 = vmatprep.subr.msk.bf16.mxu0 %vm2017_vm2, %v7130_v6 }
0x1a2d   :  { %10300 = vmatmul.mubr.msk.bf16.vlgmr.msra.gmra.mrb[120].mxu0 %vm2013_vm3, %v12969_v11  ;;  %v11007_v11 = vld [vmem:[#allocation46 + $0xc0] sm:$0xff]  }
0x1a2e   :  { %10304 = vmatpush3.bf16.msra.mxu0 %v7132_v10  ;;  %10305 = vmatprep.mubr.msk.bf16.mxu0 %vm2013_vm3, %v12974_v2  ;;  %v11009_v2 = vld [vmem:[#allocation46 + $0x80] sm:$0xff]   ;;  %v11038_v10 = vld [vmem:[#allocation46 + $0x150] sm:$0xff]  }
0x1a2f   :  { %10462 = vmatprep.subr.msk.bf16.mxu0 %vm2017_vm2, %v7187_v38 }
0x1a39   :  { %10306 = vmatmul.mubr.msk.bf16.vlgmr.msra.gmra.mrb[120].mxu0 %vm2013_vm3, %v12981_v16  ;;  %v11011_v16 = vld [vmem:[#allocation46 + $0xc8] sm:$0xff]  }
0x1a3a   :  { %10310 = vmatpush3.bf16.msra.mxu0 %v7189_v39  ;;  %10311 = vmatprep.mubr.msk.bf16.mxu0 %vm2013_vm3, %v12986_v7  ;;  %v11013_v7 = vld [vmem:[#allocation46 + $0x88] sm:$0xff]  }
0x1a3b   :  { %10339 = vmatprep.subr.bf16.mxu0 %v13051_v26 }
0x1a45   :  { %10312 = vmatmul.mubr.msk.bf16.vlgmr.msra.gmra.mrb[120].mxu0 %vm2013_vm3, %v12992_v14  ;;  %v11015_v14 = vld [vmem:[#allocation46 + $0xd0] sm:$0xff]  }
0x1a46   :  { %10340 = vmatpush3.bf16.msra.mxu0 %v13051_v26  ;;  %10343 = vmatprep.mubr.msk.bf16.mxu0 %vm648_vm0, %v13110_v37 }
0x1a47   :  { %10341 = vmatprep.subr.bf16.mxu0 %v13049_v25 }
0x1a4a   :  { %10342 = vmatpush3.bf16.msra.mxu0 %v13049_v25 }
0x1a4b   :  { %9751 = vmatprep.subr.bf16.mxu0 %v11007_v11 }
0x1a4d   :  { %10344 = vmatmul.mubr.msk.bf16.vlgmr.msra.gmra.mrb[124].mxu0 %vm648_vm0, %v13116_v61 }
0x1a4e   :  { %7928 = vmatprep.mubr.bf16.mxu0 %v13051_v26  ;;  %9752 = vmatpush3.bf16.msra.mxu0 %v11009_v2 }
0x1a4f   :  { %9753 = vmatprep.subr.bf16.mxu0 %v11011_v16  ;;  %v11039_v16 = vld [vmem:[#allocation46 + $0x110] sm:$0xff]  }
0x1a52   :  { %9754 = vmatpush3.bf16.msra.mxu0 %v11013_v7  ;;  %v11040_v7 = vld [vmem:[#allocation46 + $0x158] sm:$0xff]  }
0x1a53   :  { %9755 = vmatprep.subr.bf16.mxu0 %v11015_v14  ;;  %v11041_v14 = vld [vmem:[#allocation46 + $0x118] sm:$0xff]  }
0x1a56   :  { %9756 = vmatpush3.bf16.msra.mxu0 %v11017_v63 }
0x1a57   :  { %9757 = vmatprep.subr.bf16.mxu0 %v11019_v60  ;;  %v11042_v60 = vld [vmem:[#allocation46 + $0x160] sm:$0xff]  }
0x1a5a   :  { %9758 = vmatpush3.bf16.msra.mxu0 %v11021_v48 }
0x1a5b   :  { %9759 = vmatprep.subr.bf16.mxu0 %v11023_v0 }
0x1a5e   :  { %9760 = vmatpush3.bf16.msra.mxu0 %v11025_v1 }
0x1a5f   :  { %9761 = vmatprep.subr.bf16.mxu0 %v11027_v30 }
0x1a62   :  { %9762 = vmatpush3.bf16.msra.mxu0 %v11029_v32 }
0x1a63   :  { %9763 = vmatprep.subr.bf16.mxu0 %v11030_v34 }
0x1a66   :  { %9764 = vmatpush3.bf16.msra.mxu0 %v11032_v36 }
0x1a67   :  { %9765 = vmatprep.subr.bf16.mxu0 %v11034_v53 }
0x1a6a   :  { %9766 = vmatpush3.bf16.msra.mxu0 %v11036_v62 }
0x1b18   :  { %v10313_v23 = vpop.f32.mrb[120].mxu0 }
0x1b19   :  { %v7225_v43 = vpop.f32.mrb[121].mxu0 }
0x1b1a   :  { %v10314_v4 = vpop.f32.mrb[122].mxu0 }
0x1b1b   :  { %v13121_v12 = vpack.c.bf16 %v10314_v4, %v10313_v23  ;;  %v7228_v3 = vpop.f32.mrb[123].mxu0 }
0x1b1c   :  { %v13123_v40 = vpack.c.bf16 %v7228_v3, %v7225_v43  ;;  %v11043_v43 = vld [vmem:[#allocation46 + $0x120] sm:$0xff]   ;;  %v11044_v3 = vld [vmem:[#allocation46 + $0x168] sm:$0xff]  }
0x1b1e   :  { %10315 = vmatprep.subr.bf16.mxu1 %v13123_v40 }
0x1b1f   :  { %10316 = vmatpush3.bf16.msra.mxu1 %v13123_v40 }
0x1b20   :  { %10317 = vmatprep.subr.bf16.mxu1 %v13121_v12  ;;  %v13149_v42 = vpop.f32.mrb[124].mxu0 }
0x1b21   :  { %v7439_v45 = vpop.f32.mrb[125].mxu0 }
0x1b22   :  { %v10346_v46 = vpop.f32.mrb[126].mxu0 }
0x1b23   :  { %10318 = vmatpush3.bf16.msra.mxu1 %v13121_v12  ;;  %v7455_v49 = vpack.c.bf16 %v10346_v46, %v13149_v42  ;;  %v7442_v50 = vpop.f32.mrb[127].mxu0 }
0x1b24   :  { %10323 = vmatprep.subr.bf16.mxu1 %v13123_v40  ;;  %v7454_v51 = vpack.c.bf16 %v7442_v50, %v7439_v45 }
0x1b26   :  { %10320 = vmatmul.mubr.msk.bf16.vlgmr.msra.gmra.mrb[132].mxu1 %vm648_vm0, %v13130_v18 }
0x1b27   :  { %10324 = vmatpush3.bf16.msra.mxu1 %v13123_v40  ;;  %10327 = vmatprep.mubr.msk.bf16.mxu1 %vm648_vm0, %v13110_v37 }
0x1b28   :  { %10325 = vmatprep.subr.bf16.mxu1 %v13121_v12 }
0x1b2b   :  { %10326 = vmatpush3.bf16.msra.mxu1 %v13121_v12 }
0x1b2c   :  { %10331 = vmatprep.subr.bf16.mxu1 %v13051_v26 }
0x1b2e   :  { %10328 = vmatmul.mubr.msk.bf16.vlgmr.msra.gmra.mrb[136].mxu1 %vm648_vm0, %v13116_v61 }
0x1b2f   :  { %10332 = vmatpush3.bf16.msra.mxu1 %v13051_v26  ;;  %10335 = vmatprep.mubr.msk.bf16.mxu1 %vm648_vm0, %v13078_v33  ;;  %v11008_v26 = vld [vmem:[#allocation46 + $0x10] sm:$0xff]  }
0x1b30   :  { %10333 = vmatprep.subr.bf16.mxu1 %v13049_v25 }
0x1b33   :  { %10334 = vmatpush3.bf16.msra.mxu1 %v13049_v25 }
0x1b34   :  { %9723 = vmatprep.subr.bf16.mxu1 %v11002_v13  ;;  %v11048_v13 = vld [vmem:[#allocation46 + $0x178] sm:$0xff]  }
0x1b36   :  { %10336 = vmatmul.mubr.msk.bf16.vlgmr.msra.gmra.mrb[140].mxu1 %vm648_vm0, %v13130_v18 }
0x1b37   :  { %9724 = vmatpush3.bf16.msra.mxu1 %v11003_v20  ;;  %v11049_v20 = vld [vmem:[#allocation46 + $0x138] sm:$0xff]  }
0x1b38   :  { %9725 = vmatprep.subr.bf16.mxu1 %v11004_v21  ;;  %v11055_v21 = vld [vmem:[#allocation48 + $0x80] sm:$0xff]  }
0x1b3b   :  { %9726 = vmatpush3.bf16.msra.mxu1 %v11005_v22  ;;  %v11058_v22 = vld [vmem:[#allocation48 + $0x88] sm:$0xff]  }
0x1b3c   :  { %9727 = vmatprep.subr.bf16.mxu1 %v11006_v17  ;;  %v11064_v17 = vld [vmem:[#allocation48 + $0x98] sm:$0xff]  }
0x1b3f   :  { %9728 = vmatpush3.bf16.msra.mxu1 %v11008_v26  ;;  %v11067_v26 = vld [vmem:[#allocation48 + $0xa0] sm:$0xff]  }
0x1b40   :  { %9729 = vmatprep.subr.bf16.mxu1 %v11010_v24 }
0x1b43   :  { %9730 = vmatpush3.bf16.msra.mxu1 %v11012_v19 }
0x1b44   :  { %9731 = vmatprep.subr.bf16.mxu1 %v11014_v15 }
0x1b47   :  { %9732 = vmatpush3.bf16.msra.mxu1 %v11016_v44 }
0x1b48   :  { %9733 = vmatprep.subr.bf16.mxu1 %v11018_v27 }
0x1b4b   :  { %9734 = vmatpush3.bf16.msra.mxu1 %v11020_v29 }
0x1b4c   :  { %9735 = vmatprep.subr.bf16.mxu1 %v11022_v28  ;;  %v9098_v28 = vld [vmem:[#allocation43] ss:$0 sm:$0xff] }
0x1b4f   :  { %9736 = vmatpush3.bf16.msra.mxu1 %v11024_v41 }
0x1b50   :  { %9737 = vmatprep.subr.bf16.mxu1 %v11026_v47 }
0x1b53   :  { %9738 = vmatpush3.bf16.msra.mxu1 %v11028_v31 }
0x1b54   :  { %9779 = vmatprep.subr.bf16.mxu1 %v11031_v35 }
0x1bf9   :  { %v10321_v55 = vpop.f32.mrb[132].mxu1 }
0x1bfa   :  { %v7284_v52 = vpop.f32.mrb[133].mxu1 }
0x1bfb   :  { %v10322_v54 = vpop.f32.mrb[134].mxu1 }
0x1bfc   :  { %v7300_v56 = vpack.c.bf16 %v10322_v54, %v10321_v55  ;;  %v7287_v57 = vpop.f32.mrb[135].mxu1 }
0x1bfd   :  { %v7299_v58 = vpack.c.bf16 %v7287_v57, %v7284_v52 }
0x1bff   :  { %7879 = vmatprep.mubr.bf16.mxu1 %v7299_v58 }
0x1c00   :  { %7880 = vmatmul.mubr.bf16.vlgmr.msra.gmra.mrb[144].mxu1 %v13123_v40  ;;  %v11047_v40 = vld [vmem:[#allocation46 + $0x130] sm:$0xff]  }
0x1c01   :  { %9780 = vmatpush3.bf16.msra.mxu1 %v11033_v8  ;;  %v10329_v6 = vpop.f32.mrb[136].mxu1  ;;  %7887 = vmatprep.mubr.bf16.mxu1 %v7300_v56 }
0x1c02   :  { %v7335_v59 = vpop.f32.mrb[137].mxu1  ;;  %9781 = vmatprep.subr.bf16.mxu1 %v11035_v5 }
0x1c03   :  { %v10330_v38 = vpop.f32.mrb[138].mxu1 }
0x1c04   :  { %v7351_v39 = vpack.c.bf16 %v10330_v38, %v10329_v6  ;;  %v7338_v11 = vpop.f32.mrb[139].mxu1 }
0x1c05   :  { %v7350_v2 = vpack.c.bf16 %v7338_v11, %v7335_v59  ;;  %9782 = vmatpush3.bf16.msra.mxu1 %v11037_v9 }
0x1c06   :  { %9783 = vmatprep.subr.bf16.mxu1 %v11038_v10 }
0x1c07   :  { %7929 = vmatmul.mubr.bf16.vlgmr.msra.gmra.mrb[128].mxu0 %v7350_v2 }
0x1c08   :  { %7888 = vmatmul.mubr.bf16.gmra.mrb[148].mxu1 %v13121_v12  ;;  %7936 = vmatprep.mubr.bf16.mxu0 %v13049_v25  ;;  %v11045_v25 = vld [vmem:[#allocation46 + $0x128] sm:$0xff]   ;;  %v11046_v12 = vld [vmem:[#allocation46 + $0x170] sm:$0xff]  }
0x1c09   :  { %9784 = vmatpush3.bf16.msra.mxu1 %v11039_v16  ;;  %v10337_v63 = vpop.f32.mrb[140].mxu1  ;;  %7977 = vmatprep.mubr.bf16.mxu1 %v7454_v51 }
0x1c0a   :  { %9785 = vmatprep.subr.bf16.mxu1 %v11040_v7  ;;  %v7388_v48 = vpop.f32.mrb[141].mxu1 }
0x1c0b   :  { %v10338_v0 = vpop.f32.mrb[142].mxu1 }
0x1c0c   :  { %v7404_v1 = vpack.c.bf16 %v10338_v0, %v10337_v63  ;;  %v7391_v23 = vpop.f32.mrb[143].mxu1 }
0x1c0d   :  { %9786 = vmatpush3.bf16.msra.mxu1 %v11041_v14  ;;  %v7403_v4 = vpack.c.bf16 %v7391_v23, %v7388_v48 }
0x1c0e   :  { %9787 = vmatprep.subr.bf16.mxu1 %v11042_v60 }
0x1c0f   :  { %7937 = vmatmul.mubr.bf16.gmra.mrb[132].mxu0 %v7351_v39 }
0x1c10   :  { %10351 = vmatprep.mubr.msk.bf16.mxu0 %vm648_vm0, %v13078_v33  ;;  %v11061_v33 = vld [vmem:[#allocation48 + $0x90] sm:$0xff]  }
0x1c11   :  { %9788 = vmatpush3.bf16.msra.mxu1 %v11043_v43 }
0x1c12   :  { %9789 = vmatprep.subr.bf16.mxu1 %v11044_v3 }
0x1c15   :  { %9790 = vmatpush3.bf16.msra.mxu1 %v11045_v25 }
0x1c16   :  { %9791 = vmatprep.subr.bf16.mxu1 %v11046_v12 }
0x1c19   :  { %9792 = vmatpush3.bf16.msra.mxu1 %v11047_v40 }
0x1c1a   :  { %9793 = vmatprep.subr.bf16.mxu1 %v11048_v13 }
0x1c1d   :  { %9794 = vmatpush3.bf16.msra.mxu1 %v11049_v20  ;;  %v11050_v20 = vld [vmem:[#allocation48 + $0x40] sm:$0xff]  }
0x1c1e   :  { %10363 = vmatprep.subr.bf16.mxu1 %v11055_v21 }
0x1c20   :  { %7978 = vmatmul.mubr.bf16.vlgmr.msra.gmra.mrb[152].mxu1 %v7403_v4 }
0x1c21   :  { %7985 = vmatprep.mubr.bf16.mxu1 %v7455_v49  ;;  %10364 = vmatpush3.bf16.msra.mxu1 %v11055_v21  ;;  %v11051_v21 = vld [vmem:[#allocation48] sm:$0xff]  }
0x1c22   :  { %10365 = vmatprep.subr.bf16.mxu1 %v11058_v22 }
0x1c25   :  { %10366 = vmatpush3.bf16.msra.mxu1 %v11058_v22  ;;  %v11052_v22 = vld [vmem:[#allocation48 + $0x48] sm:$0xff]  }
0x1c26   :  { %10367 = vmatprep.subr.bf16.mxu1 %v11061_v33 }
0x1c28   :  { %7986 = vmatmul.mubr.bf16.gmra.mrb[156].mxu1 %v7404_v1 }
0x1c29   :  { %10368 = vmatpush3.bf16.msra.mxu1 %v11061_v33  ;;  %v11053_v33 = vld [vmem:[#allocation48 + $0x8] sm:$0xff]  }
0x1c2a   :  { %10369 = vmatprep.subr.bf16.mxu1 %v11064_v17 }
0x1c2d   :  { %10370 = vmatpush3.bf16.msra.mxu1 %v11064_v17  ;;  %v11056_v17 = vld [vmem:[#allocation48 + $0x10] sm:$0xff]  }
0x1c2e   :  { %10371 = vmatprep.subr.bf16.mxu1 %v11067_v26 }
0x1c31   :  { %10372 = vmatpush3.bf16.msra.mxu1 %v11067_v26  ;;  %v11057_v26 = vld [vmem:[#allocation48 + $0x58] sm:$0xff]  }
0x1cd3   :  { %v9739_v24 = vpop.f32.mrb[144].mxu1 }
0x1cd4   :  { %v9740_v19 = vpop.f32.mrb[145].mxu1 }
0x1cd5   :  { %v9741_v15 = vadd.f32 %v9740_v19, %v9739_v24  ;;  %v9742_v44 = vpop.f32.mrb[146].mxu1  ;;  %v11060_v24 = vld [vmem:[#allocation48 + $0x60] sm:$0xff]  }
0x1cd6   :  { %v9743_v27 = vpop.f32.mrb[147].mxu1  ;;  %v11062_v19 = vld [vmem:[#allocation48 + $0x20] sm:$0xff]  }
0x1cd7   :  { %v9744_v29 = vadd.f32 %v9743_v27, %v9742_v44  ;;  %v7882_v31 = vadd.f32 %v9741_v15, %v9098_v28  ;;  %v11063_v15 = vld [vmem:[#allocation48 + $0x68] sm:$0xff]   ;;  %v11068_v27 = vld [vmem:[#allocation48 + $0x30] sm:$0xff]  }
0x1cd8   :  { %v11065_v44 = vld [vmem:[#allocation48 + $0x28] sm:$0xff]  }
0x1cd9   :  { %v7885_v42 = vadd.f32 %v9744_v29, %v9098_v28  ;;  %v11069_v29 = vld [vmem:[#allocation48 + $0x78] sm:$0xff]  }
0x1cda   :  { %v9767_v41 = vpop.f32.mrb[128].mxu0 }
0x1cdb   :  { %v9745_v47 = vpop.f32.mrb[148].mxu1  ;;  %v9768_v30 = vpop.f32.mrb[129].mxu0 }
0x1cdc   :  { %v9769_v32 = vadd.f32 %v9768_v30, %v9767_v41  ;;  %v9746_v34 = vpop.f32.mrb[149].mxu1  ;;  %v9770_v35 = vpop.f32.mrb[130].mxu0  ;;  %v11071_v41 = vld [vmem:[#allocation48 + $0x38] sm:$0xff]  }
0x1cdd   :  { %v9747_v36 = vadd.f32 %v9746_v34, %v9745_v47  ;;  %v9748_v53 = vpop.f32.mrb[150].mxu1  ;;  %v9771_v62 = vpop.f32.mrb[131].mxu0  ;;  %v11072_v47 = vld [vmem:[#allocation48 + $0xb0] sm:$0xff]   ;;  %v11073_v30 = vld [vmem:[#allocation48 + $0xb8] sm:$0xff]  }
0x1cde   :  { %v7931_v45 = vadd.f32 %v9769_v32, %v7882_v31  ;;  %v9772_v46 = vadd.f32 %v9771_v62, %v9770_v35  ;;  %v9749_v49 = vpop.f32.mrb[151].mxu1  ;;  %v11074_v31 = vld [vmem:[#allocation16] sm:$0xff]  }
0x1cdf   :  { %v9750_v50 = vadd.f32 %v9749_v49, %v9748_v53  ;;  %v7890_v54 = vadd.f32 %v9747_v36, %v9098_v28  ;;  %v11076_v49 = vld [vmem:[#allocation16 + $0x10] sm:$0xff]  }
0x1ce0   :  { %v7934_v51 = vadd.f32 %v9772_v46, %v7885_v42  ;;  %v11075_v42 = vld [vmem:[#allocation16 + $0x8] sm:$0xff]  }
0x1ce1   :  { %v7893_v8 = vadd.f32 %v9750_v50, %v9098_v28  ;;  %v11070_v28 = vld [vmem:[#allocation48 + $0xa8] sm:$0xff]  }
0x1ce2   :  { %v9773_v55 = vpop.f32.mrb[132].mxu0  ;;  %10373 = vmatprep.subr.bf16.mxu1 %v11070_v28 }
0x1ce3   :  { %v9774_v52 = vpop.f32.mrb[133].mxu0  ;;  %10374 = vmatpush3.bf16.msra.mxu1 %v11070_v28 }
0x1ce4   :  { %v9775_v56 = vadd.f32 %v9774_v52, %v9773_v55  ;;  %v9776_v57 = vpop.f32.mrb[134].mxu0  ;;  %10375 = vmatprep.subr.bf16.mxu1 %v11072_v47 }
0x1ce5   :  { %v9777_v58 = vpop.f32.mrb[135].mxu0 }
0x1ce6   :  { %v7939_v5 = vadd.f32 %v9775_v56, %v7890_v54  ;;  %v9778_v6 = vadd.f32 %v9777_v58, %v9776_v57  ;;  %v11077_v54 = vld [vmem:[#allocation16 + $0x18] sm:$0xff]   ;;  %v11078_v56 = vld [vmem:[#allocation16 + $0x20] sm:$0xff]   ;;  %v11079_v57 = vld [vmem:[#allocation16 + $0x28] sm:$0xff]  }
0x1ce7   :  { %10376 = vmatpush3.bf16.msra.mxu1 %v11072_v47  ;;  %v11080_v58 = vld [vmem:[#allocation16 + $0x30] sm:$0xff]  }
0x1ce8   :  { %v7942_v9 = vadd.f32 %v9778_v6, %v7893_v8  ;;  %10377 = vmatprep.subr.bf16.mxu1 %v11073_v30  ;;  %v11081_v8 = vld [vmem:[#allocation16 + $0x38] sm:$0xff]  }
0x1ceb   :  { %10378 = vmatpush3.bf16.msra.mxu1 %v11073_v30 }
0x1cf3   :  { %v9795_v59 = vpop.f32.mrb[152].mxu1 }
0x1cf4   :  { %v9796_v10 = vpop.f32.mrb[153].mxu1 }
0x1cf5   :  { %v9797_v38 = vadd.f32 %v9796_v10, %v9795_v59  ;;  %v9798_v39 = vpop.f32.mrb[154].mxu1 }
0x1cf6   :  { %v9799_v11 = vpop.f32.mrb[155].mxu1 }
0x1cf7   :  { %v7980_v2 = vadd.f32 %v9797_v38, %v7931_v45  ;;  %v9800_v16 = vadd.f32 %v9799_v11, %v9798_v39  ;;  %v9151_v39 = vld [vmem:[#allocation45] ss:$0 sm:$0xff] }
0x1cf9   :  { %v7983_v7 = vadd.f32 %v9800_v16, %v7934_v51  ;;  %v7994_v14 = vmax.f32 %v7980_v2, 0.0 }
0x1cfb   :  { %v7995_v63 = vmax.f32 %v7983_v7, 0.0  ;;  %v9801_v60 = vpop.f32.mrb[156].mxu1 }
0x1cfc   :  { %v9802_v48 = vpop.f32.mrb[157].mxu1 }
0x1cfd   :  { %v13157_v0 = vpack.c.bf16 %v7995_v63, %v7994_v14  ;;  %v9803_v1 = vadd.f32 %v9802_v48, %v9801_v60  ;;  %v9804_v23 = vpop.f32.mrb[158].mxu1 }
0x1cfe   :  { %v9805_v43 = vpop.f32.mrb[159].mxu1 }
0x1cff   :  { %v7988_v4 = vadd.f32 %v9803_v1, %v7939_v5  ;;  %v9806_v3 = vadd.f32 %v9805_v43, %v9804_v23  ;;  %10347 = vmatprep.subr.bf16.mxu0 %v13157_v0 }
0x1d00   :  { %10348 = vmatpush3.bf16.msra.mxu0 %v13157_v0 }
0x1d01   :  { %v7991_v25 = vadd.f32 %v9806_v3, %v7942_v9  ;;  %v7996_v12 = vmax.f32 %v7988_v4, 0.0 }
0x1d03   :  { %v7997_v40 = vmax.f32 %v7991_v25, 0.0 }
0x1d05   :  { %v13161_v13 = vpack.c.bf16 %v7997_v40, %v7996_v12 }
0x1d07   :  { %10349 = vmatprep.subr.bf16.mxu0 %v13161_v13 }
0x1d08   :  { %10350 = vmatpush3.bf16.msra.mxu0 %v13161_v13 }
0x1d09   :  { %10355 = vmatprep.subr.bf16.mxu0 %v13157_v0 }
0x1d0b   :  { %10352 = vmatmul.mubr.msk.bf16.vlgmr.msra.gmra.mrb[136].mxu0 %vm648_vm0, %v13130_v18  ;;  %v11054_v18 = vld [vmem:[#allocation48 + $0x50] sm:$0xff]  }
0x1d0c   :  { %10356 = vmatpush3.bf16.msra.mxu0 %v13157_v0  ;;  %10359 = vmatprep.mubr.msk.bf16.mxu0 %vm648_vm0, %v13110_v37  ;;  %v11059_v37 = vld [vmem:[#allocation48 + $0x18] sm:$0xff]  }
0x1d0d   :  { %10357 = vmatprep.subr.bf16.mxu0 %v13161_v13 }
0x1d10   :  { %10358 = vmatpush3.bf16.msra.mxu0 %v13161_v13 }
0x1d11   :  { %9815 = vmatprep.subr.bf16.mxu0 %v11050_v20 }
0x1d13   :  { %10360 = vmatmul.mubr.msk.bf16.vlgmr.msra.gmra.mrb[140].mxu0 %vm648_vm0, %v13116_v61  ;;  %v11066_v61 = vld [vmem:[#allocation48 + $0x70] sm:$0xff]  }
0x1d14   :  { %9816 = vmatpush3.bf16.msra.mxu0 %v11051_v21 }
0x1d15   :  { %9817 = vmatprep.subr.bf16.mxu0 %v11052_v22 }
0x1d18   :  { %9818 = vmatpush3.bf16.msra.mxu0 %v11053_v33 }
0x1d19   :  { %9819 = vmatprep.subr.bf16.mxu0 %v11054_v18 }
0x1d1c   :  { %9820 = vmatpush3.bf16.msra.mxu0 %v11056_v17 }
0x1d1d   :  { %9821 = vmatprep.subr.bf16.mxu0 %v11057_v26  ;;  %v9176_v26 = vld [vmem:[#allocation15] ss:$0 sm:$0xff] }
0x1d20   :  { %9822 = vmatpush3.bf16.msra.mxu0 %v11059_v37 }
0x1d21   :  { %9823 = vmatprep.subr.bf16.mxu0 %v11060_v24 }
0x1d24   :  { %9824 = vmatpush3.bf16.msra.mxu0 %v11062_v19 }
0x1d25   :  { %9825 = vmatprep.subr.bf16.mxu0 %v11063_v15 }
0x1d28   :  { %9826 = vmatpush3.bf16.msra.mxu0 %v11065_v44 }
0x1d29   :  { %9827 = vmatprep.subr.bf16.mxu0 %v11066_v61 }
0x1d2c   :  { %9828 = vmatpush3.bf16.msra.mxu0 %v11068_v27 }
0x1d2d   :  { %9829 = vmatprep.subr.bf16.mxu0 %v11069_v29 }
0x1d30   :  { %9830 = vmatpush3.bf16.msra.mxu0 %v11071_v41 }
0x1d31   :  { %10383 = vmatprep.subr.bf16.mxu0 %v11074_v31 }
0x1dde   :  { %v10353_v32 = vpop.f32.mrb[136].mxu0 }
0x1ddf   :  { %v8034_v34 = vpop.f32.mrb[137].mxu0 }
0x1de0   :  { %v10354_v35 = vpop.f32.mrb[138].mxu0 }
0x1de1   :  { %v8050_v36 = vpack.c.bf16 %v10354_v35, %v10353_v32  ;;  %v8037_v53 = vpop.f32.mrb[139].mxu0 }
0x1de2   :  { %v8049_v62 = vpack.c.bf16 %v8037_v53, %v8034_v34 }
0x1de4   :  { %8333 = vmatprep.mubr.bf16.mxu0 %v8049_v62 }
0x1de5   :  { %8334 = vmatmul.mubr.bf16.vlgmr.msra.gmra.mrb[144].mxu0 %v13157_v0 }
0x1de6   :  { %v10361_v45 = vpop.f32.mrb[140].mxu0  ;;  %8341 = vmatprep.mubr.bf16.mxu0 %v8050_v36  ;;  %10384 = vmatpush3.bf16.msra.mxu0 %v11074_v31 }
0x1de7   :  { %v8085_v46 = vpop.f32.mrb[141].mxu0  ;;  %10385 = vmatprep.subr.bf16.mxu0 %v11075_v42 }
0x1de8   :  { %v10362_v50 = vpop.f32.mrb[142].mxu0 }
0x1de9   :  { %v8101_v51 = vpack.c.bf16 %v10362_v50, %v10361_v45  ;;  %v8088_v55 = vpop.f32.mrb[143].mxu0 }
0x1dea   :  { %v8100_v52 = vpack.c.bf16 %v8088_v55, %v8085_v46  ;;  %10386 = vmatpush3.bf16.msra.mxu0 %v11075_v42 }
0x1deb   :  { %10387 = vmatprep.subr.bf16.mxu0 %v11076_v49 }
0x1dec   :  { %10379 = vmatprep.mubr.bf16.mxu1 %v8100_v52 }
0x1ded   :  { %8342 = vmatmul.mubr.bf16.gmra.mrb[148].mxu0 %v13161_v13  ;;  %10380 = vmatmul.mubr.bf16.vlgmr.msra.gmra.mrb[160].mxu1 %v8101_v51 }
0x1dee   :  { %10388 = vmatpush3.bf16.msra.mxu0 %v11076_v49 }
0x1def   :  { %10389 = vmatprep.subr.bf16.mxu0 %v11077_v54 }
0x1df2   :  { %10390 = vmatpush3.bf16.msra.mxu0 %v11077_v54 }
0x1df3   :  { %10391 = vmatprep.subr.bf16.mxu0 %v11078_v56 }
0x1df6   :  { %10392 = vmatpush3.bf16.msra.mxu0 %v11078_v56 }
0x1df7   :  { %10393 = vmatprep.subr.bf16.mxu0 %v11079_v57 }
0x1dfa   :  { %10394 = vmatpush3.bf16.msra.mxu0 %v11079_v57 }
0x1dfb   :  { %10395 = vmatprep.subr.bf16.mxu0 %v11080_v58 }
0x1dfe   :  { %10396 = vmatpush3.bf16.msra.mxu0 %v11080_v58 }
0x1dff   :  { %10397 = vmatprep.subr.bf16.mxu0 %v11081_v8 }
0x1e02   :  { %10398 = vmatpush3.bf16.msra.mxu0 %v11081_v8 }
0x1eb8   :  { %v9831_v5 = vpop.f32.mrb[144].mxu0 }
0x1eb9   :  { %v9832_v6 = vpop.f32.mrb[145].mxu0 }
0x1eba   :  { %v9833_v9 = vadd.f32 %v9832_v6, %v9831_v5  ;;  %v9834_v59 = vpop.f32.mrb[146].mxu0 }
0x1ebb   :  { %v9835_v10 = vpop.f32.mrb[147].mxu0 }
0x1ebc   :  { %v9836_v38 = vadd.f32 %v9835_v10, %v9834_v59  ;;  %v8336_v16 = vadd.f32 %v9833_v9, %v9151_v39 }
0x1ebe   :  { %v8339_v1 = vadd.f32 %v9836_v38, %v9151_v39 }
0x1ec0   :  { %v9837_v11 = vpop.f32.mrb[148].mxu0  ;;  %v10381_v2 = vpop.f32.mrb[160].mxu1 }
0x1ec1   :  { %v9838_v7 = vpop.f32.mrb[149].mxu0  ;;  %v8384_v14 = vpop.f32.mrb[161].mxu1 }
0x1ec2   :  { %v9839_v63 = vadd.f32 %v9838_v7, %v9837_v11  ;;  %v8385_v60 = vadd.f32 %v8384_v14, %v8336_v16  ;;  %v9840_v48 = vpop.f32.mrb[150].mxu0  ;;  %v10382_v0 = vpop.f32.mrb[162].mxu1 }
0x1ec3   :  { %v9841_v23 = vpop.f32.mrb[151].mxu0  ;;  %v8387_v43 = vpop.f32.mrb[163].mxu1 }
0x1ec4   :  { %v8344_v4 = vadd.f32 %v9839_v63, %v9151_v39  ;;  %v9842_v3 = vadd.f32 %v9841_v23, %v9840_v48  ;;  %v8388_v25 = vadd.f32 %v8387_v43, %v8339_v1  ;;  %v8399_v40 = vmax.f32 %v8385_v60, 0.0 }
0x1ec6   :  { %v8393_v12 = vadd.f32 %v10381_v2, %v8344_v4  ;;  %v8347_v13 = vadd.f32 %v9842_v3, %v9151_v39  ;;  %v8400_v20 = vmax.f32 %v8388_v25, 0.0 }
0x1ec8   :  { %v8396_v21 = vadd.f32 %v10382_v0, %v8347_v13  ;;  %v8403_v22 = vpack.c.bf16 %v8400_v20, %v8399_v40  ;;  %v8401_v33 = vmax.f32 %v8393_v12, 0.0 }
0x1eca   :  { %v8402_v18 = vmax.f32 %v8396_v21, 0.0  ;;  %10399 = vmatprep.mubr.bf16.mxu0 %v8403_v22 }
0x1ecc   :  { %v8404_v17 = vpack.c.bf16 %v8402_v18, %v8401_v33 }
0x1ece   :  { %10400 = vmatmul.mubr.bf16.vlgmr.msra.gmra.mrb[152].mxu0 %v8404_v17 }
0x1fa1   :  { %v10401_v37 = vpop.f32.mrb[152].mxu0 }
0x1fa2   :  { %v8519_v24 = vadd.f32 %v10401_v37, %v9176_v26  ;;  %v8510_v19 = vpop.f32.mrb[153].mxu0 }
0x1fa3   :  { %v8511_v15 = vadd.f32 %v9176_v26, %v8510_v19  ;;  %v10402_v44 = vpop.f32.mrb[154].mxu0 }
0x1fa4   :  { %8527 = vst [vmem:[%s12262_s17 + $0x10] sm:$0xff] %v8519_v24  ;;  %v8522_v61 = vadd.f32 %v10402_v44, %v9176_v26  ;;  %v8513_v27 = vpop.f32.mrb[155].mxu0 }
0x1fa5   :  { %8525 = vst [vmem:[%s12262_s17] sm:$0xff] %v8511_v15  ;;  %v8514_v29 = vadd.f32 %v9176_v26, %v8513_v27 }
0x1fa6   :  { %8528 = vst [vmem:[%s12262_s17 + $0x18] sm:$0xff] %v8522_v61 }
0x1fa7   :  { %8526 = vst [vmem:[%s12262_s17 + $0x8] sm:$0xff] %v8514_v29 }
0x1fa8   :  { %8533 = vsyncpa [#allocation3], 1 }
0x1fa9   :  { %8534 = vsyncpa [#allocation5], 1 }
0x1faa   :  { %8535 = vsyncpa [#allocation8], 1 }
0x1fab   :  { %8536 = vsyncpa [#allocation11], 1 }
0x1fac   :  { %8537 = vsyncpa [#allocation14], 1 }
0x1fad   :  { %8538 = vsyncpa [#allocation17], 1 }
0x1fae   :  { %8539 = vsyncpa [#allocation20], 1 }
0x1faf   :  { %8540 = vsyncpa [#allocation23], 1 }
0x1fb0   :  { %8541 = vsyncpa [#allocation26], 1 }
0x1fb1   :  { %8542 = vsyncpa [#allocation29], 1 }
0x1fb2   :  { %8543 = vsyncpa [#allocation32], 1 }
0x1fb3   :  { %8544 = vsyncpa [#allocation35], 1 }
0x1fb4   :  { %8545 = vsyncpa [#allocation38], 1 }
0x1fb5   :  { %8546 = vsyncpa [#allocation41], 1 }
0x1fb6   :  { %8547 = vsyncpa [#allocation44], 1 }
0x1fb7   :  { %8548 = vsyncpa [#allocation47], 1 }
0x1fb8   :  { %8549 = vsyncpa [#allocation50], 1 }
0x1fb9   :  { %8550 = vsyncpa [#allocation53], 1 }

</bundles_post_ra>
